<compile_context>
chip_gen: v7x
topology: tpu7x:2x2x1
jax: 0.10.0
libtpu: 0.0.40
codegen_flags: <defaults>
</compile_context>

<pallas_src>
import functools

import jax
import jax.numpy as jnp
from jax import lax
from jax.experimental import pallas as pl
from jax.experimental.pallas import tpu as pltpu


def _resblock_kernel(x_top_ref, x_mid_ref, x_bot_ref,
                     w1_ref, b1_ref, w2r_ref, b2_ref, w3_ref, b3_ref,
                     alpha_ref, o_ref, t_ref, *, res_scale):
    TH = x_mid_ref.shape[1]          # rows in this tile
    W = x_mid_ref.shape[2]
    C = x_mid_ref.shape[3]
    C4 = w1_ref.shape[1]
    f32 = jnp.float32

    a = alpha_ref[0]                 # shared PReLU slope (SMEM scalar)
    w1 = w1_ref[...]
    b1 = b1_ref[...]

    def conv1_prelu(rows):           # (P, C) -> (P, C4), f32 accumulation
        v = jnp.dot(rows, w1, preferred_element_type=f32) + b1
        return jnp.where(v > 0, v, a * v)

    # ---- 1x1 conv (C -> C4) + PReLU, staged into the VMEM scratch ---------
    # (TH,W) merges into the sublane axis; layout-free when W % 8 == 0.
    xm = x_mid_ref[0]                                        # (TH, W, C)
    t_ref[1:TH + 1] = conv1_prelu(xm.reshape(TH * W, C)).reshape(TH, W, C4)

    i = pl.program_id(1)
    last = pl.num_programs(1) - 1

    # Halo rows: conv1 of the neighbouring image row, or zeros at the image
    # border.  Zero padding must be applied to the FEATURE map t, not to x,
    # because conv1(0) + b1 != 0.
    @pl.when(i > 0)
    def _():
        t_ref[0] = conv1_prelu(x_top_ref[0, 0])

    @pl.when(i == 0)
    def _():
        t_ref[0] = jnp.zeros((W, C4), f32)

    @pl.when(i < last)
    def _():
        t_ref[TH + 1] = conv1_prelu(x_bot_ref[0, 0])

    @pl.when(i == last)
    def _():
        t_ref[TH + 1] = jnp.zeros((W, C4), f32)

    # ---- 3x3 conv (C4 -> C4, SAME) + PReLU: one MXU matmul with K=9*C4 ----
    t = t_ref[...]                                           # (TH+2, W, C4)
    zcol = jnp.zeros((TH + 2, 1, C4), f32)
    tp = jnp.concatenate([zcol, t, zcol], axis=1)            # (TH+2, W+2, C4)
    # TODO(synk): replace the zero-column pad + shifted slices with
    # pltpu.roll(..., axis=1) (XLU sublane rotate) + an edge mask.
    win9 = jnp.concatenate(
        [tp[dy:dy + TH, dx:dx + W] for dy in range(3) for dx in range(3)],
        axis=-1)                                             # (TH, W, 9*C4)
    t2 = jnp.dot(win9.reshape(TH * W, 9 * C4), w2r_ref[...],
                 preferred_element_type=f32) + b2_ref[...]
    t2 = jnp.where(t2 > 0, t2, a * t2)

    # ---- 1x1 conv (C4 -> C) + residual -------------------------------------
    y = jnp.dot(t2.astype(w3_ref.dtype), w3_ref[...],
                preferred_element_type=f32) + b3_ref[...]
    y = y.reshape(TH, W, C) * res_scale + xm.astype(f32)
    o_ref[0] = y.astype(o_ref.dtype)


def _vmem_capacity_bytes():
    """Generation-aware VMEM capacity (v5e/v6e: 128 MiB, v7x: 64 MiB/core)."""
    try:
        return int(pltpu.get_tpu_info().vmem_capacity_bytes)
    except Exception:
        return 64 * 1024 * 1024          # conservative (v7x-sized) fallback


def _pick_tile_rows(N, H, W, C, C4, io_itemsize, vmem_budget):
    """Largest divisor of H whose working set fits the VMEM budget."""
    lane = lambda c: ((c + 127) // 128) * 128        # lane padding of narrow dims
    per_row = W * (
        4 * C * io_itemsize                          # mid in + out, double-buffered
        + lane(C4) * 4                               # t scratch (f32)
        + lane(C4) * 4                               # zero-padded copy tp
        + lane(9 * C4) * 4                           # win9
        + lane(C4) * 4                               # t2
        + lane(C) * 4)                               # y before residual
    max_rows = max(1, int(vmem_budget) // int(per_row))
    divisors = [d for d in range(1, H + 1) if H % d == 0]
    fits = [d for d in divisors if d <= max_rows] or [1]
    # Keep >= 2 grid steps when possible so both v7x TensorCores get work.
    multi = [d for d in fits if N * (H // d) >= 2]
    return (multi or fits)[-1]


def resblock_pallas(x, params, *, res_scale=1.0, tile_rows=None,
                    vmem_limit_bytes=None):
    """x: (N, H, W, C) NHWC.  Compute is f32-accumulated; output has x.dtype.

    params = (w1 (C,C4), b1 (C4,), w2 (3,3,C4,C4) HWIO, b2 (C4,),
              w3 (C4,C), b3 (C,), alpha (1,))
    """
    N, H, W, C = x.shape
    w1, b1, w2, b2, w3, b3, alpha = params
    C4 = w1.shape[1]

    cap = _vmem_capacity_bytes()
    if vmem_limit_bytes is None:
        vmem_limit_bytes = max(32 * 1024 * 1024,
                               min(cap * 3 // 4, 100 * 1024 * 1024))
    if tile_rows is None:
        budget = min(cap // 2, 64 * 1024 * 1024)
        tile_rows = _pick_tile_rows(N, H, W, C, C4, x.dtype.itemsize, budget)
    TH = min(tile_rows, H)
    # TODO(synk): handle ragged last tiles (pad H in the wrapper) for odd H.
    assert H % TH == 0, "row tile must divide H"
    n_tiles = H // TH

    f32 = jnp.float32
    cdt = x.dtype                     # MXU operand dtype for the 1x1 convs
    w1 = w1.astype(cdt)
    w3 = w3.astype(cdt)
    # (kh, kw, Cin, Cout) -> (9*Cin, Cout): (dy, dx, cin) ordering matches the
    # win9 channel concatenation inside the kernel.  Kept f32 (3x3 stage is f32).
    w2r = w2.astype(f32).reshape(9 * C4, C4)
    b1 = b1.reshape(1, C4).astype(f32)
    b2 = b2.reshape(1, C4).astype(f32)
    b3 = b3.reshape(1, C).astype(f32)
    alpha = alpha.reshape(1).astype(f32)

    def full_spec(arr):
        nd = arr.ndim
        return pl.BlockSpec(arr.shape, lambda n, i, _nd=nd: (0,) * _nd)

    kernel = functools.partial(_resblock_kernel, res_scale=res_scale)

    flops = 2 * N * H * W * (C * C4 + 9 * C4 * C4 + C4 * C)
    bytes_accessed = (2 * int(x.size) * x.dtype.itemsize
                      + 4 * sum(int(p.size) for p in (w1, b1, w2r, b2, w3, b3)))
    cost = pl.CostEstimate(flops=int(flops), transcendentals=0,
                           bytes_accessed=int(bytes_accessed))

    return pl.pallas_call(
        kernel,
        out_shape=jax.ShapeDtypeStruct((N, H, W, C), x.dtype),
        grid_spec=pltpu.PrefetchScalarGridSpec(
            num_scalar_prefetch=0,
            grid=(N, n_tiles),
            in_specs=[
                # halo row above the tile (clamped at the image border; the
                # kernel zeroes the out-of-image halo FEATURE rows)
                pl.BlockSpec((1, 1, W, C),
                             lambda n, i: (n, jnp.maximum(i * TH - 1, 0), 0, 0)),
                # the TH tile rows
                pl.BlockSpec((1, TH, W, C), lambda n, i: (n, i, 0, 0)),
                # halo row below the tile (clamped)
                pl.BlockSpec((1, 1, W, C),
                             lambda n, i: (n, jnp.minimum(i * TH + TH, H - 1), 0, 0)),
                full_spec(w1), full_spec(b1),
                full_spec(w2r), full_spec(b2),
                full_spec(w3), full_spec(b3),
                # PReLU slope: scalar in SMEM, not a padded VMEM tile
                pl.BlockSpec((1,), lambda n, i: (0,),
                             memory_space=pltpu.MemorySpace.SMEM),
            ],
            out_specs=pl.BlockSpec((1, TH, W, C), lambda n, i: (n, i, 0, 0)),
            scratch_shapes=[pltpu.VMEM((TH + 2, W, C4), jnp.float32)],
        ),
        compiler_params=pltpu.CompilerParams(
            dimension_semantics=("parallel", "parallel"),   # batch + row tiles
            vmem_limit_bytes=int(vmem_limit_bytes)),
        cost_estimate=cost,
    )(x, x, x, w1, b1, w2r, b2, w3, b3, alpha)


def resblock_reference(x, params, *, res_scale=1.0):
    """Pure-JAX NHWC reference for validation (full f32 precision)."""
    w1, b1, w2, b2, w3, b3, alpha = params
    a = alpha.reshape(())
    x32 = x.astype(jnp.float32)
    prelu = lambda v: jnp.where(v > 0, v, a * v)

    t = jnp.einsum('nhwc,cd->nhwd', x32, w1,
                   precision=lax.Precision.HIGHEST) + b1
    t = prelu(t)
    t2 = lax.conv_general_dilated(
        t, w2, window_strides=(1, 1), padding='SAME',
        dimension_numbers=('NHWC', 'HWIO', 'NHWC'),
        precision=lax.Precision.HIGHEST) + b2
    t2 = prelu(t2)
    y = jnp.einsum('nhwd,dc->nhwc', t2, w3,
                   precision=lax.Precision.HIGHEST) + b3
    return y * res_scale + x32


if __name__ == "__main__":
    # n_feats = 64 (EDSR baseline) -> bottleneck C4 = 16.
    N, H, W, C = 2, 16, 16, 64
    C4 = C // 4
    res_scale = 1.0

    key = jax.random.PRNGKey(0)
    ks = jax.random.split(key, 7)
    x = jax.random.normal(ks[0], (N, H, W, C), dtype=jnp.float32)

    w1 = jax.random.normal(ks[1], (C, C4), jnp.float32) * 0.1
    b1 = jax.random.normal(ks[2], (C4,), jnp.float32) * 0.1
    w2 = jax.random.normal(ks[3], (3, 3, C4, C4), jnp.float32) * 0.1   # HWIO
    b2 = jax.random.normal(ks[4], (C4,), jnp.float32) * 0.1
    w3 = jax.random.normal(ks[5], (C4, C), jnp.float32) * 0.1
    b3 = jax.random.normal(ks[6], (C,), jnp.float32) * 0.1
    alpha = jnp.full((1,), 0.25, jnp.float32)    # nn.PReLU() default slope

    params = (w1, b1, w2, b2, w3, b3, alpha)

    ref = jax.block_until_ready(resblock_reference(x, params, res_scale=res_scale))

    # f32 activations at the HBM boundary (auto-chosen row tile).
    out = jax.block_until_ready(
        resblock_pallas(x, params, res_scale=res_scale))
    assert out.shape == (N, H, W, C)
    err = jnp.max(jnp.abs(out - ref))
    assert err < 2e-3, err

    # Explicit small tile (exercises the multi-tile halo path).
    out_t4 = jax.block_until_ready(
        resblock_pallas(x, params, res_scale=res_scale, tile_rows=4))
    err_t4 = jnp.max(jnp.abs(out_t4 - ref))
    assert err_t4 < 2e-3, err_t4

    # bf16 activations at the HBM boundary: memory-bound block => ~2x fewer
    # HBM bytes; the 1x1 convs run native bf16 on the MXU with f32 accumulate.
    out_bf16 = jax.block_until_ready(
        resblock_pallas(x.astype(jnp.bfloat16), params, res_scale=res_scale))
    assert out_bf16.dtype == jnp.bfloat16
    err_bf16 = jnp.max(jnp.abs(out_bf16.astype(jnp.float32) - ref))
    assert err_bf16 < 2.5e-1, err_bf16

    print("KERNEL_OK")
</pallas_src>

<mosaic_0001>
module attributes {stable_mosaic.version = 11 : i64} {
  func.func @_resblock_kernel(%arg0: i32, %arg1: i32, %arg2: memref<1x1x16x64xf32, #tpu.memory_space<vmem>>, %arg3: memref<1x16x16x64xf32, #tpu.memory_space<vmem>>, %arg4: memref<1x1x16x64xf32, #tpu.memory_space<vmem>>, %arg5: memref<64x16xf32, #tpu.memory_space<vmem>>, %arg6: memref<1x16xf32, #tpu.memory_space<vmem>>, %arg7: memref<144x16xf32, #tpu.memory_space<vmem>>, %arg8: memref<1x16xf32, #tpu.memory_space<vmem>>, %arg9: memref<16x64xf32, #tpu.memory_space<vmem>>, %arg10: memref<1x64xf32, #tpu.memory_space<vmem>>, %arg11: memref<1xf32, #tpu.memory_space<smem>>, %arg12: memref<1x16x16x64xf32, #tpu.memory_space<vmem>>, %arg13: memref<18x16x16xf32, #tpu.memory_space<vmem>>) attributes {dimension_semantics = [#tpu.dimension_semantics<parallel>, #tpu.dimension_semantics<parallel>], iteration_bounds = array<i64: 2, 1>, scalar_prefetch = 0 : i64, scratch_operands = 1 : i64, tpu.core_type = #tpu.core_type<tc>, window_params = [{transform_indices = @transform_0, window_bounds = array<i64: 1, 1, 16, 64>}, {transform_indices = @transform_1, window_bounds = array<i64: 1, 16, 16, 64>}, {transform_indices = @transform_2, window_bounds = array<i64: 1, 1, 16, 64>}, {pipeline_mode = #tpu.pipeline_mode<synchronous>, transform_indices = @transform_3, window_bounds = array<i64: 64, 16>}, {pipeline_mode = #tpu.pipeline_mode<synchronous>, transform_indices = @transform_4, window_bounds = array<i64: 1, 16>}, {pipeline_mode = #tpu.pipeline_mode<synchronous>, transform_indices = @transform_5, window_bounds = array<i64: 144, 16>}, {pipeline_mode = #tpu.pipeline_mode<synchronous>, transform_indices = @transform_6, window_bounds = array<i64: 1, 16>}, {pipeline_mode = #tpu.pipeline_mode<synchronous>, transform_indices = @transform_7, window_bounds = array<i64: 16, 64>}, {pipeline_mode = #tpu.pipeline_mode<synchronous>, transform_indices = @transform_8, window_bounds = array<i64: 1, 64>}, {transform_indices = @transform_9, window_bounds = array<i64: 1>}, {transform_indices = @transform_10, window_bounds = array<i64: 1, 16, 16, 64>}]} {
    %c0 = arith.constant 0 : index
    %0 = memref.load %arg11[%c0] : memref<1xf32, #tpu.memory_space<smem>>
    %c0_0 = arith.constant 0 : index
    %c0_1 = arith.constant 0 : index
    %1 = vector.load %arg5[%c0_0, %c0_1] : memref<64x16xf32, #tpu.memory_space<vmem>>, vector<64x16xf32>
    %c0_2 = arith.constant 0 : index
    %c0_3 = arith.constant 0 : index
    %2 = vector.load %arg6[%c0_2, %c0_3] : memref<1x16xf32, #tpu.memory_space<vmem>>, vector<1x16xf32>
    %c0_4 = arith.constant 0 : index
    %c0_5 = arith.constant 0 : index
    %c0_6 = arith.constant 0 : index
    %c0_7 = arith.constant 0 : index
    %3 = vector.load %arg3[%c0_4, %c0_5, %c0_6, %c0_7] : memref<1x16x16x64xf32, #tpu.memory_space<vmem>>, vector<1x16x16x64xf32>
    %4 = vector.shape_cast %3 : vector<1x16x16x64xf32> to vector<16x16x64xf32>
    %5 = vector.shape_cast %4 : vector<16x16x64xf32> to vector<256x64xf32>
    %cst = arith.constant dense<0.000000e+00> : vector<256x16xf32>
    %6 = tpu.matmul %5, %1, %cst {dimension_numbers = #tpu.dot_dimension_numbers<[1], [0], [0], [1], [0, 0, 1, 1], [], []>} : vector<256x64xf32>, vector<64x16xf32>, vector<256x16xf32> -> vector<256x16xf32>
    %7 = vector.broadcast %2 : vector<1x16xf32> to vector<256x16xf32>
    %8 = arith.addf %6, %7 : vector<256x16xf32>
    %cst_8 = arith.constant 0.000000e+00 : f32
    %9 = vector.broadcast %cst_8 : f32 to vector<256x16xf32>
    %10 = arith.cmpf ogt, %8, %9 : vector<256x16xf32>
    %11 = vector.broadcast %0 : f32 to vector<256x16xf32>
    %12 = arith.mulf %11, %8 : vector<256x16xf32>
    %13 = arith.select %10, %8, %12 : vector<256x16xi1>, vector<256x16xf32>
    %14 = vector.shape_cast %13 : vector<256x16xf32> to vector<16x16x16xf32>
    %c1 = arith.constant 1 : index
    %c0_9 = arith.constant 0 : index
    %c0_10 = arith.constant 0 : index
    %15 = vector.load %arg13[%c1, %c0_9, %c0_10] : memref<18x16x16xf32, #tpu.memory_space<vmem>>, vector<16x16x16xf32>
    tpu.vector_store %arg13[%c1, %c0_9, %c0_10], %14 {strides = array<i32>} : memref<18x16x16xf32, #tpu.memory_space<vmem>>, vector<16x16x16xf32>,
    %c0_i32 = arith.constant 0 : i32
    %16 = arith.cmpi sgt, %arg1, %c0_i32 : i32
    %17 = arith.extui %16 : i1 to i32
    %c0_i32_11 = arith.constant 0 : i32
    %18 = arith.cmpi ne, %17, %c0_i32_11 : i32
    scf.if %18 {
      %c0_38 = arith.constant 0 : index
      %c0_39 = arith.constant 0 : index
      %c0_40 = arith.constant 0 : index
      %c0_41 = arith.constant 0 : index
      %64 = vector.load %arg2[%c0_38, %c0_39, %c0_40, %c0_41] : memref<1x1x16x64xf32, #tpu.memory_space<vmem>>, vector<1x1x16x64xf32>
      %65 = vector.shape_cast %64 : vector<1x1x16x64xf32> to vector<16x64xf32>
      %cst_42 = arith.constant dense<0.000000e+00> : vector<16x16xf32>
      %66 = tpu.matmul %65, %1, %cst_42 {dimension_numbers = #tpu.dot_dimension_numbers<[1], [0], [0], [1], [0, 0, 1, 1], [], []>} : vector<16x64xf32>, vector<64x16xf32>, vector<16x16xf32> -> vector<16x16xf32>
      %67 = vector.broadcast %2 : vector<1x16xf32> to vector<16x16xf32>
      %68 = arith.addf %66, %67 : vector<16x16xf32>
      %cst_43 = arith.constant 0.000000e+00 : f32
      %69 = vector.broadcast %cst_43 : f32 to vector<16x16xf32>
      %70 = arith.cmpf ogt, %68, %69 : vector<16x16xf32>
      %71 = vector.broadcast %0 : f32 to vector<16x16xf32>
      %72 = arith.mulf %71, %68 : vector<16x16xf32>
      %73 = arith.select %70, %68, %72 : vector<16x16xi1>, vector<16x16xf32>
      %c0_44 = arith.constant 0 : index
      %c0_45 = arith.constant 0 : index
      %c0_46 = arith.constant 0 : index
      %74 = vector.load %arg13[%c0_44, %c0_45, %c0_46] : memref<18x16x16xf32, #tpu.memory_space<vmem>>, vector<1x16x16xf32>
      %75 = vector.shape_cast %74 : vector<1x16x16xf32> to vector<16x16xf32>
      %76 = vector.shape_cast %73 : vector<16x16xf32> to vector<1x16x16xf32>
      tpu.vector_store %arg13[%c0_44, %c0_45, %c0_46], %76 {strides = array<i32>} : memref<18x16x16xf32, #tpu.memory_space<vmem>>, vector<1x16x16xf32>,
    } else {
    }
    %c0_i32_12 = arith.constant 0 : i32
    %19 = arith.cmpi eq, %arg1, %c0_i32_12 : i32
    %20 = arith.extui %19 : i1 to i32
    %c0_i32_13 = arith.constant 0 : i32
    %21 = arith.cmpi ne, %20, %c0_i32_13 : i32
    scf.if %21 {
      %cst_38 = arith.constant 0.000000e+00 : f32
      %64 = vector.broadcast %cst_38 : f32 to vector<16x16xf32>
      %c0_39 = arith.constant 0 : index
      %c0_40 = arith.constant 0 : index
      %c0_41 = arith.constant 0 : index
      %65 = vector.load %arg13[%c0_39, %c0_40, %c0_41] : memref<18x16x16xf32, #tpu.memory_space<vmem>>, vector<1x16x16xf32>
      %66 = vector.shape_cast %65 : vector<1x16x16xf32> to vector<16x16xf32>
      %67 = vector.shape_cast %64 : vector<16x16xf32> to vector<1x16x16xf32>
      tpu.vector_store %arg13[%c0_39, %c0_40, %c0_41], %67 {strides = array<i32>} : memref<18x16x16xf32, #tpu.memory_space<vmem>>, vector<1x16x16xf32>,
    } else {
    }
    %c0_i32_14 = arith.constant 0 : i32
    %22 = arith.cmpi slt, %arg1, %c0_i32_14 : i32
    %23 = arith.extui %22 : i1 to i32
    %c0_i32_15 = arith.constant 0 : i32
    %24 = arith.cmpi ne, %23, %c0_i32_15 : i32
    scf.if %24 {
      %c0_38 = arith.constant 0 : index
      %c0_39 = arith.constant 0 : index
      %c0_40 = arith.constant 0 : index
      %c0_41 = arith.constant 0 : index
      %64 = vector.load %arg4[%c0_38, %c0_39, %c0_40, %c0_41] : memref<1x1x16x64xf32, #tpu.memory_space<vmem>>, vector<1x1x16x64xf32>
      %65 = vector.shape_cast %64 : vector<1x1x16x64xf32> to vector<16x64xf32>
      %cst_42 = arith.constant dense<0.000000e+00> : vector<16x16xf32>
      %66 = tpu.matmul %65, %1, %cst_42 {dimension_numbers = #tpu.dot_dimension_numbers<[1], [0], [0], [1], [0, 0, 1, 1], [], []>} : vector<16x64xf32>, vector<64x16xf32>, vector<16x16xf32> -> vector<16x16xf32>
      %67 = vector.broadcast %2 : vector<1x16xf32> to vector<16x16xf32>
      %68 = arith.addf %66, %67 : vector<16x16xf32>
      %cst_43 = arith.constant 0.000000e+00 : f32
      %69 = vector.broadcast %cst_43 : f32 to vector<16x16xf32>
      %70 = arith.cmpf ogt, %68, %69 : vector<16x16xf32>
      %71 = vector.broadcast %0 : f32 to vector<16x16xf32>
      %72 = arith.mulf %71, %68 : vector<16x16xf32>
      %73 = arith.select %70, %68, %72 : vector<16x16xi1>, vector<16x16xf32>
      %c17 = arith.constant 17 : index
      %c0_44 = arith.constant 0 : index
      %c0_45 = arith.constant 0 : index
      %74 = vector.load %arg13[%c17, %c0_44, %c0_45] : memref<18x16x16xf32, #tpu.memory_space<vmem>>, vector<1x16x16xf32>
      %75 = vector.shape_cast %74 : vector<1x16x16xf32> to vector<16x16xf32>
      %76 = vector.shape_cast %73 : vector<16x16xf32> to vector<1x16x16xf32>
      tpu.vector_store %arg13[%c17, %c0_44, %c0_45], %76 {strides = array<i32>} : memref<18x16x16xf32, #tpu.memory_space<vmem>>, vector<1x16x16xf32>,
    } else {
    }
    %c0_i32_16 = arith.constant 0 : i32
    %25 = arith.cmpi eq, %arg1, %c0_i32_16 : i32
    %26 = arith.extui %25 : i1 to i32
    %c0_i32_17 = arith.constant 0 : i32
    %27 = arith.cmpi ne, %26, %c0_i32_17 : i32
    scf.if %27 {
      %cst_38 = arith.constant 0.000000e+00 : f32
      %64 = vector.broadcast %cst_38 : f32 to vector<16x16xf32>
      %c17 = arith.constant 17 : index
      %c0_39 = arith.constant 0 : index
      %c0_40 = arith.constant 0 : index
      %65 = vector.load %arg13[%c17, %c0_39, %c0_40] : memref<18x16x16xf32, #tpu.memory_space<vmem>>, vector<1x16x16xf32>
      %66 = vector.shape_cast %65 : vector<1x16x16xf32> to vector<16x16xf32>
      %67 = vector.shape_cast %64 : vector<16x16xf32> to vector<1x16x16xf32>
      tpu.vector_store %arg13[%c17, %c0_39, %c0_40], %67 {strides = array<i32>} : memref<18x16x16xf32, #tpu.memory_space<vmem>>, vector<1x16x16xf32>,
    } else {
    }
    %c0_18 = arith.constant 0 : index
    %c0_19 = arith.constant 0 : index
    %c0_20 = arith.constant 0 : index
    %28 = vector.load %arg13[%c0_18, %c0_19, %c0_20] : memref<18x16x16xf32, #tpu.memory_space<vmem>>, vector<18x16x16xf32>
    %cst_21 = arith.constant 0.000000e+00 : f32
    %29 = vector.broadcast %cst_21 : f32 to vector<18x1x16xf32>
    %30 = tpu.concatenate %29, %28, %29 in 1 : vector<18x1x16xf32>, vector<18x16x16xf32>, vector<18x1x16xf32> -> vector<18x18x16xf32>
    %31 = vector.extract_strided_slice %30 {offsets = [0, 0, 0], sizes = [16, 16, 16], strides = [1, 1, 1]} : vector<18x18x16xf32> to vector<16x16x16xf32>
    %32 = vector.extract_strided_slice %30 {offsets = [0, 1, 0], sizes = [16, 16, 16], strides = [1, 1, 1]} : vector<18x18x16xf32> to vector<16x16x16xf32>
    %33 = vector.extract_strided_slice %30 {offsets = [0, 2, 0], sizes = [16, 16, 16], strides = [1, 1, 1]} : vector<18x18x16xf32> to vector<16x16x16xf32>
    %34 = vector.extract_strided_slice %30 {offsets = [1, 0, 0], sizes = [16, 16, 16], strides = [1, 1, 1]} : vector<18x18x16xf32> to vector<16x16x16xf32>
    %35 = vector.extract_strided_slice %30 {offsets = [1, 1, 0], sizes = [16, 16, 16], strides = [1, 1, 1]} : vector<18x18x16xf32> to vector<16x16x16xf32>
    %36 = vector.extract_strided_slice %30 {offsets = [1, 2, 0], sizes = [16, 16, 16], strides = [1, 1, 1]} : vector<18x18x16xf32> to vector<16x16x16xf32>
    %37 = vector.extract_strided_slice %30 {offsets = [2, 0, 0], sizes = [16, 16, 16], strides = [1, 1, 1]} : vector<18x18x16xf32> to vector<16x16x16xf32>
    %38 = vector.extract_strided_slice %30 {offsets = [2, 1, 0], sizes = [16, 16, 16], strides = [1, 1, 1]} : vector<18x18x16xf32> to vector<16x16x16xf32>
    %39 = vector.extract_strided_slice %30 {offsets = [2, 2, 0], sizes = [16, 16, 16], strides = [1, 1, 1]} : vector<18x18x16xf32> to vector<16x16x16xf32>
    %40 = tpu.concatenate %31, %32, %33, %34, %35, %36, %37, %38, %39 in 2 : vector<16x16x16xf32>, vector<16x16x16xf32>, vector<16x16x16xf32>, vector<16x16x16xf32>, vector<16x16x16xf32>, vector<16x16x16xf32>, vector<16x16x16xf32>, vector<16x16x16xf32>, vector<16x16x16xf32> -> vector<16x16x144xf32>
    %41 = vector.shape_cast %40 : vector<16x16x144xf32> to vector<256x144xf32>
    %c0_22 = arith.constant 0 : index
    %c0_23 = arith.constant 0 : index
    %42 = vector.load %arg7[%c0_22, %c0_23] : memref<144x16xf32, #tpu.memory_space<vmem>>, vector<144x16xf32>
    %cst_24 = arith.constant dense<0.000000e+00> : vector<256x16xf32>
    %43 = tpu.matmul %41, %42, %cst_24 {dimension_numbers = #tpu.dot_dimension_numbers<[1], [0], [0], [1], [0, 0, 1, 1], [], []>} : vector<256x144xf32>, vector<144x16xf32>, vector<256x16xf32> -> vector<256x16xf32>
    %c0_25 = arith.constant 0 : index
    %c0_26 = arith.constant 0 : index
    %44 = vector.load %arg8[%c0_25, %c0_26] : memref<1x16xf32, #tpu.memory_space<vmem>>, vector<1x16xf32>
    %45 = vector.broadcast %44 : vector<1x16xf32> to vector<256x16xf32>
    %46 = arith.addf %43, %45 : vector<256x16xf32>
    %cst_27 = arith.constant 0.000000e+00 : f32
    %47 = vector.broadcast %cst_27 : f32 to vector<256x16xf32>
    %48 = arith.cmpf ogt, %46, %47 : vector<256x16xf32>
    %49 = vector.broadcast %0 : f32 to vector<256x16xf32>
    %50 = arith.mulf %49, %46 : vector<256x16xf32>
    %51 = arith.select %48, %46, %50 : vector<256x16xi1>, vector<256x16xf32>
    %c0_28 = arith.constant 0 : index
    %c0_29 = arith.constant 0 : index
    %52 = vector.load %arg9[%c0_28, %c0_29] : memref<16x64xf32, #tpu.memory_space<vmem>>, vector<16x64xf32>
    %cst_30 = arith.constant dense<0.000000e+00> : vector<256x64xf32>
    %53 = tpu.matmul %51, %52, %cst_30 {dimension_numbers = #tpu.dot_dimension_numbers<[1], [0], [0], [1], [0, 0, 1, 1], [], []>} : vector<256x16xf32>, vector<16x64xf32>, vector<256x64xf32> -> vector<256x64xf32>
    %c0_31 = arith.constant 0 : index
    %c0_32 = arith.constant 0 : index
    %54 = vector.load %arg10[%c0_31, %c0_32] : memref<1x64xf32, #tpu.memory_space<vmem>>, vector<1x64xf32>
    %55 = vector.broadcast %54 : vector<1x64xf32> to vector<256x64xf32>
    %56 = arith.addf %53, %55 : vector<256x64xf32>
    %57 = vector.shape_cast %56 : vector<256x64xf32> to vector<16x16x64xf32>
    %cst_33 = arith.constant 1.000000e+00 : f32
    %58 = vector.broadcast %cst_33 : f32 to vector<16x16x64xf32>
    %59 = arith.mulf %57, %58 : vector<16x16x64xf32>
    %60 = arith.addf %59, %4 : vector<16x16x64xf32>
    %c0_34 = arith.constant 0 : index
    %c0_35 = arith.constant 0 : index
    %c0_36 = arith.constant 0 : index
    %c0_37 = arith.constant 0 : index
    %61 = vector.load %arg12[%c0_34, %c0_35, %c0_36, %c0_37] : memref<1x16x16x64xf32, #tpu.memory_space<vmem>>, vector<1x16x16x64xf32>
    %62 = vector.shape_cast %61 : vector<1x16x16x64xf32> to vector<16x16x64xf32>
    %63 = vector.shape_cast %60 : vector<16x16x64xf32> to vector<1x16x16x64xf32>
    tpu.vector_store %arg12[%c0_34, %c0_35, %c0_36, %c0_37], %63 {strides = array<i32>} : memref<1x16x16x64xf32, #tpu.memory_space<vmem>>, vector<1x16x16x64xf32>,
    return
  }
  func.func @transform_0(%arg0: i32, %arg1: i32) -> (i32, i32, i32, i32) {
    %c16_i32 = arith.constant 16 : i32
    %0 = arith.muli %arg1, %c16_i32 : i32
    %c1_i32 = arith.constant 1 : i32
    %1 = arith.subi %0, %c1_i32 : i32
    %c0_i32 = arith.constant 0 : i32
    %2 = arith.maxsi %1, %c0_i32 : i32
    %c0_i32_0 = arith.constant 0 : i32
    %c0_i32_1 = arith.constant 0 : i32
    %c0_i32_2 = arith.constant 0 : i32
    return %arg0, %2, %c0_i32_0, %c0_i32_1 : i32, i32, i32, i32
  }
  func.func @transform_1(%arg0: i32, %arg1: i32) -> (i32, i32, i32, i32) {
    %c0_i32 = arith.constant 0 : i32
    %c0_i32_0 = arith.constant 0 : i32
    %c0_i32_1 = arith.constant 0 : i32
    return %arg0, %arg1, %c0_i32, %c0_i32_0 : i32, i32, i32, i32
  }
  func.func @transform_2(%arg0: i32, %arg1: i32) -> (i32, i32, i32, i32) {
    %c16_i32 = arith.constant 16 : i32
    %0 = arith.muli %arg1, %c16_i32 : i32
    %c16_i32_0 = arith.constant 16 : i32
    %1 = arith.addi %0, %c16_i32_0 : i32
    %c15_i32 = arith.constant 15 : i32
    %2 = arith.minsi %1, %c15_i32 : i32
    %c0_i32 = arith.constant 0 : i32
    %c0_i32_1 = arith.constant 0 : i32
    %c0_i32_2 = arith.constant 0 : i32
    return %arg0, %2, %c0_i32, %c0_i32_1 : i32, i32, i32, i32
  }
  func.func @transform_3(%arg0: i32, %arg1: i32) -> (i32, i32) {
    %c0_i32 = arith.constant 0 : i32
    %c0_i32_0 = arith.constant 0 : i32
    %c0_i32_1 = arith.constant 0 : i32
    return %c0_i32, %c0_i32_0 : i32, i32
  }
  func.func @transform_4(%arg0: i32, %arg1: i32) -> (i32, i32) {
    %c0_i32 = arith.constant 0 : i32
    %c0_i32_0 = arith.constant 0 : i32
    %c0_i32_1 = arith.constant 0 : i32
    return %c0_i32, %c0_i32_0 : i32, i32
  }
  func.func @transform_5(%arg0: i32, %arg1: i32) -> (i32, i32) {
    %c0_i32 = arith.constant 0 : i32
    %c0_i32_0 = arith.constant 0 : i32
    %c0_i32_1 = arith.constant 0 : i32
    return %c0_i32, %c0_i32_0 : i32, i32
  }
  func.func @transform_6(%arg0: i32, %arg1: i32) -> (i32, i32) {
    %c0_i32 = arith.constant 0 : i32
    %c0_i32_0 = arith.constant 0 : i32
    %c0_i32_1 = arith.constant 0 : i32
    return %c0_i32, %c0_i32_0 : i32, i32
  }
  func.func @transform_7(%arg0: i32, %arg1: i32) -> (i32, i32) {
    %c0_i32 = arith.constant 0 : i32
    %c0_i32_0 = arith.constant 0 : i32
    %c0_i32_1 = arith.constant 0 : i32
    return %c0_i32, %c0_i32_0 : i32, i32
  }
  func.func @transform_8(%arg0: i32, %arg1: i32) -> (i32, i32) {
    %c0_i32 = arith.constant 0 : i32
    %c0_i32_0 = arith.constant 0 : i32
    %c0_i32_1 = arith.constant 0 : i32
    return %c0_i32, %c0_i32_0 : i32, i32
  }
  func.func @transform_9(%arg0: i32, %arg1: i32) -> i32 {
    %c0_i32 = arith.constant 0 : i32
    %c0_i32_0 = arith.constant 0 : i32
    return %c0_i32 : i32
  }
  func.func @transform_10(%arg0: i32, %arg1: i32) -> (i32, i32, i32, i32) {
    %c0_i32 = arith.constant 0 : i32
    %c0_i32_0 = arith.constant 0 : i32
    %c0_i32_1 = arith.constant 0 : i32
    return %arg0, %arg1, %c0_i32, %c0_i32_0 : i32, i32, i32, i32
  }
}

</mosaic_0001>

<bundles_post_ra>
// kernel: tpu_custom_call.1
= control target key start
LH: loop header
LB: loop body
LE: loop exit
PB: predicated region body
PF: predicated region fallthrough
CT: control target
= control target key end

     0   :  { %s6645_s0 = inlined_call_operand.hbm [shape: f32[2,16,16,64], index: 0, kind: input, shape index: {}]   ;;  %s6646_s1 = inlined_call_operand.hbm [shape: f32[2,16,16,64], index: 1, kind: input, shape index: {}]   ;;  %s6647_s2 = inlined_call_operand.hbm [shape: f32[2,16,16,64], index: 2, kind: input, shape index: {}]   ;;  %s6648_s3 = inlined_call_operand.vmem [shape: f32[64,16], index: 3, kind: input, shape index: {}]   ;;  %s6649_s4 = inlined_call_operand.vmem [shape: f32[1,16], index: 4, kind: input, shape index: {}]   ;;  %s6650_s5 = inlined_call_operand.vmem [shape: f32[144,16], index: 5, kind: input, shape index: {}]   ;;  %s6651_s6 = inlined_call_operand.vmem [shape: f32[1,16], index: 6, kind: input, shape index: {}]   ;;  %s6652_s7 = inlined_call_operand.vmem [shape: f32[16,64], index: 7, kind: input, shape index: {}]   ;;  %s6653_s8 = inlined_call_operand.vmem [shape: f32[1,64], index: 8, kind: input, shape index: {}]   ;;  %s6654_s9 = inlined_call_operand.<no memory space> [shape: f32[1], index: 9, kind: input, shape index: {}]   ;;  %s6655_s10 = inlined_call_operand.hbm [shape: f32[2,16,16,64], index: 10, kind: output, shape index: {}]  }
   0x1   :  { %6682 = sst [smem:[#allocation31_spill]] %s6646_s1 }
   0x2   :  { %6683 = sst [smem:[#allocation32_spill]] %s6655_s10 }
   0x3   :  { %15 = sst [smem:[#allocation3]] %s6654_s9 }
   0x4   :  { %16 = vsyncpa [#allocation5], 0 }
   0x5   :  { %18 = vsyncpa [#allocation5 + $0x1], 0 }
   0x6   :  { %19 = vsyncpa [#allocation8], 0 }
   0x7   :  { %21 = vsyncpa [#allocation8 + $0x1], 0 }
   0x8   :  { %22 = vsyncpa [#allocation6], 0 }
   0x9   :  { %24 = vsyncpa [#allocation6 + $0x1], 0  ;;  %s4814_s15 = smov 0   ;;  %s4816_s16 = smov 0  }
   0xa   :  { %s4818_s17 = smov 0   ;;  %s4820_s18 = smov 0  }
   0xb   :  { %s4822_s19 = smov 0   ;;  %s4824_s20 = smov 0  }
   0xc LB: > { %6684 = sst [smem:[#allocation14_spill]] %s4717_s15  ;;  %s4845_s9 = sadd.s32 4294967295, %s4737_s20   ;;  %s4737_s20 = sphi %s4824_s20, %s30_s20   ;;  %s4733_s19 = sphi %s4822_s19, %s6736_s19   ;;  %s4729_s18 = sphi %s4820_s18, %s6735_s18   ;;  %s4725_s17 = sphi %s4818_s17, %s6734_s17   ;;  %s4721_s16 = sphi %s4816_s16, %s6738_s16   ;;  %s4717_s15 = sphi %s4814_s15, %s6737_s15  }
   0xd   : > { %6685 = sst [smem:[#allocation15_spill]] %s4725_s17  ;;  %s3513_s21 = sadd.s32 4294967294, %s4737_s20  }
   0xe   : > { %6686 = sst [smem:[#allocation16_spill]] %s4733_s19  ;;  %s42_s22 = sadd.s32 1, %s4733_s19 }
   0xf   : > { %6687 = sst [smem:[#allocation17_spill]] %s4737_s20  ;;  %s59_s23 = sadd.s32 1, %s4725_s17 }
  0x10   : > { %p44_p0 = scmp.ge.s32.totalorder %s42_s22, 2  ;;  %p66_p1 = scmp.ne.s32.totalorder %s4725_s17, %s4721_s16 }
  0x11   : > { %p67_p2 = scmp.eq.s32.totalorder %s4737_s20, 0  ;;  %p72_p3 = scmp.ne.s32.totalorder %s4721_s16, %s4717_s15 }
  0x12   : > { %s6740_s22 = smov (%p44_p0, %s42_s22), 0  ;;  %p73_p5 = scmp.eq.s32.totalorder %s4845_s9, 0 }
  0x13   : > { %6688 = sst [smem:[#allocation18_spill]] %s6740_s22  ;;  %p4857_p4 = por %p67_p2, %p66_p1 }
  0x14   : > { %s54_s25 = ssub.s32 %s4733_s19, %s6740_s22  ;;  %p309_p6 = scmp.eq.s32.totalorder %s4845_s9, 1 }
  0x15   : > { %p57_p7 = scmp.eq.s32.totalorder %s54_s25, 0  ;;  %p4865_p8 = por %p73_p5, %p72_p3 }
  0x16   : > { %p4869_p9 = por %p309_p6, %p66_p1  ;;  %p315_p10 = scmp.eq.s32.totalorder %s3513_s21, 1 }
  0x17   : > { %s6690_s26 = scalar_select %p4865_p8, 1, 0 }
  0x18   : > { %s6691_s27 = scalar_select %p4869_p9, 1, 0 }
  0x19   : > { %s4874_s28 = scalar_select %p57_p7, %s4725_s17, %s59_s23  }
  0x1a   : > { %6692 = sst [smem:[#allocation19_spill]] %s6691_s27  ;;  %p4876_p11 = por %p315_p10, %p72_p3 }
  0x1b   : > { %6693 = sst [smem:[#allocation20_spill]] %s4874_s28  ;;  %p3921_p13 = scmp.lt.s32.totalorder %s4737_s20, 2 }
  0x1c   : > { %s6694_s29 = scalar_select %p4876_p11, 1, 0 }
  0x1d   : > { %s4883_s30 = sand.u32 1, %s4725_s17   ;;  %s4886_s11 = sshll.u32 %s4733_s19, 12 }
  0x1e   : > { %6695 = sst [smem:[#allocation21_spill]] %s6694_s29  ;;  %p4890_p0 = pnand %p3921_p13, %p4857_p4 }
  0x1f   : > { %s383_s13 = sand.u32 1, %s4737_s20   ;;  %s3519_s14 = sshll.u32 %s4883_s30, 8 }
  0x20   : > { %s6697_s1 = sld [smem:[#allocation31_spill]]  ;;  %s387_s22 = scalar_lea.vmem [#allocation7], %s3519_s14 }
  0x21   : > { %s397_s19 = sshll.u32 %s387_s22, 4  ;;  %s4906_s24 = scalar_lea.sflag [#allocation8], %s383_s13  ;;  %s4903_s19 = int_to_ptr.vmem [resolvable:$true] %s397_s19 }
  0x22   : > { %p4912_p4 = pneg %p4890_p0 }
  0x26   : > { %s4900_s25 = scalar_lea.hbm %s6697_s1, %s4886_s11  ;;  %s4566_s22 = scalar_lea.hbm %s6697_s1, 8192 }
  0x27   : > { %s4561_s28 = scalar_lea.hbm %s4900_s25, 4096  ;;  %p4567_p7 = scmp.lt.u32.totalorder %s4900_s25, %s6697_s1 }
  0x28   : > { %p4562_p3 = scmp.ne.s32.totalorder %s4900_s25, %s4561_s28  ;;  %p4568_p10 = scmp.lt.u32.totalorder %s4566_s22, %s4561_s28 }
  0x29   : > { %p4570_p12 = scmp.lt.u32.totalorder %s4561_s28, %s4900_s25 }
  0x2a   : > { %p4564_p5 = pnand %p4912_p4, %p4562_p3  ;;  %p4569_p13 = por %p4568_p10, %p4567_p7 }
  0x2c   : > { %p4565_p6 = pneg %p4564_p5  ;;  %p4571_p1 = por %p4570_p12, %p4569_p13 }
  0x2e   : > { %p4572_p2 = pnand %p4571_p1, %p4565_p6 }
  0x30   : > { %4575 = shalt.err (!%p4572_p2)
}
  0x31   : > { %s4576_s13 = scalar_lea.vmem %s4903_s19, 4096  ;;  %s4739_s21 = smov [#allocation7]  }
  0x32   : > { %p4577_p3 = scmp.ne.s32.totalorder %s4903_s19, %s4576_s13  ;;  %s4581_s14 = sshll.u32 %s4739_s21, 4  ;;  %s4582_s14 = int_to_ptr.vmem [resolvable:$false] %s4581_s14 }
  0x33   : > { %s4583_s29 = scalar_lea.vmem %s4582_s14, 8192  ;;  %p4584_p9 = scmp.lt.s32.totalorder %s4903_s19, %s4582_s14 }
  0x34   : > { %p4579_p5 = pnand %p4577_p3, %p4912_p4  ;;  %p4585_p8 = scmp.lt.s32.totalorder %s4583_s29, %s4576_s13 }
  0x36   : > { %p4580_p11 = pneg %p4579_p5  ;;  %p4586_p7 = por %p4585_p8, %p4584_p9 }
  0x38   : > { %p4587_p10 = pnand %p4586_p7, %p4580_p11 }
  0x3a   : > { %4590 = shalt.err (!%p4587_p10)
}
  0x3b   : > { %s6664_s28 = smov 128   ;;  %s6666_s22 = smov 8  }
  0x3c   : > { %3913 = dma.hbm_to_vmem [thread:$0]  (!%p4890_p0), %s4900_s25, 4096, %s4903_s19, %s4906_s24, %s6664_s28, %s6664_s28, %s6666_s22  }
  0x3d   : > { %p6699_p8 = scmp.lt.s32.totalorder %s4737_s20, 3  ;;  %p6700_p9 = scmp.ge.s32.totalorder %s4737_s20, 1 }
  0x3e   : > { %s3516_s13 = sshll.u32 %s4883_s30, 4  ;;  %s4952_s29 = scalar_lea.hbm %s6645_s0, %s4886_s11 }
  0x3f   : > { %p4943_p11 = pnand %p6700_p9, %p6699_p8  ;;  %s360_s1 = scalar_lea.vmem [#allocation4], %s3516_s13 }
  0x40   : > { %s373_s15 = sshll.u32 %s360_s1, 4  ;;  %s411_s10 = scalar_lea.vmem [#allocation9], %s3516_s13  ;;  %s4954_s15 = int_to_ptr.vmem [resolvable:$true] %s373_s15 }
  0x41   : > { %s6701_s23 = scalar_select %p4943_p11, 1, 0 }
  0x42   : > { %s424_s19 = sshll.u32 %s411_s10, 4  ;;  %s357_s25 = scalar_lea.sflag [#allocation5], %s4883_s30  ;;  %s4956_s19 = int_to_ptr.vmem [resolvable:$true] %s424_s19 }
  0x43   : > { %s4591_s28 = scalar_lea.hbm %s4952_s29, 256  ;;  %s4596_s22 = scalar_lea.hbm %s6645_s0, 8192 }
  0x44   : > { %p4592_p12 = scmp.ne.s32.totalorder %s4952_s29, %s4591_s28  ;;  %p4597_p6 = scmp.lt.u32.totalorder %s4952_s29, %s6645_s0 }
  0x45   : > { %p4598_p13 = scmp.lt.u32.totalorder %s4596_s22, %s4591_s28  ;;  %p4600_p5 = scmp.lt.u32.totalorder %s4591_s28, %s4952_s29 }
  0x46   : > { %p4594_p1 = pnand %p4592_p12, %p4912_p4 }
  0x47   : > { %p4599_p3 = por %p4598_p13, %p4597_p6 }
  0x48   : > { %p4595_p2 = pneg %p4594_p1 }
  0x49   : > { %p4601_p7 = por %p4600_p5, %p4599_p3 }
  0x4b   : > { %p4602_p10 = pnand %p4601_p7, %p4595_p2 }
  0x4d   : > { %4605 = shalt.err (!%p4602_p10)
}
  0x4e   : > { %s4606_s1 = scalar_lea.vmem %s4954_s15, 256  ;;  %s4742_s10 = smov [#allocation4]  }
  0x4f   : > { %p4607_p8 = scmp.ne.s32.totalorder %s4954_s15, %s4606_s1  ;;  %s4611_s13 = sshll.u32 %s4742_s10, 4  ;;  %s4612_s13 = int_to_ptr.vmem [resolvable:$false] %s4611_s13 }
  0x50   : > { %s4613_s20 = scalar_lea.vmem %s4612_s13, 512  ;;  %p4614_p1 = scmp.lt.s32.totalorder %s4954_s15, %s4612_s13 }
  0x51   : > { %p4609_p9 = pnand %p4607_p8, %p4912_p4  ;;  %p4615_p11 = scmp.lt.s32.totalorder %s4613_s20, %s4606_s1 }
  0x53   : > { %p4610_p12 = pneg %p4609_p9  ;;  %p4616_p6 = por %p4615_p11, %p4614_p1 }
  0x55   : > { %p4617_p13 = pnand %p4616_p6, %p4610_p12 }
  0x57   : > { %4620 = shalt.err (!%p4617_p13)
}
  0x58   : > { %s6702_s27 = smov 8   ;;  %s6703_s28 = smov 128  }
  0x59   : > { %3910 = dma.hbm_to_vmem [thread:$0]  (!%p4890_p0), %s4952_s29, 256, %s4954_s15, %s357_s25, %s6703_s28, %s6703_s28, %s6702_s27  }
  0x5a   : > { %s3641_s22 = sadd.s32 3840, %s4886_s11  ;;  %s4626_s20 = scalar_lea.hbm %s6647_s2, 8192 }
  0x5b   : > { %s4989_s1 = scalar_lea.hbm %s6647_s2, %s3641_s22 }
  0x5c   : > { %s4621_s10 = scalar_lea.hbm %s4989_s1, 256  ;;  %p4627_p5 = scmp.lt.u32.totalorder %s4989_s1, %s6647_s2 }
  0x5d   : > { %p4622_p11 = scmp.ne.s32.totalorder %s4989_s1, %s4621_s10  ;;  %p4628_p7 = scmp.lt.u32.totalorder %s4626_s20, %s4621_s10 }
  0x5e   : > { %p4630_p8 = scmp.lt.u32.totalorder %s4621_s10, %s4989_s1 }
  0x5f   : > { %p4624_p2 = pnand %p4622_p11, %p4912_p4  ;;  %p4629_p10 = por %p4628_p7, %p4627_p5 }
  0x61   : > { %p4625_p3 = pneg %p4624_p2  ;;  %p4631_p9 = por %p4630_p8, %p4629_p10 }
  0x63   : > { %p4632_p12 = pnand %p4631_p9, %p4625_p3 }
  0x65   : > { %4635 = shalt.err (!%p4632_p12)
}
  0x66   : > { %s4636_s29 = scalar_lea.vmem %s4956_s19, 256  ;;  %s4743_s25 = smov [#allocation9]  }
  0x67   : > { %p4637_p1 = scmp.ne.s32.totalorder %s4956_s19, %s4636_s29  ;;  %s4641_s22 = sshll.u32 %s4743_s25, 4  ;;  %s4642_s22 = int_to_ptr.vmem [resolvable:$false] %s4641_s22 }
  0x68   : > { %s4643_s21 = scalar_lea.vmem %s4642_s22, 512  ;;  %p4644_p11 = scmp.lt.s32.totalorder %s4956_s19, %s4642_s22 }
  0x69   : > { %p4639_p6 = pnand %p4637_p1, %p4912_p4  ;;  %p4645_p2 = scmp.lt.s32.totalorder %s4643_s21, %s4636_s29 }
  0x6b   : > { %p4640_p13 = pneg %p4639_p6  ;;  %p4646_p5 = por %p4645_p2, %p4644_p11 }
  0x6d   : > { %p4647_p7 = pnand %p4646_p5, %p4640_p13 }
  0x6f   : > { %4650 = shalt.err (!%p4647_p7)
}
  0x70   : > { %3916 = dma.hbm_to_vmem [thread:$0]  (!%p4890_p0), %s4989_s1, 256, %s4956_s19, %s4906_s24, %s6703_s28, %s6703_s28, %s6702_s27  }
  0x71   : > { %p6704_p4 = scmp.ne.s32.totalorder %s6701_s23, 0 }
  0x73   : > { %436 = sbr.rel (%p6704_p4) target bundleno = 1178 (0x49a), region = 60 }
  0x7a   : > { %s5019_s17 = sand.u32 1, %s4721_s16   ;;  %p6705_p3 = scmp.ne.s32.totalorder %s6690_s26, 0 }
  0x7b   : > { %s439_s14 = scalar_lea.sflag [#allocation5], %s5019_s17 }
  0x7c   : > { %4704 = dma.done.wait (%p6705_p3), %s439_s14, 256  }
  0x7d   : > { %4706 = vsyncadd (%p6705_p3), %s439_s14, 4294967040  ;;  %s447_s12 = sand.u32 1, %s4845_s9   ;;  %s3527_s24 = sshll.u32 %s5019_s17, 8 }
  0x7e   : > { %s448_s19 = scalar_lea.sflag [#allocation8], %s447_s12  ;;  %s5030_s23 = scalar_lea.vmem [#allocation7], %s3527_s24 }
  0x7f   : > { %4708 = dma.done.wait (%p6705_p3), %s448_s19, 4352  }
  0x80   : > { %4710 = vsyncadd (%p6705_p3), %s448_s19, 4294962944  ;;  %v518_v0 = vld [vmem:[%s6648_s3] sm:$0xff]  ;;  %v519_v1 = vld [vmem:[%s6648_s3 + $0x8] sm:$0xff]  ;;  %vm565_vm0 = vcmask 523264   ;;  %vm985_vm1 = vcmask 130048   ;;  %v4744_v44 = vmov 0.0  }
  0x81   : > { %v520_v2 = vld [vmem:[%s6648_s3 + $0x10] sm:$0xff]  ;;  %v3834_v3 = vpack.c.bf16 %v519_v1, %v518_v0  ;;  %v521_v4 = vld [vmem:[%s6648_s3 + $0x18] sm:$0xff]  ;;  %v522_v6 = vld [vmem:[%s6648_s3 + $0x20] sm:$0xff]  ;;  %1219 = vst.msk [vmem:[#allocation2 + $0x110] sm:$0xff] %vm985_vm1, %v4744_v44  ;;  %vm1293_vm2 = vcmask 1040384   ;;  %s4745_s12 = smov 96  }
  0x82   : > { %v3838_v5 = vpack.c.bf16 %v521_v4, %v520_v2  ;;  %v523_v7 = vld [vmem:[%s6648_s3 + $0x28] sm:$0xff]  ;;  %v527_v8 = vld [vmem:[%s5030_s23] sm:$0xff]  ;;  %v524_v10 = vld [vmem:[%s6648_s3 + $0x30] sm:$0xff]  ;;  %1220 = vst.msk [vmem:[#allocation2 + $0x118] sm:$0xff] %vm985_vm1, %v4744_v44  ;;  %s517_s19 = sld [smem:[#allocation3]]  ;;  %v4746_v51 = vmov 0.0|0.0  }
  0x83   : > { %3835 = vmatprep.subr.bf16.mxu0 %v3834_v3  ;;  %3734 = vmatprep.mubr.msk.f32.mxu0 %vm565_vm0, %v527_v8  ;;  %v3842_v9 = vpack.c.bf16 %v523_v7, %v522_v6  ;;  %v525_v11 = vld [vmem:[%s6648_s3 + $0x38] sm:$0xff]  ;;  %v528_v13 = vld [vmem:[%s5030_s23 + $0x8] sm:$0xff]  ;;  %v529_v14 = vld [vmem:[%s5030_s23 + $0x10] sm:$0xff]  ;;  %1117 = vst.msk [vmem:[#allocation2] sm:$0xff] %vm985_vm1, %v4744_v44  ;;  %vm1468_vm9 = vcmask 1046528   ;;  %vm1645_vm12 = vcmask 1045504  }
  0x84   : > { %3837 = vmatpush3.bf16.msra.mxu0 %v3834_v3  ;;  %v3846_v12 = vpack.c.bf16 %v525_v11, %v524_v10  ;;  %v530_v15 = vld [vmem:[%s5030_s23 + $0x18] sm:$0xff]  ;;  %v531_v16 = vld [vmem:[%s5030_s23 + $0x20] sm:$0xff]  ;;  %v532_v17 = vld [vmem:[%s5030_s23 + $0x28] sm:$0xff]  ;;  %1118 = vst.msk [vmem:[#allocation2 + $0x8] sm:$0xff] %vm985_vm1, %v4744_v44  ;;  %3881 = vmatprep.subr.bf16.mxu1 %v4746_v51  ;;  %s4747_s30 = smov 16   ;;  %s4748_s13 = smov 48  }
  0x85   : > { %3839 = vmatprep.subr.bf16.mxu0 %v3838_v5  ;;  %v533_v18 = vld [vmem:[%s5030_s23 + $0x30] sm:$0xff]  ;;  %v534_v19 = vld [vmem:[%s5030_s23 + $0x38] sm:$0xff]  ;;  %v535_v20 = vld [vmem:[%s5030_s23 + $0x40] sm:$0xff]  ;;  %s4749_s20 = smov 32   ;;  %s4750_s26 = smov 64  }
  0x86   : > { %v536_v21 = vld [vmem:[%s5030_s23 + $0x48] sm:$0xff]  ;;  %v537_v22 = vld [vmem:[%s5030_s23 + $0x50] sm:$0xff]  ;;  %v538_v23 = vld [vmem:[%s5030_s23 + $0x58] sm:$0xff]  ;;  %s4751_s15 = smov 80   ;;  %s4752_s11 = smov 112  }
  0x87   : > { %v539_v24 = vld [vmem:[%s5030_s23 + $0x60] sm:$0xff]  ;;  %v540_v25 = vld [vmem:[%s5030_s23 + $0x68] sm:$0xff]  ;;  %v541_v26 = vld [vmem:[%s5030_s23 + $0x70] sm:$0xff]  ;;  %s6463_s27 = scalar_lea.vmem [#allocation10], %s3527_s24  ;;  %s3642_s24 = sshll.u32 %s4729_s18, 12 }
  0x88   : > { %3841 = vmatpush3.bf16.msra.mxu0 %v3838_v5  ;;  %v542_v27 = vld [vmem:[%s5030_s23 + $0x78] sm:$0xff]  ;;  %v543_v28 = vld [vmem:[%s5030_s23 + $0x80] sm:$0xff]  ;;  %v544_v29 = vld [vmem:[%s5030_s23 + $0x88] sm:$0xff]  ;;  %v5151_v54 = vstv %s517_s19  ;;  %s6725_s28 = sld [smem:[#allocation19_spill]]  ;;  %s3376_s1 = sshll.u32 %s6463_s27, 4  ;;  %s6591_s1 = int_to_ptr.vmem [resolvable:$true] %s3376_s1 }
  0x89   : > { %3843 = vmatprep.subr.bf16.mxu0 %v3842_v9  ;;  %v545_v30 = vld [vmem:[%s5030_s23 + $0x90] sm:$0xff]  ;;  %v546_v31 = vld [vmem:[%s5030_s23 + $0x98] sm:$0xff]  ;;  %v547_v32 = vld [vmem:[%s5030_s23 + $0xa0] sm:$0xff]  ;;  %6706 = vst [vmem:[#allocation22_spill] sm:$0xff] %v5151_v54  ;;  %s6726_s29 = sld [smem:[#allocation32_spill]]  ;;  %s3360_s18 = scalar_lea.sflag [#allocation6], %s5019_s17 }
  0x8a   : > { %v548_v33 = vld [vmem:[%s5030_s23 + $0xa8] sm:$0xff]  ;;  %v549_v34 = vld [vmem:[%s5030_s23 + $0xb0] sm:$0xff]  ;;  %v550_v35 = vld [vmem:[%s5030_s23 + $0xb8] sm:$0xff]  ;;  %s4651_s22 = scalar_lea.vmem %s6591_s1, 4096  ;;  %s4753_s21 = smov [#allocation10]  }
  0x8b   : > { %v551_v36 = vld [vmem:[%s5030_s23 + $0xc0] sm:$0xff]  ;;  %v552_v37 = vld [vmem:[%s5030_s23 + $0xc8] sm:$0xff]  ;;  %v553_v38 = vld [vmem:[%s5030_s23 + $0xd0] sm:$0xff]  ;;  %p4652_p0 = scmp.ne.s32.totalorder %s6591_s1, %s4651_s22  ;;  %s4655_s14 = sshll.u32 %s4753_s21, 4  ;;  %s4656_s14 = int_to_ptr.vmem [resolvable:$false] %s4655_s14 }
  0x8c   : > { %3845 = vmatpush3.bf16.msra.mxu0 %v3842_v9  ;;  %v554_v39 = vld [vmem:[%s5030_s23 + $0xd8] sm:$0xff]  ;;  %v555_v40 = vld [vmem:[%s5030_s23 + $0xe0] sm:$0xff]  ;;  %v556_v41 = vld [vmem:[%s5030_s23 + $0xe8] sm:$0xff]  ;;  %p4658_p12 = scmp.lt.s32.totalorder %s6591_s1, %s4656_s14 }
  0x8d   : > { %3847 = vmatprep.subr.bf16.mxu0 %v3846_v12  ;;  %v557_v42 = vld [vmem:[%s5030_s23 + $0xf0] sm:$0xff]  ;;  %v558_v43 = vld [vmem:[%s5030_s23 + $0xf8] sm:$0xff]  ;;  %v5141_v48 = vld [vmem:[%s6649_s4] ss:$0 sm:$0xff] }
  0x8e   : > { %v5128_v45 = vld [vmem:[#allocation2 + $0x110] sm:$0xff]  ;;  %v2555_v49 = vld [vmem:[%s6650_s5] sm:$0xff]  ;;  %v2556_v50 = vld [vmem:[%s6650_s5 + $0x8] sm:$0xff]  ;;  %p6727_p10 = scmp.ne.s32.totalorder %s6725_s28, 0 }
  0x8f   : > { %v6672_v46 = vrot.slane %v5128_v45, 7  ;;  %v3851_v52 = vpack.c.bf16 %v2556_v50, %v2555_v49  ;;  %v2557_v58 = vld [vmem:[%s6650_s5 + $0x10] sm:$0xff]  ;;  %v2558_v59 = vld [vmem:[%s6650_s5 + $0x18] sm:$0xff]  ;;  %v2559_v5 = vld [vmem:[%s6650_s5 + $0x20] sm:$0xff]  ;;  %s6589_s25 = scalar_lea.hbm %s6726_s29, %s3642_s24 }
  0x90   : > { %3849 = vmatpush3.bf16.msra.mxu0 %v3846_v12  ;;  %v3854_v61 = vpack.c.bf16 %v2558_v59, %v2557_v58  ;;  %v2560_v6 = vld [vmem:[%s6650_s5 + $0x28] sm:$0xff]  ;;  %p4653_p8 = pnand %p4652_p0, %p6727_p10 }
  0x91   : > { %v5134_v47 = vsel %vm1293_vm2, 0.0, %v6672_v46  ;;  %3850 = vmatprep.subr.bf16.mxu0 %v4746_v51  ;;  %3890 = vmatpush1.bf16.msra.mxu1 %v3851_v52  ;;  %v3857_v8 = vpack.c.bf16 %v2560_v6, %v2559_v5 }
  0x92   : > { %2183 = vrot.lane.b32.xlu0 %v5134_v47, %s4745_s12  ;;  %3882 = vmatprep.subr.bf16.mxu1 %v4746_v51  ;;  %p4654_p9 = pneg %p4653_p8 }
  0x93   : > { %3735 = vmatmul.mubr.msk.f32.vlgmr.msra.gmra.mrb[0].mxu0 %vm565_vm0, %v528_v13 }
  0x94   : > { %3737 = vmatprep.mubr.msk.f32.mxu0 %vm565_vm0, %v529_v14  ;;  %3852 = vmatpush1.bf16.msra.mxu0 %v3851_v52 }
  0x95   : > { %3853 = vmatprep.subr.bf16.mxu0 %v4746_v51  ;;  %3891 = vmatpush1.bf16.msra.mxu1 %v3854_v61 }
  0x96   : > { %3883 = vmatprep.subr.bf16.mxu1 %v4746_v51 }
  0x97   : > { %3738 = vmatmul.mubr.msk.f32.gmra.mrb[2].mxu0 %vm565_vm0, %v530_v15 }
  0x98   : > { %3740 = vmatprep.mubr.msk.f32.mxu0 %vm565_vm0, %v531_v16  ;;  %3855 = vmatpush1.bf16.msra.mxu0 %v3854_v61  ;;  %v2561_v16 = vld [vmem:[%s6650_s5 + $0x30] sm:$0xff] }
  0x99   : > { %3856 = vmatprep.subr.bf16.mxu0 %v4746_v51  ;;  %3892 = vmatpush1.bf16.msra.mxu1 %v3857_v8 }
  0x9a   : > { %3884 = vmatprep.subr.bf16.mxu1 %v4746_v51 }
  0x9b   : > { %3741 = vmatmul.mubr.msk.f32.gmra.mrb[4].mxu0 %vm565_vm0, %v532_v17  ;;  %v2562_v17 = vld [vmem:[%s6650_s5 + $0x38] sm:$0xff] }
  0x9c   : > { %3743 = vmatprep.mubr.msk.f32.mxu0 %vm565_vm0, %v533_v18  ;;  %3858 = vmatpush1.bf16.msra.mxu0 %v3857_v8 }
  0x9d   : > { %3859 = vmatprep.subr.bf16.mxu0 %v4746_v51 }
  0x9f   : > { %3744 = vmatmul.mubr.msk.f32.gmra.mrb[6].mxu0 %vm565_vm0, %v534_v19  ;;  %v3860_v19 = vpack.c.bf16 %v2562_v17, %v2561_v16 }
  0xa0   : > { %3746 = vmatprep.mubr.msk.f32.mxu0 %vm565_vm0, %v535_v20 }
  0xa1   : > { %3893 = vmatpush1.bf16.msra.mxu1 %v3860_v19  ;;  %3861 = vmatpush1.bf16.msra.mxu0 %v3860_v19 }
  0xa2   : > { %3885 = vmatprep.subr.bf16.mxu1 %v4746_v51  ;;  %3862 = vmatprep.subr.bf16.mxu0 %v4746_v51 }
  0xa3   : > { %3747 = vmatmul.mubr.msk.f32.gmra.mrb[8].mxu0 %vm565_vm0, %v536_v21 }
  0xa4   : > { %3749 = vmatprep.mubr.msk.f32.mxu0 %vm565_vm0, %v537_v22 }
  0xa7   : > { %3750 = vmatmul.mubr.msk.f32.gmra.mrb[10].mxu0 %vm565_vm0, %v538_v23 }
  0xa8   : > { %3752 = vmatprep.mubr.msk.f32.mxu0 %vm565_vm0, %v539_v24 }
  0xab   : > { %3753 = vmatmul.mubr.msk.f32.gmra.mrb[12].mxu0 %vm565_vm0, %v540_v25 }
  0xac   : > { %3755 = vmatprep.mubr.msk.f32.mxu0 %vm565_vm0, %v541_v26 }
  0xaf   : > { %3756 = vmatmul.mubr.msk.f32.gmra.mrb[14].mxu0 %vm565_vm0, %v542_v27 }
  0xb0   : > { %3758 = vmatprep.mubr.msk.f32.mxu0 %vm565_vm0, %v543_v28 }
  0xb3   : > { %3759 = vmatmul.mubr.msk.f32.gmra.mrb[16].mxu0 %vm565_vm0, %v544_v29 }
  0xb4   : > { %3761 = vmatprep.mubr.msk.f32.mxu0 %vm565_vm0, %v545_v30  ;;  %v2563_v30 = vld [vmem:[%s6650_s5 + $0x40] sm:$0xff] }
  0xb7   : > { %3762 = vmatmul.mubr.msk.f32.gmra.mrb[18].mxu0 %vm565_vm0, %v546_v31  ;;  %v2564_v31 = vld [vmem:[%s6650_s5 + $0x48] sm:$0xff] }
  0xb8   : > { %3764 = vmatprep.mubr.msk.f32.mxu0 %vm565_vm0, %v547_v32 }
  0xbb   : > { %3765 = vmatmul.mubr.msk.f32.gmra.mrb[20].mxu0 %vm565_vm0, %v548_v33 }
  0xbc   : > { %3767 = vmatprep.mubr.msk.f32.mxu0 %vm565_vm0, %v549_v34  ;;  %v3863_v34 = vpack.c.bf16 %v2564_v31, %v2563_v30 }
  0xbe   : > { %3894 = vmatpush1.bf16.msra.mxu1 %v3863_v34  ;;  %3864 = vmatpush1.bf16.msra.mxu0 %v3863_v34 }
  0xbf   : > { %3768 = vmatmul.mubr.msk.f32.gmra.mrb[22].mxu0 %vm565_vm0, %v550_v35  ;;  %3886 = vmatprep.subr.bf16.mxu1 %v4746_v51 }
  0xc0   : > { %3770 = vmatprep.mubr.msk.f32.mxu0 %vm565_vm0, %v551_v36  ;;  %3865 = vmatprep.subr.bf16.mxu0 %v4746_v51 }
  0xc3   : > { %3771 = vmatmul.mubr.msk.f32.gmra.mrb[24].mxu0 %vm565_vm0, %v552_v37 }
  0xc4   : > { %3773 = vmatprep.mubr.msk.f32.mxu0 %vm565_vm0, %v553_v38 }
  0xc7   : > { %3774 = vmatmul.mubr.msk.f32.gmra.mrb[26].mxu0 %vm565_vm0, %v554_v39 }
  0xc8   : > { %3776 = vmatprep.mubr.msk.f32.mxu0 %vm565_vm0, %v555_v40 }
  0xcb   : > { %3777 = vmatmul.mubr.msk.f32.gmra.mrb[28].mxu0 %vm565_vm0, %v556_v41 }
  0xcc   : > { %3779 = vmatprep.mubr.msk.f32.mxu0 %vm565_vm0, %v557_v42 }
  0xcf   : > { %3780 = vmatmul.mubr.msk.f32.gmra.mrb[30].mxu0 %vm565_vm0, %v558_v43 }
 0x166   : > { %v3736_v53 = vpop.f32.mrb[0].mxu0 }
 0x167   : > { %v734_v55 = vadd.f32 %v3736_v53, %v5141_v48  ;;  %v728_v56 = vpop.f32.mrb[1].mxu0 }
 0x168   : > { %v729_v57 = vadd.f32 %v5141_v48, %v728_v56 }
 0x169   : > { %vm888_vm3 = vcmp.gt.f32.partialorder %v734_v55, 0.0  ;;  %v921_v60 = vmul.f32 %v5151_v54, %v734_v55 }
 0x16a   : > { %vm887_vm4 = vcmp.gt.f32.partialorder %v729_v57, 0.0  ;;  %v920_v62 = vmul.f32 %v5151_v54, %v729_v57  ;;  %v3739_v63 = vpop.f32.mrb[2].mxu0 }
 0x16b   : > { %v953_v0 = vsel %vm888_vm3, %v734_v55, %v921_v60  ;;  %v744_v1 = vadd.f32 %v3739_v63, %v5141_v48  ;;  %v738_v2 = vpop.f32.mrb[3].mxu0 }
 0x16c   : > { %987 = vst.msk [vmem:[#allocation2 + $0x18] sm:$0xff] %vm985_vm1, %v953_v0  ;;  %v952_v3 = vsel %vm887_vm4, %v729_v57, %v920_v62  ;;  %v739_v4 = vadd.f32 %v5141_v48, %v738_v2 }
 0x16d   : > { %986 = vst.msk [vmem:[#allocation2 + $0x10] sm:$0xff] %vm985_vm1, %v952_v3  ;;  %vm890_vm5 = vcmp.gt.f32.partialorder %v744_v1, 0.0  ;;  %v923_v7 = vmul.f32 %v5151_v54, %v744_v1 }
 0x16e   : > { %vm889_vm6 = vcmp.gt.f32.partialorder %v739_v4, 0.0  ;;  %v922_v9 = vmul.f32 %v5151_v54, %v739_v4  ;;  %v3742_v10 = vpop.f32.mrb[4].mxu0 }
 0x16f   : > { %v955_v11 = vsel %vm890_vm5, %v744_v1, %v923_v7  ;;  %v754_v12 = vadd.f32 %v3742_v10, %v5141_v48  ;;  %v748_v13 = vpop.f32.mrb[5].mxu0 }
 0x170   : > { %989 = vst.msk [vmem:[#allocation2 + $0x28] sm:$0xff] %vm985_vm1, %v955_v11  ;;  %v954_v14 = vsel %vm889_vm6, %v739_v4, %v922_v9  ;;  %v749_v15 = vadd.f32 %v5141_v48, %v748_v13 }
 0x171   : > { %988 = vst.msk [vmem:[#allocation2 + $0x20] sm:$0xff] %vm985_vm1, %v954_v14  ;;  %vm892_vm7 = vcmp.gt.f32.partialorder %v754_v12, 0.0  ;;  %v925_v18 = vmul.f32 %v5151_v54, %v754_v12 }
 0x172   : > { %vm891_vm8 = vcmp.gt.f32.partialorder %v749_v15, 0.0  ;;  %v924_v20 = vmul.f32 %v5151_v54, %v749_v15  ;;  %v3745_v21 = vpop.f32.mrb[6].mxu0 }
 0x173   : > { %v957_v22 = vsel %vm892_vm7, %v754_v12, %v925_v18  ;;  %v764_v23 = vadd.f32 %v3745_v21, %v5141_v48  ;;  %v758_v24 = vpop.f32.mrb[7].mxu0  ;;  %v1224_v25 = vld [vmem:[#allocation2 + $0x18] sm:$0xff] }
 0x174   : > { %991 = vst.msk [vmem:[#allocation2 + $0x38] sm:$0xff] %vm985_vm1, %v957_v22  ;;  %v956_v26 = vsel %vm891_vm8, %v749_v15, %v924_v20  ;;  %v759_v27 = vadd.f32 %v5141_v48, %v758_v24  ;;  %v1223_v28 = vld [vmem:[#allocation2 + $0x10] sm:$0xff]  ;;  %v1298_v29 = vrot.slane %v1224_v25, 7 }
 0x175   : > { %990 = vst.msk [vmem:[#allocation2 + $0x30] sm:$0xff] %vm985_vm1, %v956_v26  ;;  %vm894_vm10 = vcmp.gt.f32.partialorder %v764_v23, 0.0  ;;  %v927_v32 = vmul.f32 %v5151_v54, %v764_v23  ;;  %v1297_v33 = vrot.slane %v1223_v28, 7 }
 0x176   : > { %vm893_vm11 = vcmp.gt.f32.partialorder %v759_v27, 0.0  ;;  %v926_v35 = vmul.f32 %v5151_v54, %v759_v27  ;;  %v3748_v36 = vpop.f32.mrb[8].mxu0  ;;  %v5208_v37 = vsel %vm1293_vm2, %v1298_v29, 0.0 }
 0x177   : > { %v959_v38 = vsel %vm894_vm10, %v764_v23, %v927_v32  ;;  %v774_v39 = vadd.f32 %v3748_v36, %v5141_v48  ;;  %v768_v40 = vpop.f32.mrb[9].mxu0  ;;  %v5212_v41 = vsel %vm1293_vm2, %v1297_v33, %v1298_v29  ;;  %v5215_v42 = vsel %vm1293_vm2, 0.0, %v1297_v33  ;;  %v1226_v43 = vld [vmem:[#allocation2 + $0x28] sm:$0xff] }
 0x178   : > { %993 = vst.msk [vmem:[#allocation2 + $0x48] sm:$0xff] %vm985_vm1, %v959_v38  ;;  %v958_v44 = vsel %vm893_vm11, %v759_v27, %v926_v35  ;;  %v769_v49 = vadd.f32 %v5141_v48, %v768_v40  ;;  %v1474_v50 = vrot.slane %v5215_v42, 1  ;;  %v1475_v52 = vrot.slane %v5212_v41, 1  ;;  %v1225_v53 = vld [vmem:[#allocation2 + $0x20] sm:$0xff] }
 0x179   : > { %992 = vst.msk [vmem:[#allocation2 + $0x40] sm:$0xff] %vm985_vm1, %v958_v44  ;;  %vm896_vm13 = vcmp.gt.f32.partialorder %v774_v39, 0.0  ;;  %v929_v55 = vmul.f32 %v5151_v54, %v774_v39  ;;  %v1477_v56 = vrot.slane %v5208_v37, 1  ;;  %v1300_v57 = vrot.slane %v1225_v53, 7 }
 0x17a   : > { %vm895_vm14 = vcmp.gt.f32.partialorder %v769_v49, 0.0  ;;  %v928_v58 = vmul.f32 %v5151_v54, %v769_v49  ;;  %v5228_v59 = vsel %vm1468_vm9, %v1474_v50, %v1475_v52  ;;  %v3751_v60 = vpop.f32.mrb[10].mxu0  ;;  %v1301_v61 = vrot.slane %v1226_v43, 7 }
 0x17b   : > { %v961_v62 = vsel %vm896_vm13, %v774_v39, %v929_v55  ;;  %v5231_v63 = vsel %vm1468_vm9, %v1475_v52, %v1477_v56  ;;  %v784_v0 = vadd.f32 %v3751_v60, %v5141_v48  ;;  %v5235_v1 = vsel %vm1293_vm2, 0.0, %v1300_v57  ;;  %v778_v2 = vpop.f32.mrb[11].mxu0 }
 0x17c   : > { %995 = vst.msk [vmem:[#allocation2 + $0x58] sm:$0xff] %vm985_vm1, %v961_v62  ;;  %v960_v3 = vsel %vm895_vm14, %v769_v49, %v928_v58  ;;  %v3984_v4 = vpack.i.bf16 %v5231_v63, %v5228_v59  ;;  %v5241_v5 = vsel %vm1293_vm2, %v1300_v57, %v1301_v61  ;;  %v779_v6 = vadd.f32 %v5141_v48, %v778_v2  ;;  %v1227_v26 = vld [vmem:[#allocation2 + $0x30] sm:$0xff]  ;;  %v1228_v49 = vld [vmem:[#allocation2 + $0x38] sm:$0xff] }
 0x17d   : > { %994 = vst.msk [vmem:[#allocation2 + $0x50] sm:$0xff] %vm985_vm1, %v960_v3  ;;  %vm898_vm15 = vcmp.gt.f32.partialorder %v784_v0, 0.0  ;;  %v931_v7 = vmul.f32 %v5151_v54, %v784_v0  ;;  %v3994_v8 = vpack.i.bf16 %v5241_v5, %v5235_v1  ;;  %v1656_v9 = vrot.slane %v5235_v1, 2 }
 0x17e   : > { %3985 = vrot.lane.b32.xlu0 %v3984_v4, %s4747_s30  ;;  %vm897_vm3 = vcmp.gt.f32.partialorder %v779_v6, 0.0  ;;  %v930_v10 = vmul.f32 %v5151_v54, %v779_v6  ;;  %v1657_v11 = vrot.slane %v5241_v5, 2  ;;  %v3754_v12 = vpop.f32.mrb[12].mxu0  ;;  %v1651_v13 = vrot.slane %v5215_v42, 2 }
 0x17f   : > { %v963_v14 = vsel %vm898_vm15, %v784_v0, %v931_v7  ;;  %3995 = vrot.lane.b32.xlu1 %v3994_v8, %s4748_s13  ;;  %v794_v15 = vadd.f32 %v3754_v12, %v5141_v48  ;;  %v788_v16 = vpop.f32.mrb[13].mxu0  ;;  %v1652_v17 = vrot.slane %v5212_v41, 2  ;;  %v1654_v18 = vrot.slane %v5208_v37, 2 }
 0x180   : > { %997 = vst.msk [vmem:[#allocation2 + $0x68] sm:$0xff] %vm985_vm1, %v963_v14  ;;  %v962_v19 = vsel %vm897_vm3, %v779_v6, %v930_v10  ;;  %v1658_v20 = vsel %vm1645_vm12, %v1656_v9, %v1657_v11  ;;  %v789_v21 = vadd.f32 %v5141_v48, %v788_v16  ;;  %v1420_v22 = vsel %vm1293_vm2, %v1301_v61, 0.0 }
 0x181   : > { %996 = vst.msk [vmem:[#allocation2 + $0x60] sm:$0xff] %vm985_vm1, %v962_v19  ;;  %3568 = vmatprep.mubr.msk.f32.mxu0 %vm985_vm1, %v1658_v20  ;;  %vm900_vm4 = vcmp.gt.f32.partialorder %v794_v15, 0.0  ;;  %v933_v23 = vmul.f32 %v5151_v54, %v794_v15  ;;  %v5265_v24 = vsel %vm1645_vm12, %v1651_v13, %v1652_v17  ;;  %v5268_v25 = vsel %vm1645_vm12, %v1652_v17, %v1654_v18  ;;  %v1229_v18 = vld [vmem:[#allocation2 + $0x40] sm:$0xff]  ;;  %v1230_v19 = vld [vmem:[#allocation2 + $0x48] sm:$0xff] }
 0x182   : > { %vm899_vm5 = vcmp.gt.f32.partialorder %v789_v21, 0.0  ;;  %v932_v27 = vmul.f32 %v5151_v54, %v789_v21  ;;  %v3989_v28 = vpack.i.bf16 %v5268_v25, %v5265_v24  ;;  %v3757_v29 = vpop.f32.mrb[14].mxu0  ;;  %v1479_v30 = vrot.slane %v5235_v1, 1 }
 0x183   : > { %v965_v31 = vsel %vm900_vm4, %v794_v15, %v933_v23  ;;  %v804_v32 = vadd.f32 %v3757_v29, %v5141_v48  ;;  %v1480_v33 = vrot.slane %v5241_v5, 1  ;;  %v1482_v34 = vrot.slane %v1420_v22, 1  ;;  %v798_v35 = vpop.f32.mrb[15].mxu0 }
 0x184   : > { %999 = vst.msk [vmem:[#allocation2 + $0x78] sm:$0xff] %vm985_vm1, %v965_v31  ;;  %v964_v36 = vsel %vm899_vm5, %v789_v21, %v932_v27  ;;  %3990 = vrot.lane.b32.xlu0 %v3989_v28, %s4749_s20  ;;  %v799_v37 = vadd.f32 %v5141_v48, %v798_v35  ;;  %v1659_v38 = vrot.slane %v1420_v22, 2  ;;  %v1303_v39 = vrot.slane %v1227_v26, 7 }
 0x185   : > { %998 = vst.msk [vmem:[#allocation2 + $0x70] sm:$0xff] %vm985_vm1, %v964_v36  ;;  %vm902_vm6 = vcmp.gt.f32.partialorder %v804_v32, 0.0  ;;  %v935_v40 = vmul.f32 %v5151_v54, %v804_v32  ;;  %v5282_v43 = vsel %vm1468_vm9, %v1479_v30, %v1480_v33  ;;  %v5285_v44 = vsel %vm1468_vm9, %v1480_v33, %v1482_v34 }
 0x186   : > { %v3999_v50 = vpack.i.bf16 %v5285_v44, %v5282_v43  ;;  %vm901_vm7 = vcmp.gt.f32.partialorder %v799_v37, 0.0  ;;  %v934_v52 = vmul.f32 %v5151_v54, %v799_v37  ;;  %v5291_v53 = vsel %vm1645_vm12, %v1657_v11, %v1659_v38  ;;  %v3760_v55 = vpop.f32.mrb[16].mxu0 }
 0x187   : > { %v967_v56 = vsel %vm902_vm6, %v804_v32, %v935_v40  ;;  %v4004_v57 = vpack.i.bf16 %v5291_v53, %v1658_v20  ;;  %v814_v58 = vadd.f32 %v3760_v55, %v5141_v48  ;;  %v808_v60 = vpop.f32.mrb[17].mxu0  ;;  %v1304_v0 = vrot.slane %v1228_v49, 7  ;;  %v1232_v55 = vld [vmem:[#allocation2 + $0x58] sm:$0xff] }
 0x188   : > { %1001 = vst.msk [vmem:[#allocation2 + $0x88] sm:$0xff] %vm985_vm1, %v967_v56  ;;  %4000 = vrot.lane.b32.xlu1 %v3999_v50, %s4750_s26  ;;  %v966_v61 = vsel %vm901_vm7, %v799_v37, %v934_v52  ;;  %v809_v62 = vadd.f32 %v5141_v48, %v808_v60  ;;  %v5299_v2 = vsel %vm1293_vm2, 0.0, %v1303_v39  ;;  %v1306_v29 = vrot.slane %v1229_v18, 7  ;;  %v1231_v52 = vld [vmem:[#allocation2 + $0x50] sm:$0xff] }
 0x189   : > { %1000 = vst.msk [vmem:[#allocation2 + $0x80] sm:$0xff] %vm985_vm1, %v966_v61  ;;  %4005 = vrot.lane.b32.xlu0 %v4004_v57, %s4751_s15  ;;  %vm904_vm8 = vcmp.gt.f32.partialorder %v814_v58, 0.0  ;;  %v937_v3 = vmul.f32 %v5151_v54, %v814_v58  ;;  %v1661_v4 = vrot.slane %v5299_v2, 2  ;;  %v5307_v7 = vsel %vm1293_vm2, %v1303_v39, %v1304_v0 }
 0x18a   : > { %vm903_vm10 = vcmp.gt.f32.partialorder %v809_v62, 0.0  ;;  %v936_v6 = vmul.f32 %v5151_v54, %v809_v62  ;;  %v1421_v8 = vsel %vm1293_vm2, %v1304_v0, 0.0  ;;  %v5310_v9 = vpop.f32.mrb[18].mxu0  ;;  %v1662_v11 = vrot.slane %v5307_v7, 2 }
 0x18b   : > { %v969_v10 = vsel %vm904_vm8, %v814_v58, %v937_v3  ;;  %v1484_v12 = vrot.slane %v5299_v2, 1  ;;  %v5314_v13 = vpop.f32.mrb[19].mxu0  ;;  %v1485_v15 = vrot.slane %v5307_v7, 1  ;;  %v1487_v16 = vrot.slane %v1421_v8, 1 }
 0x18c   : > { %1003 = vst.msk [vmem:[#allocation2 + $0x98] sm:$0xff] %vm985_vm1, %v969_v10  ;;  %4010 = vrot.lane.b32.xlu1 %v3999_v50, %s4747_s30  ;;  %v968_v14 = vsel %vm903_vm10, %v809_v62, %v936_v6  ;;  %v1663_v17 = vsel %vm1645_vm12, %v1661_v4, %v1662_v11  ;;  %v4019_v20 = vpack.i.bf16 %v5307_v7, %v5299_v2  ;;  %v1664_v27 = vrot.slane %v1421_v8, 2 }
 0x18d   : > { %1002 = vst.msk [vmem:[#allocation2 + $0x90] sm:$0xff] %vm985_vm1, %v968_v14  ;;  %4015 = vrot.lane.b32.xlu0 %v4004_v57, %s4749_s20  ;;  %3570 = vmatprep.mubr.msk.f32.mxu1 %vm985_vm1, %v1663_v17  ;;  %v1486_v21 = vsel %vm1468_vm9, %v1484_v12, %v1485_v15  ;;  %v1488_v22 = vsel %vm1468_vm9, %v1485_v15, %v1487_v16  ;;  %v1307_v30 = vrot.slane %v1230_v19, 7  ;;  %v5345_v35 = vsel %vm1293_vm2, 0.0, %v1306_v29 }
 0x18e   : > { %v5327_v23 = vpop.f32.mrb[20].mxu0  ;;  %v4029_v26 = vpack.i.bf16 %v1488_v22, %v1486_v21  ;;  %v5336_v32 = vsel %vm1645_vm12, %v1662_v11, %v1664_v27  ;;  %v1489_v39 = vrot.slane %v5345_v35, 1  ;;  %v1666_v60 = vrot.slane %v5345_v35, 2 }
 0x18f   : > { %v5329_v28 = vpop.f32.mrb[21].mxu0  ;;  %v5342_v34 = vsel %vm1293_vm2, %v1306_v29, %v1307_v30  ;;  %v1422_v36 = vsel %vm1293_vm2, %v1307_v30, 0.0  ;;  %v4039_v37 = vpack.i.bf16 %v5336_v32, %v1663_v17  ;;  %v1309_v0 = vrot.slane %v1231_v52, 7  ;;  %v1233_v29 = vld [vmem:[#allocation2 + $0x60] sm:$0xff]  ;;  %v1234_v30 = vld [vmem:[#allocation2 + $0x68] sm:$0xff] }
 0x190   : > { %4020 = vrot.lane.b32.xlu1 %v4019_v20, %s4745_s12  ;;  %v1490_v40 = vrot.slane %v5342_v34, 1  ;;  %v1492_v49 = vrot.slane %v1422_v36, 1  ;;  %v4054_v56 = vpack.i.bf16 %v5342_v34, %v5345_v35  ;;  %v1667_v61 = vrot.slane %v5342_v34, 2 }
 0x191   : > { %4030 = vrot.lane.b32.xlu0 %v4029_v26, %s4752_s11  ;;  %v1669_v62 = vrot.slane %v1422_v36, 2  ;;  %v1310_v3 = vrot.slane %v1232_v55, 7  ;;  %v5380_v12 = vsel %vm1293_vm2, 0.0, %v1309_v0  ;;  %v819_v52 = vadd.f32 %v5141_v48, %v5314_v13 }
 0x192   : > { %v5333_v31 = vpop.f32.mrb[22].mxu0  ;;  %v1491_v57 = vsel %vm1468_vm9, %v1489_v39, %v1490_v40  ;;  %v1493_v58 = vsel %vm1468_vm9, %v1490_v40, %v1492_v49  ;;  %v5368_v6 = vsel %vm1645_vm12, %v1666_v60, %v1667_v61  ;;  %v1494_v17 = vrot.slane %v5380_v12, 1 }
 0x193   : > { %v5338_v33 = vpop.f32.mrb[23].mxu0  ;;  %v4064_v4 = vpack.i.bf16 %v1493_v58, %v1491_v57  ;;  %v5371_v8 = vsel %vm1645_vm12, %v1667_v61, %v1669_v62  ;;  %v5377_v11 = vsel %vm1293_vm2, %v1309_v0, %v1310_v3  ;;  %v1423_v14 = vsel %vm1293_vm2, %v1310_v3, 0.0  ;;  %v2566_v0 = vld [vmem:[%s6650_s5 + $0x58] sm:$0xff] }
 0x194   : > { %4025 = vrot.lane.b32.xlu1 %v4019_v20, %s4748_s13  ;;  %v4074_v16 = vpack.i.bf16 %v5371_v8, %v5368_v6  ;;  %v1495_v18 = vrot.slane %v5377_v11, 1  ;;  %v1497_v19 = vrot.slane %v1423_v14, 1  ;;  %v824_v20 = vadd.f32 %v5310_v9, %v5141_v48 }
 0x195   : > { %4035 = vrot.lane.b32.xlu0 %v4029_v26, %s4750_s26  ;;  %v1672_v27 = vrot.slane %v5377_v11, 2  ;;  %v4089_v36 = vpack.i.bf16 %v5377_v11, %v5380_v12  ;;  %v1674_v39 = vrot.slane %v1423_v14, 2  ;;  %v1312_v9 = vrot.slane %v1233_v29, 7 }
 0x196   : > { %v5350_v38 = vpop.f32.mrb[24].mxu0  ;;  %v1496_v21 = vsel %vm1468_vm9, %v1494_v17, %v1495_v18  ;;  %v1498_v22 = vsel %vm1468_vm9, %v1495_v18, %v1497_v19  ;;  %vm906_vm11 = vcmp.gt.f32.partialorder %v824_v20, 0.0  ;;  %v1313_v40 = vrot.slane %v1234_v30, 7  ;;  %v1235_v30 = vld [vmem:[#allocation2 + $0x70] sm:$0xff] }
 0x197   : > { %v5354_v50 = vpop.f32.mrb[25].mxu0  ;;  %v939_v49 = vmul.f32 %v5151_v54, %v824_v20  ;;  %vm905_vm13 = vcmp.gt.f32.partialorder %v819_v52, 0.0  ;;  %v938_v60 = vmul.f32 %v5151_v54, %v819_v52  ;;  %v829_v61 = vadd.f32 %v5141_v48, %v5329_v28 }
 0x198   : > { %4040 = vrot.lane.b32.xlu1 %v4039_v37, %s4751_s15  ;;  %v5417_v62 = vsel %vm1645_vm12, %v1672_v27, %v1674_v39  ;;  %v5431_v28 = vsel %vm1293_vm2, %v1312_v9, %v1313_v40  ;;  %v1424_v14 = vsel %vm1293_vm2, %v1313_v40, 0.0  ;;  %v2569_v40 = vld [vmem:[%s6650_s5 + $0x70] sm:$0xff] }
 0x199   : > { %4045 = vrot.lane.b32.xlu0 %v4029_v26, %s4747_s30  ;;  %v1671_v26 = vrot.slane %v5380_v12, 2  ;;  %v971_v58 = vsel %vm906_vm11, %v824_v20, %v939_v49  ;;  %vm907_vm15 = vcmp.gt.f32.partialorder %v829_v61, 0.0  ;;  %v940_v19 = vmul.f32 %v5151_v54, %v829_v61  ;;  %v2570_v49 = vld [vmem:[%s6650_s5 + $0x78] sm:$0xff] }
 0x19a   : > { %v5373_v10 = vpop.f32.mrb[26].mxu0  ;;  %1005 = vst.msk [vmem:[#allocation2 + $0xa8] sm:$0xff] %vm985_vm1, %v971_v58  ;;  %v1502_v29 = vrot.slane %v1424_v14, 1 }
 0x19b   : > { %v5383_v15 = vpop.f32.mrb[27].mxu0  ;;  %v5407_v55 = vsel %vm1645_vm12, %v1671_v26, %v1672_v27  ;;  %v1500_v27 = vrot.slane %v5431_v28, 1  ;;  %v972_v39 = vsel %vm907_vm15, %v829_v61, %v940_v19  ;;  %v2571_v19 = vld [vmem:[%s6650_s5 + $0x80] sm:$0xff]  ;;  %vm2358_vm15 = vcmask 261120  }
 0x19c   : > { %4050 = vrot.lane.b32.xlu1 %v4039_v37, %s4749_s20  ;;  %v4099_v37 = vpack.i.bf16 %v1498_v22, %v1496_v21  ;;  %v4109_v18 = vpack.i.bf16 %v5417_v62, %v5407_v55  ;;  %v2567_v21 = vld [vmem:[%s6650_s5 + $0x60] sm:$0xff]  ;;  %v2568_v22 = vld [vmem:[%s6650_s5 + $0x68] sm:$0xff]  ;;  %1006 = vst.msk [vmem:[#allocation2 + $0xb0] sm:$0xff] %vm985_vm1, %v972_v39 }
 0x19d   : > { %4055 = vrot.lane.b32.xlu0 %v4054_v56, %s4745_s12 }
 0x19e   : > { %v5411_v57 = vpop.f32.mrb[28].mxu0 }
 0x19f   : > { %v5427_v3 = vpop.f32.mrb[29].mxu0 }
 0x1a0   : > { %4065 = vrot.lane.b32.xlu1 %v4064_v4, %s4752_s11 }
 0x1a1   : > { %4060 = vrot.lane.b32.xlu0 %v4054_v56, %s4748_s13  ;;  %v834_v56 = vadd.f32 %v5327_v23, %v5141_v48  ;;  %v2565_v23 = vld [vmem:[%s6650_s5 + $0x50] sm:$0xff] }
 0x1a2   : > { %v3866_v20 = vpack.c.bf16 %v2566_v0, %v2565_v23  ;;  %v1679_v23 = vrot.slane %v1424_v14, 2  ;;  %v3872_v0 = vpack.c.bf16 %v2570_v49, %v2569_v40  ;;  %v2572_v14 = vld [vmem:[%s6650_s5 + $0x88] sm:$0xff]  ;;  %v854_v40 = vadd.f32 %v5350_v38, %v5141_v48 }
 0x1a3   : > { %vm908_vm14 = vcmp.gt.f32.partialorder %v834_v56, 0.0  ;;  %v941_v13 = vmul.f32 %v5151_v54, %v834_v56 }
 0x1a4   : > { %4070 = vrot.lane.b32.xlu1 %v4064_v4, %s4750_s26  ;;  %3895 = vmatpush1.bf16.msra.mxu1 %v3866_v20  ;;  %vm912_vm5 = vcmp.gt.f32.partialorder %v854_v40, 0.0 }
 0x1a5   : > { %4075 = vrot.lane.b32.xlu0 %v4074_v16, %s4751_s15  ;;  %v973_v17 = vsel %vm908_vm14, %v834_v56, %v941_v13  ;;  %3887 = vmatprep.subr.bf16.mxu1 %v4746_v51  ;;  %v1315_v56 = vrot.slane %v1235_v30, 7  ;;  %v1677_v13 = vrot.slane %v5431_v28, 2 }
 0x1a6   : > { %1007 = vst.msk [vmem:[#allocation2 + $0xb8] sm:$0xff] %vm985_vm1, %v973_v17  ;;  %3867 = vmatpush1.bf16.msra.mxu0 %v3866_v20  ;;  %v839_v17 = vadd.f32 %v5141_v48, %v5338_v33 }
 0x1a7   : > { %3868 = vmatprep.subr.bf16.mxu0 %v4746_v51 }
 0x1a8   : > { %4080 = vrot.lane.b32.xlu1 %v4064_v4, %s4747_s30  ;;  %v5434_v4 = vsel %vm1293_vm2, 0.0, %v1312_v9  ;;  %v3869_v9 = vpack.c.bf16 %v2568_v22, %v2567_v21  ;;  %vm909_vm4 = vcmp.gt.f32.partialorder %v839_v17, 0.0  ;;  %v942_v33 = vmul.f32 %v5151_v54, %v839_v17 }
 0x1a9   : > { %4085 = vrot.lane.b32.xlu0 %v4074_v16, %s4749_s20  ;;  %v970_v16 = vsel %vm905_vm13, %v819_v52, %v938_v60  ;;  %v1499_v26 = vrot.slane %v5434_v4, 1  ;;  %v4124_v52 = vpack.i.bf16 %v5431_v28, %v5434_v4  ;;  %v1503_v60 = vsel %vm1468_vm9, %v1500_v27, %v1502_v29  ;;  %v5497_v29 = vpop.f32.mrb[30].mxu0 }
 0x1aa   : > { %1004 = vst.msk [vmem:[#allocation2 + $0xa0] sm:$0xff] %vm985_vm1, %v970_v16  ;;  %v1676_v61 = vrot.slane %v5434_v4, 2  ;;  %3896 = vmatpush1.bf16.msra.mxu1 %v3869_v9  ;;  %v844_v16 = vadd.f32 %v5333_v31, %v5141_v48  ;;  %3870 = vmatpush1.bf16.msra.mxu0 %v3869_v9  ;;  %v5492_v22 = vsel %vm1645_vm12, %v1677_v13, %v1679_v23  ;;  %v5506_v49 = vpop.f32.mrb[31].mxu0 }
 0x1ab   : > { %3888 = vmatprep.subr.bf16.mxu1 %v4746_v51  ;;  %3871 = vmatprep.subr.bf16.mxu0 %v4746_v51  ;;  %v974_v9 = vsel %vm909_vm4, %v839_v17, %v942_v33  ;;  %v849_v23 = vadd.f32 %v5141_v48, %v5354_v50  ;;  %vm2456_vm4 = vcmask 654336  }
 0x1ac   : > { %4090 = vrot.lane.b32.xlu1 %v4089_v36, %s4745_s12  ;;  %vm910_vm3 = vcmp.gt.f32.partialorder %v844_v16, 0.0  ;;  %v943_v20 = vmul.f32 %v5151_v54, %v844_v16  ;;  %v5489_v21 = vsel %vm1645_vm12, %v1676_v61, %v1677_v13  ;;  %1008 = vst.msk [vmem:[#allocation2 + $0xc0] sm:$0xff] %vm985_vm1, %v974_v9  ;;  %v945_v13 = vmul.f32 %v5151_v54, %v854_v40 }
 0x1ad   : > { %4100 = vrot.lane.b32.xlu0 %v4099_v37, %s4752_s11  ;;  %vm911_vm6 = vcmp.gt.f32.partialorder %v849_v23, 0.0  ;;  %v944_v50 = vmul.f32 %v5151_v54, %v849_v23 }
 0x1ae   : > { %3897 = vmatpush1.bf16.msra.mxu1 %v3872_v0  ;;  %v975_v39 = vsel %vm910_vm3, %v844_v16, %v943_v20  ;;  %3873 = vmatpush1.bf16.msra.mxu0 %v3872_v0  ;;  %v977_v17 = vsel %vm912_vm5, %v854_v40, %v945_v13  ;;  %vm2391_vm3 = vcmask 392192   ;;  %vm2489_vm5 = vcmask 785408  }
 0x1af   : > { %3889 = vmatprep.subr.bf16.mxu1 %v4746_v51  ;;  %1009 = vst.msk [vmem:[#allocation2 + $0xc8] sm:$0xff] %vm985_vm1, %v975_v39  ;;  %3874 = vmatprep.subr.bf16.mxu0 %v4746_v51  ;;  %1011 = vst.msk [vmem:[#allocation2 + $0xd8] sm:$0xff] %vm985_vm1, %v977_v17  ;;  %v874_v17 = vadd.f32 %v5411_v57, %v5141_v48 }
 0x1b0   : > { %4095 = vrot.lane.b32.xlu1 %v4089_v36, %s4748_s13  ;;  %v1236_v36 = vld [vmem:[#allocation2 + $0x78] sm:$0xff] }
 0x1b1   : > { %4105 = vrot.lane.b32.xlu0 %v4099_v37, %s4750_s26  ;;  %v1316_v58 = vrot.slane %v1236_v36, 7  ;;  %v1221_v36 = vld [vmem:[#allocation2] sm:$0xff]  ;;  %vm916_vm10 = vcmp.gt.f32.partialorder %v874_v17, 0.0 }
 0x1b3   : > { %v5483_v31 = vsel %vm1293_vm2, %v1315_v56, %v1316_v58  ;;  %v1425_v30 = vsel %vm1293_vm2, %v1316_v58, 0.0 }
 0x1b4   : > { %4110 = vrot.lane.b32.xlu1 %v4109_v18, %s4751_s15  ;;  %v1507_v38 = vrot.slane %v1425_v30, 1  ;;  %v1682_v20 = vrot.slane %v5483_v31, 2  ;;  %v1684_v33 = vrot.slane %v1425_v30, 2  ;;  %v864_v30 = vadd.f32 %v5373_v10, %v5141_v48 }
 0x1b5   : > { %4115 = vrot.lane.b32.xlu0 %v4099_v37, %s4747_s30  ;;  %v1501_v37 = vsel %vm1468_vm9, %v1499_v26, %v1500_v27  ;;  %v5495_v26 = vsel %vm1293_vm2, 0.0, %v1315_v56  ;;  %v3875_v27 = vpack.c.bf16 %v2572_v14, %v2571_v19  ;;  %v1222_v56 = vld [vmem:[#allocation2 + $0x8] sm:$0xff] }
 0x1b6   : > { %v1504_v58 = vrot.slane %v5495_v26, 1  ;;  %v1295_v61 = vrot.slane %v1222_v56, 7  ;;  %v4159_v14 = vpack.i.bf16 %v5483_v31, %v5495_v26  ;;  %v976_v56 = vsel %vm911_vm6, %v849_v23, %v944_v50 }
 0x1b7   : > { %3898 = vmatpush1.bf16.msra.mxu1 %v3875_v27  ;;  %3876 = vmatpush1.bf16.msra.mxu0 %v3875_v27  ;;  %v1237_v27 = vld [vmem:[#allocation2 + $0x80] sm:$0xff]  ;;  %1010 = vst.msk [vmem:[#allocation2 + $0xd0] sm:$0xff] %vm985_vm1, %v976_v56  ;;  %v5555_v23 = vsel %vm1645_vm12, %v1682_v20, %v1684_v33  ;;  %vm914_vm7 = vcmp.gt.f32.partialorder %v864_v30, 0.0  ;;  %v947_v10 = vmul.f32 %v5151_v54, %v864_v30  ;;  %vm2522_vm6 = vcmask 916480  }
 0x1b8   : > { %4120 = vrot.lane.b32.xlu1 %v4109_v18, %s4749_s20  ;;  %v4134_v18 = vpack.i.bf16 %v1503_v60, %v1501_v37  ;;  %v1505_v37 = vrot.slane %v5483_v31, 1  ;;  %v1294_v60 = vrot.slane %v1221_v36, 7  ;;  %v1238_v36 = vld [vmem:[#allocation2 + $0x88] sm:$0xff]  ;;  %v1418_v40 = vsel %vm1293_vm2, %v1295_v61, 0.0 }
 0x1b9   : > { %4125 = vrot.lane.b32.xlu0 %v4124_v52, %s4745_s12 }
 0x1ba   : > { %v1506_v51 = vsel %vm1468_vm9, %v1504_v58, %v1505_v37  ;;  %v5523_v0 = vsel %vm1468_vm9, %v1505_v37, %v1507_v38  ;;  %v5526_v16 = vsel %vm1293_vm2, 0.0, %v1294_v60  ;;  %v5530_v19 = vsel %vm1293_vm2, %v1294_v60, %v1295_v61 }
 0x1bb   : > { %v4169_v39 = vpack.i.bf16 %v5523_v0, %v1506_v51  ;;  %v1469_v9 = vrot.slane %v5526_v16, 1  ;;  %v1646_v58 = vrot.slane %v5526_v16, 2  ;;  %v859_v37 = vadd.f32 %v5141_v48, %v5383_v15 }
 0x1bc   : > { %4135 = vrot.lane.b32.xlu1 %v4134_v18, %s4752_s11  ;;  %v1647_v38 = vrot.slane %v5530_v19, 2  ;;  %v1318_v60 = vrot.slane %v1237_v27, 7  ;;  %v1319_v61 = vrot.slane %v1238_v36, 7  ;;  %v1472_v27 = vrot.slane %v1418_v40, 1 }
 0x1bd   : > { %4130 = vrot.lane.b32.xlu0 %v4124_v52, %s4748_s13  ;;  %v4144_v52 = vpack.i.bf16 %v5492_v22, %v5489_v21  ;;  %vm913_vm8 = vcmp.gt.f32.partialorder %v859_v37, 0.0  ;;  %v946_v15 = vmul.f32 %v5151_v54, %v859_v37 }
 0x1be   : > { %v5570_v36 = vsel %vm1293_vm2, %v1318_v60, %v1319_v61  ;;  %v5573_v56 = vsel %vm1293_vm2, %v1319_v61, 0.0  ;;  %v869_v61 = vadd.f32 %v5141_v48, %v5427_v3  ;;  %v879_v3 = vadd.f32 %v5141_v48, %v5506_v49 }
 0x1bf   : > { %v978_v33 = vsel %vm913_vm8, %v859_v37, %v946_v15  ;;  %v884_v15 = vadd.f32 %v5497_v29, %v5141_v48  ;;  %v1687_v49 = vrot.slane %v5570_v36, 2 }
 0x1c0   : > { %4140 = vrot.lane.b32.xlu1 %v4134_v18, %s4750_s26  ;;  %1012 = vst.msk [vmem:[#allocation2 + $0xe0] sm:$0xff] %vm985_vm1, %v978_v33  ;;  %vm915_vm11 = vcmp.gt.f32.partialorder %v869_v61, 0.0  ;;  %vm917_vm14 = vcmp.gt.f32.partialorder %v879_v3, 0.0 }
 0x1c1   : > { %4145 = vrot.lane.b32.xlu0 %v4144_v52, %s4751_s15  ;;  %vm918_vm13 = vcmp.gt.f32.partialorder %v884_v15, 0.0  ;;  %v951_v33 = vmul.f32 %v5151_v54, %v884_v15 }
 0x1c4   : > { %4150 = vrot.lane.b32.xlu1 %v4134_v18, %s4747_s30  ;;  %v1681_v18 = vrot.slane %v5495_v26, 2 }
 0x1c5   : > { %4155 = vrot.lane.b32.xlu0 %v4144_v52, %s4749_s20  ;;  %v1470_v52 = vrot.slane %v5530_v19, 1 }
 0x1c6   : > { %v5552_v13 = vsel %vm1645_vm12, %v1681_v18, %v1682_v20  ;;  %v5565_v18 = vsel %vm1293_vm2, 0.0, %v1318_v60  ;;  %v979_v20 = vsel %vm914_vm7, %v864_v30, %v947_v10  ;;  %v1649_v60 = vrot.slane %v1418_v40, 2 }
 0x1c7   : > { %v1471_v50 = vsel %vm1468_vm9, %v1469_v9, %v1470_v52  ;;  %v4179_v57 = vpack.i.bf16 %v5555_v23, %v5552_v13  ;;  %1013 = vst.msk [vmem:[#allocation2 + $0xe8] sm:$0xff] %vm985_vm1, %v979_v20  ;;  %v949_v9 = vmul.f32 %v5151_v54, %v874_v17  ;;  %v1473_v30 = vsel %vm1468_vm9, %v1470_v52, %v1472_v27 }
 0x1c8   : > { %4160 = vrot.lane.b32.xlu1 %v4159_v14, %s4745_s12  ;;  %v1509_v37 = vrot.slane %v5565_v18, 1  ;;  %v1510_v10 = vrot.slane %v5570_v36, 1  ;;  %v948_v40 = vmul.f32 %v5151_v54, %v869_v61  ;;  %v4194_v52 = vpack.i.bf16 %v1473_v30, %v5523_v0 }
 0x1c9   : > { %4170 = vrot.lane.b32.xlu0 %v4169_v39, %s4752_s11  ;;  %v1650_v27 = vsel %vm1645_vm12, %v1647_v38, %v1649_v60  ;;  %v1686_v48 = vrot.slane %v5565_v18, 2  ;;  %v4204_v30 = vpack.i.bf16 %v5570_v36, %v5565_v18 }
 0x1ca   : > { %v1511_v29 = vsel %vm1468_vm9, %v1509_v37, %v1510_v10 }
 0x1cb   : > { %v5613_v37 = vsel %vm1645_vm12, %v1686_v48, %v1687_v49  ;;  %v1241_v48 = vld [vmem:[#allocation2 + $0xa0] sm:$0xff] }
 0x1cc   : > { %4165 = vrot.lane.b32.xlu1 %v4159_v14, %s4748_s13  ;;  %v4184_v14 = vpack.i.bf16 %v1471_v50, %v1506_v51  ;;  %v1512_v51 = vrot.slane %v5573_v56, 1  ;;  %v4229_v60 = vpack.i.bf16 %v5265_v24, %v5613_v37 }
 0x1cd   : > { %4175 = vrot.lane.b32.xlu0 %v4169_v39, %s4750_s26  ;;  %v1648_v39 = vsel %vm1645_vm12, %v1646_v58, %v1647_v38  ;;  %v981_v58 = vsel %vm916_vm10, %v874_v17, %v949_v9  ;;  %v980_v17 = vsel %vm915_vm11, %v869_v61, %v948_v40  ;;  %v983_v38 = vsel %vm918_vm13, %v884_v15, %v951_v33 }
 0x1ce   : > { %v4189_v50 = vpack.i.bf16 %v1648_v39, %v5552_v13  ;;  %1015 = vst.msk [vmem:[#allocation2 + $0xf8] sm:$0xff] %vm985_vm1, %v981_v58  ;;  %v1513_v20 = vsel %vm1468_vm9, %v1510_v10, %v1512_v51  ;;  %1014 = vst.msk [vmem:[#allocation2 + $0xf0] sm:$0xff] %vm985_vm1, %v980_v17  ;;  %v4224_v39 = vpack.i.bf16 %v5228_v59, %v1511_v29  ;;  %v1239_v59 = vld [vmem:[#allocation2 + $0x90] sm:$0xff]  ;;  %v1689_v10 = vrot.slane %v5573_v56, 2  ;;  %v1240_v51 = vld [vmem:[#allocation2 + $0x98] sm:$0xff] }
 0x1cf   : > { %v4219_v0 = vpack.i.bf16 %v1513_v20, %v1511_v29  ;;  %1017 = vst.msk [vmem:[#allocation2 + $0x108] sm:$0xff] %vm985_vm1, %v983_v38  ;;  %v4209_v61 = vpack.i.bf16 %v5215_v42, %v5565_v18  ;;  %v4214_v58 = vpack.i.bf16 %v5212_v41, %v5570_v36  ;;  %v1321_v15 = vrot.slane %v1239_v59, 7  ;;  %v5646_v29 = vpop.permute.xlu0 %2183 }
 0x1d0   : > { %4180 = vrot.lane.b32.xlu1 %v4179_v57, %s4751_s15  ;;  %v4199_v57 = vpack.i.bf16 %v1650_v27, %v5555_v23  ;;  %v5630_v24 = vsel %vm1645_vm12, %v1687_v49, %v1689_v10  ;;  %6709 = vst [vmem:[#allocation25_spill] sm:$0xff] %v5646_v29  ;;  %v1242_v49 = vld [vmem:[#allocation2 + $0xa8] sm:$0xff] }
 0x1d1   : > { %4185 = vrot.lane.b32.xlu0 %v4184_v14, %s4747_s30  ;;  %v950_v14 = vmul.f32 %v5151_v54, %v879_v3  ;;  %v4249_v40 = vpack.i.bf16 %v5630_v24, %v5613_v37  ;;  %v5636_v56 = vsel %vm1293_vm2, 0.0, %v1321_v15  ;;  %v1325_v59 = vrot.slane %v1242_v49, 7 }
 0x1d2   : > { %6707 = vst [vmem:[#allocation23_spill] sm:$0xff] %v5636_v56  ;;  %v4254_v17 = vpack.i.bf16 %v5235_v1, %v5636_v56 }
 0x1d3   : > { %v982_v9 = vsel %vm917_vm14, %v879_v3, %v950_v14 }
 0x1d4   : > { %4190 = vrot.lane.b32.xlu1 %v4189_v50, %s4749_s20  ;;  %1016 = vst.msk [vmem:[#allocation2 + $0x100] sm:$0xff] %vm985_vm1, %v982_v9  ;;  %v1322_v50 = vrot.slane %v1240_v51, 7  ;;  %v1691_v9 = vrot.slane %v5636_v56, 2 }
 0x1d5   : > { %4195 = vrot.lane.b32.xlu0 %v4194_v52, %s4747_s30  ;;  %v4234_v52 = vpack.i.bf16 %v5231_v63, %v1513_v20  ;;  %v4244_v63 = vpack.i.bf16 %v5268_v25, %v5630_v24  ;;  %v1514_v20 = vrot.slane %v5636_v56, 1 }
 0x1d6   : > { %v5640_v3 = vsel %vm1293_vm2, %v1321_v15, %v1322_v50  ;;  %v1427_v27 = vsel %vm1293_vm2, %v1322_v50, 0.0 }
 0x1d7   : > { %6708 = vst [vmem:[#allocation24_spill] sm:$0xff] %v5640_v3  ;;  %v1515_v33 = vrot.slane %v5640_v3, 1  ;;  %v4259_v38 = vpack.i.bf16 %v5241_v5, %v5640_v3 }
 0x1d8   : > { %4220 = vrot.lane.b32.xlu1 %v4219_v0, %s4752_s11 }
 0x1d9   : > { %4200 = vrot.lane.b32.xlu0 %v4199_v57, %s4749_s20  ;;  %v4264_v57 = vpack.i.bf16 %v5640_v3, %v5636_v56  ;;  %v1516_v14 = vsel %vm1468_vm9, %v1514_v20, %v1515_v33 }
 0x1da   : > { %v4269_v10 = vpack.i.bf16 %v5282_v43, %v1516_v14  ;;  %v1428_v43 = vsel %vm1293_vm2, %v1325_v59, 0.0 }
 0x1dc   : > { %4225 = vrot.lane.b32.xlu1 %v4224_v39, %s4750_s26 }
 0x1dd   : > { %4205 = vrot.lane.b32.xlu0 %v4204_v30, %s4745_s12  ;;  %v1692_v30 = vrot.slane %v5640_v3, 2 }
 0x1df   : > { %v5668_v15 = vsel %vm1645_vm12, %v1691_v9, %v1692_v30 }
 0x1e0   : > { %4230 = vrot.lane.b32.xlu1 %v4229_v60, %s4751_s15  ;;  %v1694_v60 = vrot.slane %v1427_v27, 2 }
 0x1e1   : > { %4210 = vrot.lane.b32.xlu0 %v4209_v61, %s4748_s13  ;;  %v1324_v61 = vrot.slane %v1241_v48, 7 }
 0x1e2   : > { %v5671_v50 = vsel %vm1645_vm12, %v1692_v30, %v1694_v60 }
 0x1e3   : > { %v4284_v20 = vpack.i.bf16 %v5671_v50, %v5668_v15 }
 0x1e4   : > { %4240 = vrot.lane.b32.xlu1 %v4219_v0, %s4747_s30  ;;  %v1517_v0 = vrot.slane %v1427_v27, 1 }
 0x1e5   : > { %4215 = vrot.lane.b32.xlu0 %v4214_v58, %s4748_s13 }
 0x1e6   : > { %v1518_v39 = vsel %vm1468_vm9, %v1515_v33, %v1517_v0 }
 0x1e7   : > { %v4274_v51 = vpack.i.bf16 %v5285_v44, %v1518_v39  ;;  %v4279_v27 = vpack.i.bf16 %v1518_v39, %v1516_v14 }
 0x1e8   : > { %4250 = vrot.lane.b32.xlu1 %v4249_v40, %s4749_s20  ;;  %v5675_v40 = vsel %vm1293_vm2, %v1324_v61, %v1325_v59  ;;  %v1243_v59 = vld [vmem:[#allocation2 + $0xb0] sm:$0xff] }
 0x1e9   : > { %4235 = vrot.lane.b32.xlu0 %v4234_v52, %s4750_s26  ;;  %6710 = vst [vmem:[#allocation26_spill] sm:$0xff] %v5675_v40  ;;  %v5678_v52 = vsel %vm1293_vm2, 0.0, %v1324_v61  ;;  %v1520_v0 = vrot.slane %v5675_v40, 1 }
 0x1ea   : > { %6711 = vst [vmem:[#allocation27_spill] sm:$0xff] %v5678_v52  ;;  %v1519_v33 = vrot.slane %v5678_v52, 1 }
 0x1ec   : > { %4255 = vrot.lane.b32.xlu1 %v4254_v17, %s4745_s12  ;;  %v1521_v60 = vsel %vm1468_vm9, %v1519_v33, %v1520_v0  ;;  %v1697_v33 = vrot.slane %v5675_v40, 2 }
 0x1ed   : > { %4245 = vrot.lane.b32.xlu0 %v4244_v63, %s4751_s15 }
 0x1f0   : > { %4265 = vrot.lane.b32.xlu1 %v4264_v57, %s4748_s13  ;;  %v3986_v25 = vpop.permute.xlu0 %3985  ;;  %v1522_v57 = vrot.slane %v1428_v43, 1 }
 0x1f1   : > { %4260 = vrot.lane.b32.xlu0 %v4259_v38, %s4745_s12  ;;  %v3996_v58 = vpop.permute.xlu1 %3995  ;;  %v3987_v44 = vunpack.i.l.bf16 %v3986_v25  ;;  %v3988_v48 = vunpack.i.h.bf16 %v3986_v25  ;;  %v1699_v25 = vrot.slane %v1428_v43, 2 }
 0x1f2   : > { %v3997_v30 = vunpack.i.l.bf16 %v3996_v58  ;;  %v1523_v61 = vsel %vm1468_vm9, %v1520_v0, %v1522_v57  ;;  %v3998_v54 = vunpack.i.h.bf16 %v3996_v58 }
 0x1f3   : > { %v2328_v49 = vsel %vm985_vm1, %v5215_v42, %v3987_v44  ;;  %v4299_v42 = vpack.i.bf16 %v5675_v40, %v5678_v52  ;;  %v2329_v44 = vsel %vm985_vm1, %v5212_v41, %v3988_v48 }
 0x1f4   : > { %4270 = vrot.lane.b32.xlu1 %v4269_v10, %s4752_s11  ;;  %v1244_v10 = vld [vmem:[#allocation2 + $0xb8] sm:$0xff] }
 0x1f5   : > { %4275 = vrot.lane.b32.xlu0 %v4274_v51, %s4752_s11  ;;  %v1328_v46 = vrot.slane %v1244_v10, 7 }
 0x1f6   : > { %v3991_v17 = vpop.permute.xlu0 %3990 }
 0x1f7   : > { %v3992_v63 = vunpack.i.l.bf16 %v3991_v17  ;;  %v3993_v14 = vunpack.i.h.bf16 %v3991_v17 }
 0x1f8   : > { %4280 = vrot.lane.b32.xlu1 %v4279_v27, %s4750_s26 }
 0x1f9   : > { %4285 = vrot.lane.b32.xlu0 %v4284_v20, %s4751_s15  ;;  %v2361_v39 = vsel %vm2358_vm15, %v2328_v49, %v3992_v63  ;;  %v2362_v0 = vsel %vm2358_vm15, %v2329_v44, %v3993_v14  ;;  %v1327_v49 = vrot.slane %v1243_v59, 7  ;;  %v1429_v44 = vsel %vm1293_vm2, %v1328_v46, 0.0 }
 0x1fa   : > { %v4001_v38 = vpop.permute.xlu1 %4000  ;;  %v2394_v17 = vsel %vm2391_vm3, %v2361_v39, %v3997_v30  ;;  %v2395_v39 = vsel %vm2391_vm3, %v2362_v0, %v3998_v54 }
 0x1fb   : > { %v4006_v9 = vpop.permute.xlu0 %4005  ;;  %v4002_v51 = vunpack.i.l.bf16 %v4001_v38  ;;  %v4003_v41 = vunpack.i.h.bf16 %v4001_v38  ;;  %v5717_v59 = vsel %vm1293_vm2, %v1327_v49, %v1328_v46  ;;  %v5720_v38 = vsel %vm1293_vm2, 0.0, %v1327_v49 }
 0x1fc   : > { %4290 = vrot.lane.b32.xlu1 %v4279_v27, %s4747_s30  ;;  %v1696_v27 = vrot.slane %v5678_v52, 2  ;;  %v4007_v43 = vunpack.i.l.bf16 %v4006_v9  ;;  %6712 = vst [vmem:[#allocation28_spill] sm:$0xff] %v5720_v38  ;;  %v4008_v10 = vunpack.i.h.bf16 %v4006_v9 }
 0x1fd   : > { %4295 = vrot.lane.b32.xlu0 %v4284_v20, %s4749_s20  ;;  %v4309_v20 = vpack.i.bf16 %v1523_v61, %v1521_v60  ;;  %v2426_v48 = vsel %vm565_vm0, %v2394_v17, %v4002_v51  ;;  %v5714_v60 = vsel %vm1645_vm12, %v1697_v33, %v1699_v25  ;;  %v2427_v17 = vsel %vm565_vm0, %v2395_v39, %v4003_v41 }
 0x1fe   : > { %v5699_v63 = vpop.permute.xlu1 %4010  ;;  %v5711_v30 = vsel %vm1645_vm12, %v1696_v27, %v1697_v33  ;;  %v2459_v54 = vsel %vm2456_vm4, %v2426_v48, %v4007_v43  ;;  %v1525_v43 = vrot.slane %v5717_v59, 1  ;;  %v1527_v41 = vrot.slane %v1429_v44, 1 }
 0x1ff   : > { %v5704_v57 = vpop.permute.xlu0 %4015  ;;  %v4319_v27 = vpack.i.bf16 %v5714_v60, %v5711_v30  ;;  %v4012_v46 = vunpack.i.l.bf16 %v5699_v63 }
 0x200   : > { %4300 = vrot.lane.b32.xlu1 %v4299_v42, %s4745_s12  ;;  %v4017_v39 = vunpack.i.l.bf16 %v5704_v57  ;;  %v4018_v3 = vunpack.i.h.bf16 %v5704_v57 }
 0x201   : > { %4310 = vrot.lane.b32.xlu0 %v4309_v20, %s4752_s11 }
 0x202   : > { %v4021_v14 = vpop.permute.xlu1 %4020 }
 0x203   : > { %v4022_v58 = vunpack.i.l.bf16 %v4021_v14  ;;  %v4031_v61 = vpop.permute.xlu0 %4030  ;;  %v4023_v25 = vunpack.i.h.bf16 %v4021_v14  ;;  %v2460_v14 = vsel %vm2456_vm4, %v2427_v17, %v4008_v10  ;;  %v1702_v10 = vrot.slane %v5717_v59, 2 }
 0x204   : > { %4305 = vrot.lane.b32.xlu1 %v4299_v42, %s4748_s13  ;;  %v4032_v51 = vunpack.i.l.bf16 %v4031_v61  ;;  %v4033_v0 = vunpack.i.h.bf16 %v4031_v61  ;;  %v1524_v42 = vrot.slane %v5720_v38, 1  ;;  %v4013_v17 = vunpack.i.h.bf16 %v5699_v63 }
 0x205   : > { %4315 = vrot.lane.b32.xlu0 %v4309_v20, %s4750_s26  ;;  %v2492_v33 = vsel %vm2489_vm5, %v2459_v54, %v4022_v58  ;;  %v2493_v61 = vsel %vm2489_vm5, %v2460_v14, %v4023_v25  ;;  %v1701_v54 = vrot.slane %v5720_v38, 2  ;;  %v1528_v14 = vsel %vm1468_vm9, %v1525_v43, %v1527_v41 }
 0x206   : > { %v4026_v49 = vpop.permute.xlu1 %4025  ;;  %v2525_v9 = vsel %vm2522_vm6, %v2492_v33, %v4032_v51  ;;  %v4334_v51 = vpack.i.bf16 %v5717_v59, %v5720_v38  ;;  %v1245_v33 = vld [vmem:[#allocation2 + $0xc0] sm:$0xff]  ;;  %v2526_v52 = vsel %vm2522_vm6, %v2493_v61, %v4033_v0  ;;  %v1704_v38 = vrot.slane %v1429_v44, 2 }
 0x207   : > { %v4036_v48 = vpop.permute.xlu0 %4035  ;;  %2719 = vmatmul.mubr.f32.vlgmr.msra.gmra.mrb[0].mxu1 %v2525_v9  ;;  %v4027_v58 = vunpack.i.l.bf16 %v4026_v49  ;;  %v1246_v9 = vld [vmem:[#allocation2 + $0xc8] sm:$0xff]  ;;  %v1330_v0 = vrot.slane %v1245_v33, 7 }
 0x208   : > { %4320 = vrot.lane.b32.xlu1 %v4319_v27, %s4751_s15  ;;  %3571 = vmatprep.mubr.msk.f32.mxu1 %vm985_vm1, %v5336_v32  ;;  %v4037_v29 = vunpack.i.l.bf16 %v4036_v48  ;;  %v1526_v32 = vsel %vm1468_vm9, %v1524_v42, %v1525_v43  ;;  %v1331_v63 = vrot.slane %v1246_v9, 7  ;;  %v4028_v42 = vunpack.i.h.bf16 %v4026_v49 }
 0x209   : > { %4325 = vrot.lane.b32.xlu0 %v4309_v20, %s4747_s30  ;;  %v2330_v20 = vsel %vm985_vm1, %v5235_v1, %v4012_v46  ;;  %v4344_v57 = vpack.i.bf16 %v1528_v14, %v1526_v32  ;;  %v5769_v49 = vsel %vm1645_vm12, %v1702_v10, %v1704_v38 }
 0x20a   : > { %v4041_v40 = vpop.permute.xlu1 %4040  ;;  %v2363_v56 = vsel %vm2358_vm15, %v2330_v20, %v4017_v39  ;;  %v5777_v39 = vsel %vm1293_vm2, 0.0, %v1330_v0  ;;  %v1430_v38 = vsel %vm1293_vm2, %v1331_v63, 0.0 }
 0x20b   : > { %v5750_v25 = vpop.permute.xlu0 %4045  ;;  %2724 = vmatmul.mubr.f32.gmra.mrb[2].mxu1 %v2526_v52  ;;  %v2396_v1 = vsel %vm2391_vm3, %v2363_v56, %v4027_v58  ;;  %v4042_v46 = vunpack.i.l.bf16 %v4041_v40  ;;  %v4038_v52 = vunpack.i.h.bf16 %v4036_v48  ;;  %v4043_v58 = vunpack.i.h.bf16 %v4041_v40 }
 0x20c   : > { %4330 = vrot.lane.b32.xlu1 %v4319_v27, %s4749_s20  ;;  %3572 = vmatprep.mubr.msk.f32.mxu1 %vm985_vm1, %v5368_v6  ;;  %v2428_v44 = vsel %vm565_vm0, %v2396_v1, %v4037_v29  ;;  %v2331_v27 = vsel %vm985_vm1, %v5241_v5, %v4013_v17  ;;  %v5766_v6 = vsel %vm1645_vm12, %v1701_v54, %v1702_v10  ;;  %v1529_v20 = vrot.slane %v5777_v39, 1 }
 0x20d   : > { %4335 = vrot.lane.b32.xlu0 %v4334_v51, %s4745_s12  ;;  %v2364_v56 = vsel %vm2358_vm15, %v2331_v27, %v4018_v3  ;;  %v5774_v29 = vsel %vm1293_vm2, %v1330_v0, %v1331_v63  ;;  %v2461_v61 = vsel %vm2456_vm4, %v2428_v44, %v4042_v46  ;;  %v4354_v17 = vpack.i.bf16 %v5769_v49, %v5766_v6 }
 0x20e   : > { %v5761_v43 = vpop.permute.xlu1 %4050  ;;  %v2397_v5 = vsel %vm2391_vm3, %v2364_v56, %v4028_v42  ;;  %v1530_v40 = vrot.slane %v5774_v29, 1  ;;  %v1532_v14 = vrot.slane %v1430_v38, 1  ;;  %v1248_v56 = vld [vmem:[#allocation2 + $0xd8] sm:$0xff] }
 0x20f   : > { %v4056_v41 = vpop.permute.xlu0 %4055  ;;  %v2429_v3 = vsel %vm565_vm0, %v2397_v5, %v4038_v52  ;;  %v4052_v52 = vunpack.i.l.bf16 %v5761_v43 }
 0x210   : > { %4345 = vrot.lane.b32.xlu1 %v4344_v57, %s4752_s11  ;;  %v4057_v48 = vunpack.i.l.bf16 %v4056_v41  ;;  %v4058_v54 = vunpack.i.h.bf16 %v4056_v41  ;;  %v2462_v42 = vsel %vm2456_vm4, %v2429_v3, %v4043_v58  ;;  %v1531_v27 = vsel %vm1468_vm9, %v1529_v20, %v1530_v40  ;;  %v1247_v41 = vld [vmem:[#allocation2 + $0xd0] sm:$0xff] }
 0x211   : > { %4340 = vrot.lane.b32.xlu0 %v4334_v51, %s4748_s13  ;;  %v4047_v51 = vunpack.i.l.bf16 %v5750_v25 }
 0x212   : > { %v4066_v33 = vpop.permute.xlu1 %4065  ;;  %v2494_v9 = vsel %vm2489_vm5, %v2461_v61, %v4057_v48  ;;  %v2495_v46 = vsel %vm2489_vm5, %v2462_v42, %v4058_v54  ;;  %v4048_v48 = vunpack.i.h.bf16 %v5750_v25  ;;  %v1533_v61 = vsel %vm1468_vm9, %v1530_v40, %v1532_v14 }
 0x213   : > { %v4067_v32 = vunpack.i.l.bf16 %v4066_v33  ;;  %v4061_v10 = vpop.permute.xlu0 %4060  ;;  %v4068_v0 = vunpack.i.h.bf16 %v4066_v33  ;;  %v2332_v5 = vsel %vm985_vm1, %v5299_v2, %v4047_v51  ;;  %v1707_v54 = vrot.slane %v5774_v29, 2 }
 0x214   : > { %4350 = vrot.lane.b32.xlu1 %v4344_v57, %s4750_s26  ;;  %v4062_v58 = vunpack.i.l.bf16 %v4061_v10  ;;  %v4369_v25 = vpack.i.bf16 %v5774_v29, %v5777_v39  ;;  %v1709_v2 = vrot.slane %v1430_v38, 2  ;;  %v2365_v20 = vsel %vm2358_vm15, %v2332_v5, %v4052_v52 }
 0x215   : > { %v2527_v63 = vsel %vm2522_vm6, %v2494_v9, %v4067_v32  ;;  %4355 = vrot.lane.b32.xlu0 %v4354_v17, %s4751_s15  ;;  %v2528_v3 = vsel %vm2522_vm6, %v2495_v46, %v4068_v0  ;;  %v1333_v9 = vrot.slane %v1247_v41, 7  ;;  %v1334_v32 = vrot.slane %v1248_v56, 7 }
 0x216   : > { %v4071_v1 = vpop.permute.xlu1 %4070  ;;  %2729 = vmatmul.mubr.f32.gmra.mrb[4].mxu1 %v2527_v63  ;;  %v4379_v51 = vpack.i.bf16 %v1533_v61, %v1531_v27  ;;  %v2333_v14 = vsel %vm985_vm1, %v5307_v7, %v4048_v48  ;;  %v4063_v0 = vunpack.i.h.bf16 %v4061_v10  ;;  %v2398_v63 = vsel %vm2391_vm3, %v2365_v20, %v4062_v58 }
 0x217   : > { %3573 = vmatprep.mubr.msk.f32.mxu1 %vm985_vm1, %v5371_v8  ;;  %v5798_v44 = vpop.permute.xlu0 %4075  ;;  %v1706_v8 = vrot.slane %v5777_v39, 2  ;;  %v4072_v40 = vunpack.i.l.bf16 %v4071_v1  ;;  %v5833_v46 = vsel %vm1293_vm2, %v1333_v9, %v1334_v32  ;;  %v5836_v7 = vsel %vm1293_vm2, 0.0, %v1333_v9 }
 0x218   : > { %4360 = vrot.lane.b32.xlu1 %v4344_v57, %s4747_s30  ;;  %v4053_v57 = vunpack.i.h.bf16 %v5761_v43  ;;  %v4077_v38 = vunpack.i.l.bf16 %v5798_v44  ;;  %v5839_v10 = vsel %vm1293_vm2, %v1334_v32, 0.0  ;;  %v4073_v27 = vunpack.i.h.bf16 %v4071_v1 }
 0x219   : > { %4365 = vrot.lane.b32.xlu0 %v4354_v17, %s4749_s20  ;;  %v5827_v43 = vsel %vm1645_vm12, %v1706_v8, %v1707_v54  ;;  %v2430_v41 = vsel %vm565_vm0, %v2398_v63, %v4072_v40  ;;  %v4078_v58 = vunpack.i.h.bf16 %v5798_v44  ;;  %v1534_v40 = vrot.slane %v5836_v7, 1 }
 0x21a   : > { %v5810_v33 = vpop.permute.xlu1 %4080  ;;  %2734 = vmatmul.mubr.f32.gmra.mrb[6].mxu1 %v2528_v3  ;;  %v2366_v52 = vsel %vm2358_vm15, %v2333_v14, %v4053_v57  ;;  %v2463_v3 = vsel %vm2456_vm4, %v2430_v41, %v4077_v38  ;;  %v1537_v57 = vrot.slane %v5839_v10, 1  ;;  %v1535_v14 = vrot.slane %v5833_v46, 1  ;;  %v1249_v41 = vld [vmem:[#allocation2 + $0xe0] sm:$0xff] }
 0x21b   : > { %3574 = vmatprep.mubr.msk.f32.mxu1 %vm985_vm1, %v5407_v55  ;;  %v5818_v17 = vpop.permute.xlu0 %4085  ;;  %v5830_v55 = vsel %vm1645_vm12, %v1707_v54, %v1709_v2  ;;  %v2399_v5 = vsel %vm2391_vm3, %v2366_v52, %v4063_v0  ;;  %v4404_v52 = vpack.i.bf16 %v5833_v46, %v5836_v7 }
 0x21c   : > { %4370 = vrot.lane.b32.xlu1 %v4369_v25, %s4745_s12  ;;  %v4389_v9 = vpack.i.bf16 %v5830_v55, %v5827_v43  ;;  %v2431_v44 = vsel %vm565_vm0, %v2399_v5, %v4073_v27  ;;  %v4087_v0 = vunpack.i.l.bf16 %v5818_v17  ;;  %v1714_v27 = vrot.slane %v5839_v10, 2 }
 0x21d   : > { %4380 = vrot.lane.b32.xlu0 %v4379_v51, %s4752_s11  ;;  %v2464_v63 = vsel %vm2456_vm4, %v2431_v44, %v4078_v58  ;;  %v1712_v58 = vrot.slane %v5833_v46, 2  ;;  %v1536_v10 = vsel %vm1468_vm9, %v1534_v40, %v1535_v14 }
 0x21e   : > { %v4091_v42 = vpop.permute.xlu1 %4090 }
 0x21f   : > { %v4092_v56 = vunpack.i.l.bf16 %v4091_v42  ;;  %v4101_v48 = vpop.permute.xlu0 %4100  ;;  %v4093_v8 = vunpack.i.h.bf16 %v4091_v42 }
 0x220   : > { %4375 = vrot.lane.b32.xlu1 %v4369_v25, %s4748_s13  ;;  %v4102_v61 = vunpack.i.l.bf16 %v4101_v48  ;;  %v4103_v2 = vunpack.i.h.bf16 %v4101_v48  ;;  %v4082_v25 = vunpack.i.l.bf16 %v5810_v33 }
 0x221   : > { %4385 = vrot.lane.b32.xlu0 %v4379_v51, %s4750_s26  ;;  %v2496_v54 = vsel %vm2489_vm5, %v2463_v3, %v4092_v56  ;;  %v2497_v42 = vsel %vm2489_vm5, %v2464_v63, %v4093_v8  ;;  %v1250_v56 = vld [vmem:[#allocation2 + $0xe8] sm:$0xff]  ;;  %v4083_v3 = vunpack.i.h.bf16 %v5810_v33  ;;  %v1336_v33 = vrot.slane %v1249_v41, 7 }
 0x222   : > { %v4096_v1 = vpop.permute.xlu1 %4095  ;;  %v2529_v32 = vsel %vm2522_vm6, %v2496_v54, %v4102_v61  ;;  %v2530_v61 = vsel %vm2522_vm6, %v2497_v42, %v4103_v2  ;;  %v1538_v54 = vsel %vm1468_vm9, %v1535_v14, %v1537_v57  ;;  %v1337_v44 = vrot.slane %v1250_v56, 7 }
 0x223   : > { %v4106_v20 = vpop.permute.xlu0 %4105  ;;  %2739 = vmatmul.mubr.f32.gmra.mrb[8].mxu1 %v2529_v32  ;;  %v4097_v38 = vunpack.i.l.bf16 %v4096_v1  ;;  %v4088_v32 = vunpack.i.h.bf16 %v5818_v17  ;;  %v4098_v63 = vunpack.i.h.bf16 %v4096_v1  ;;  %v4414_v17 = vpack.i.bf16 %v1538_v54, %v1536_v10 }
 0x224   : > { %4390 = vrot.lane.b32.xlu1 %v4389_v9, %s4751_s15  ;;  %3575 = vmatprep.mubr.msk.f32.mxu1 %vm985_vm1, %v5417_v62  ;;  %v4107_v48 = vunpack.i.l.bf16 %v4106_v20  ;;  %v1711_v62 = vrot.slane %v5836_v7, 2  ;;  %v4108_v40 = vunpack.i.h.bf16 %v4106_v20  ;;  %v5893_v1 = vsel %vm1645_vm12, %v1712_v58, %v1714_v27 }
 0x225   : > { %4395 = vrot.lane.b32.xlu0 %v4379_v51, %s4747_s30  ;;  %v2334_v51 = vsel %vm985_vm1, %v5345_v35, %v4082_v25  ;;  %v5898_v42 = vsel %vm1293_vm2, %v1336_v33, %v1337_v44  ;;  %v5901_v41 = vsel %vm1293_vm2, 0.0, %v1336_v33  ;;  %v1432_v27 = vsel %vm1293_vm2, %v1337_v44, 0.0 }
 0x226   : > { %v4111_v5 = vpop.permute.xlu1 %4110  ;;  %v2367_v2 = vsel %vm2358_vm15, %v2334_v51, %v4087_v0 }
 0x227   : > { %v5873_v8 = vpop.permute.xlu0 %4115  ;;  %2744 = vmatmul.mubr.f32.gmra.mrb[10].mxu1 %v2530_v61  ;;  %v2400_v35 = vsel %vm2391_vm3, %v2367_v2, %v4097_v38  ;;  %v4112_v25 = vunpack.i.l.bf16 %v4111_v5  ;;  %v4113_v56 = vunpack.i.h.bf16 %v4111_v5  ;;  %v1540_v5 = vrot.slane %v5898_v42, 1 }
 0x228   : > { %4400 = vrot.lane.b32.xlu1 %v4389_v9, %s4749_s20  ;;  %3576 = vmatprep.mubr.msk.f32.mxu1 %vm985_vm1, %v5489_v21  ;;  %v2432_v57 = vsel %vm565_vm0, %v2400_v35, %v4107_v48  ;;  %v2335_v9 = vsel %vm985_vm1, %v5342_v34, %v4083_v3  ;;  %v5890_v21 = vsel %vm1645_vm12, %v1711_v62, %v1712_v58  ;;  %v1542_v2 = vrot.slane %v1432_v27, 1 }
 0x229   : > { %4405 = vrot.lane.b32.xlu0 %v4404_v52, %s4745_s12  ;;  %v2368_v38 = vsel %vm2358_vm15, %v2335_v9, %v4088_v32  ;;  %v2465_v48 = vsel %vm2456_vm4, %v2432_v57, %v4112_v25  ;;  %v4424_v54 = vpack.i.bf16 %v5893_v1, %v5890_v21  ;;  %v1539_v32 = vrot.slane %v5901_v41, 1 }
 0x22a   : > { %v5885_v14 = vpop.permute.xlu1 %4120  ;;  %v2401_v34 = vsel %vm2391_vm3, %v2368_v38, %v4098_v63  ;;  %v1252_v38 = vld [vmem:[#allocation2 + $0xf8] sm:$0xff] }
 0x22b   : > { %v4126_v0 = vpop.permute.xlu0 %4125  ;;  %v2433_v61 = vsel %vm565_vm0, %v2401_v34, %v4108_v40  ;;  %v4122_v40 = vunpack.i.l.bf16 %v5885_v14  ;;  %v1541_v9 = vsel %vm1468_vm9, %v1539_v32, %v1540_v5 }
 0x22c   : > { %4415 = vrot.lane.b32.xlu1 %v4414_v17, %s4752_s11  ;;  %v4127_v20 = vunpack.i.l.bf16 %v4126_v0  ;;  %v4128_v62 = vunpack.i.h.bf16 %v4126_v0  ;;  %v2466_v63 = vsel %vm2456_vm4, %v2433_v61, %v4113_v56  ;;  %v1251_v0 = vld [vmem:[#allocation2 + $0xf0] sm:$0xff] }
 0x22d   : > { %4410 = vrot.lane.b32.xlu0 %v4404_v52, %s4748_s13  ;;  %v4117_v52 = vunpack.i.l.bf16 %v5873_v8 }
 0x22e   : > { %v4136_v58 = vpop.permute.xlu1 %4135  ;;  %v2498_v3 = vsel %vm2489_vm5, %v2465_v48, %v4127_v20  ;;  %v2499_v25 = vsel %vm2489_vm5, %v2466_v63, %v4128_v62  ;;  %v4118_v20 = vunpack.i.h.bf16 %v5873_v8  ;;  %v1543_v48 = vsel %vm1468_vm9, %v1540_v5, %v1542_v2 }
 0x22f   : > { %v4137_v51 = vunpack.i.l.bf16 %v4136_v58  ;;  %v4131_v10 = vpop.permute.xlu0 %4130  ;;  %v4138_v33 = vunpack.i.h.bf16 %v4136_v58  ;;  %v2336_v34 = vsel %vm985_vm1, %v5380_v12, %v4117_v52  ;;  %v1717_v62 = vrot.slane %v5898_v42, 2 }
 0x230   : > { %4420 = vrot.lane.b32.xlu1 %v4414_v17, %s4750_s26  ;;  %v4132_v56 = vunpack.i.l.bf16 %v4131_v10  ;;  %v4439_v8 = vpack.i.bf16 %v5898_v42, %v5901_v41  ;;  %v1719_v12 = vrot.slane %v1432_v27, 2  ;;  %v2369_v32 = vsel %vm2358_vm15, %v2336_v34, %v4122_v40 }
 0x231   : > { %v2531_v44 = vsel %vm2522_vm6, %v2498_v3, %v4137_v51  ;;  %4425 = vrot.lane.b32.xlu0 %v4424_v54, %s4751_s15  ;;  %v2532_v61 = vsel %vm2522_vm6, %v2499_v25, %v4138_v33  ;;  %v1339_v3 = vrot.slane %v1251_v0, 7  ;;  %v1340_v51 = vrot.slane %v1252_v38, 7 }
 0x232   : > { %v4141_v35 = vpop.permute.xlu1 %4140  ;;  %2749 = vmatmul.mubr.f32.gmra.mrb[12].mxu1 %v2531_v44  ;;  %v4449_v52 = vpack.i.bf16 %v1543_v48, %v1541_v9  ;;  %v2337_v2 = vsel %vm985_vm1, %v5377_v11, %v4118_v20  ;;  %v4133_v33 = vunpack.i.h.bf16 %v4131_v10  ;;  %v2402_v44 = vsel %vm2391_vm3, %v2369_v32, %v4132_v56 }
 0x233   : > { %3577 = vmatprep.mubr.msk.f32.mxu1 %vm985_vm1, %v5492_v22  ;;  %v5922_v57 = vpop.permute.xlu0 %4145  ;;  %v1716_v22 = vrot.slane %v5901_v41, 2  ;;  %v4142_v5 = vunpack.i.l.bf16 %v4141_v35  ;;  %v5957_v25 = vsel %vm1293_vm2, %v1339_v3, %v1340_v51  ;;  %v5960_v11 = vsel %vm1293_vm2, 0.0, %v1339_v3 }
 0x234   : > { %4430 = vrot.lane.b32.xlu1 %v4414_v17, %s4747_s30  ;;  %v4123_v17 = vunpack.i.h.bf16 %v5885_v14  ;;  %v4147_v27 = vunpack.i.l.bf16 %v5922_v57  ;;  %6713 = vst [vmem:[#allocation29_spill] sm:$0xff] %v5957_v25  ;;  %6714 = vst [vmem:[#allocation30_spill] sm:$0xff] %v5960_v11  ;;  %v1433_v10 = vsel %vm1293_vm2, %v1340_v51, 0.0  ;;  %v4143_v9 = vunpack.i.h.bf16 %v4141_v35 }
 0x235   : > { %4435 = vrot.lane.b32.xlu0 %v4424_v54, %s4749_s20  ;;  %v5951_v14 = vsel %vm1645_vm12, %v1716_v22, %v1717_v62  ;;  %v2434_v0 = vsel %vm565_vm0, %v2402_v44, %v4142_v5  ;;  %v4148_v56 = vunpack.i.h.bf16 %v5922_v57  ;;  %v1545_v32 = vrot.slane %v5957_v25, 1  ;;  %v1253_v44 = vld [vmem:[#allocation2 + $0x100] sm:$0xff] }
 0x236   : > { %v5934_v58 = vpop.permute.xlu1 %4150  ;;  %2754 = vmatmul.mubr.f32.gmra.mrb[14].mxu1 %v2532_v61  ;;  %v2370_v40 = vsel %vm2358_vm15, %v2337_v2, %v4123_v17  ;;  %v2467_v61 = vsel %vm2456_vm4, %v2434_v0, %v4147_v27  ;;  %v1547_v5 = vrot.slane %v1433_v10, 1  ;;  %v1254_v27 = vld [vmem:[#allocation2 + $0x108] sm:$0xff]  ;;  %v1722_v0 = vrot.slane %v5957_v25, 2 }
 0x237   : > { %3578 = vmatprep.mubr.msk.f32.mxu1 %vm985_vm1, %v5552_v13  ;;  %v5942_v54 = vpop.permute.xlu0 %4155  ;;  %v5954_v13 = vsel %vm1645_vm12, %v1717_v62, %v1719_v12  ;;  %v2403_v34 = vsel %vm2391_vm3, %v2370_v40, %v4133_v33 }
 0x238   : > { %4440 = vrot.lane.b32.xlu1 %v4439_v8, %s4745_s12  ;;  %v4459_v3 = vpack.i.bf16 %v5954_v13, %v5951_v14  ;;  %v2435_v57 = vsel %vm565_vm0, %v2403_v34, %v4143_v9  ;;  %v4474_v9 = vpack.i.bf16 %v5957_v25, %v5960_v11  ;;  %v1724_v34 = vrot.slane %v1433_v10, 2 }
 0x239   : > { %4450 = vrot.lane.b32.xlu0 %v4449_v52, %s4752_s11  ;;  %v2468_v2 = vsel %vm2456_vm4, %v2435_v57, %v4148_v56  ;;  %v1342_v56 = vrot.slane %v1253_v44, 7 }
 0x23a   : > { %v4161_v63 = vpop.permute.xlu1 %4160  ;;  %v6011_v10 = vsel %vm1645_vm12, %v1722_v0, %v1724_v34 }
 0x23b   : > { %v4162_v38 = vunpack.i.l.bf16 %v4161_v63  ;;  %v4171_v20 = vpop.permute.xlu0 %4170  ;;  %v4163_v22 = vunpack.i.h.bf16 %v4161_v63  ;;  %v6019_v57 = vsel %vm1293_vm2, 0.0, %v1342_v56 }
 0x23c   : > { %4445 = vrot.lane.b32.xlu1 %v4439_v8, %s4748_s13  ;;  %v4172_v48 = vunpack.i.l.bf16 %v4171_v20  ;;  %v4173_v12 = vunpack.i.h.bf16 %v4171_v20  ;;  %v1544_v8 = vrot.slane %v5960_v11, 1  ;;  %v1721_v20 = vrot.slane %v5960_v11, 2 }
 0x23d   : > { %4455 = vrot.lane.b32.xlu0 %v4449_v52, %s4750_s26  ;;  %v2500_v62 = vsel %vm2489_vm5, %v2467_v61, %v4162_v38  ;;  %v2501_v33 = vsel %vm2489_vm5, %v2468_v2, %v4163_v22  ;;  %v4158_v2 = vunpack.i.h.bf16 %v5942_v54 }
 0x23e   : > { %v5971_v35 = vpop.permute.xlu1 %4165  ;;  %v2533_v51 = vsel %vm2522_vm6, %v2500_v62, %v4172_v48  ;;  %v2534_v40 = vsel %vm2522_vm6, %v2501_v33, %v4173_v12  ;;  %v1343_v48 = vrot.slane %v1254_v27, 7  ;;  %v4152_v62 = vunpack.i.l.bf16 %v5934_v58 }
 0x23f   : > { %v5977_v17 = vpop.permute.xlu0 %4175  ;;  %2759 = vmatmul.mubr.f32.gmra.mrb[16].mxu1 %v2533_v51  ;;  %v6008_v51 = vsel %vm1645_vm12, %v1721_v20, %v1722_v0 }
 0x240   : > { %4460 = vrot.lane.b32.xlu1 %v4459_v3, %s4751_s15  ;;  %3579 = vmatprep.mubr.msk.f32.mxu1 %vm985_vm1, %v5555_v23  ;;  %v1546_v23 = vsel %vm1468_vm9, %v1544_v8, %v1545_v32  ;;  %v4153_v8 = vunpack.i.h.bf16 %v5934_v58  ;;  %v4177_v33 = vunpack.i.l.bf16 %v5977_v17  ;;  %v4494_v27 = vpack.i.bf16 %v6011_v10, %v6008_v51 }
 0x241   : > { %4465 = vrot.lane.b32.xlu0 %v4449_v52, %s4747_s30  ;;  %v1548_v52 = vsel %vm1468_vm9, %v1545_v32, %v1547_v5  ;;  %v4167_v32 = vunpack.i.l.bf16 %v5971_v35  ;;  %v6025_v5 = vsel %vm1293_vm2, %v1343_v48, 0.0  ;;  %v4168_v58 = vunpack.i.h.bf16 %v5971_v35 }
 0x242   : > { %v5987_v63 = vpop.permute.xlu1 %4180  ;;  %v4484_v22 = vpack.i.bf16 %v1548_v52, %v1546_v23  ;;  %v1923_v20 = vrot.slane %v6025_v5, 1  ;;  %v2339_v34 = vsel %vm985_vm1, %v5431_v28, %v4153_v8 }
 0x243   : > { %v5993_v38 = vpop.permute.xlu0 %4185  ;;  %2764 = vmatmul.mubr.f32.gmra.mrb[18].mxu1 %v2534_v40  ;;  %v2338_v40 = vsel %vm985_vm1, %v5434_v4, %v4152_v62  ;;  %v4182_v35 = vunpack.i.l.bf16 %v5987_v63 }
 0x244   : > { %4470 = vrot.lane.b32.xlu1 %v4459_v3, %s4749_s20  ;;  %3580 = vmatprep.mubr.msk.f32.mxu1 %vm985_vm1, %v5613_v37  ;;  %v4157_v3 = vunpack.i.l.bf16 %v5942_v54  ;;  %v6016_v37 = vsel %vm1293_vm2, %v1342_v56, %v1343_v48  ;;  %v4178_v54 = vunpack.i.h.bf16 %v5977_v17  ;;  %v1256_v56 = vld [vmem:[#allocation2 + $0x118] sm:$0xff]  ;;  %v2372_v48 = vsel %vm2358_vm15, %v2339_v34, %v4158_v2 }
 0x245   : > { %4475 = vrot.lane.b32.xlu0 %v4474_v9, %s4745_s12  ;;  %v1921_v23 = vrot.slane %v6016_v37, 1  ;;  %v2405_v17 = vsel %vm2391_vm3, %v2372_v48, %v4168_v58  ;;  %v1346_v2 = vrot.slane %v1256_v56, 7  ;;  %v2022_v48 = vrot.slane %v6016_v37, 2 }
 0x246   : > { %v6002_v61 = vpop.permute.xlu1 %4190  ;;  %v2371_v52 = vsel %vm2358_vm15, %v2338_v40, %v4157_v3  ;;  %v4183_v40 = vunpack.i.h.bf16 %v5987_v63  ;;  %v2437_v8 = vsel %vm565_vm0, %v2405_v17, %v4178_v54  ;;  %v4509_v63 = vpack.i.bf16 %v6016_v37, %v6019_v57 }
 0x247   : > { %v6005_v12 = vpop.permute.xlu0 %4195  ;;  %v2404_v4 = vsel %vm2391_vm3, %v2371_v52, %v4167_v32  ;;  %v1924_v11 = vsel %vm1468_vm9, %v1921_v23, %v1923_v20  ;;  %v4187_v17 = vunpack.i.l.bf16 %v5993_v38 }
 0x248   : > { %4485 = vrot.lane.b32.xlu1 %v4484_v22, %s4752_s11  ;;  %v2436_v62 = vsel %vm565_vm0, %v2404_v4, %v4177_v33 }
 0x249   : > { %4480 = vrot.lane.b32.xlu0 %v4474_v9, %s4748_s13  ;;  %v1920_v9 = vrot.slane %v6019_v57, 1  ;;  %v2469_v33 = vsel %vm2456_vm4, %v2436_v62, %v4182_v35  ;;  %v6081_v62 = vsel %vm1293_vm2, %v1346_v2, 0.0 }
 0x24a   : > { %v4221_v44 = vpop.permute.xlu1 %4220 }
 0x24b   : > { %v6034_v0 = vpop.permute.xlu0 %4200  ;;  %v1922_v28 = vsel %vm1468_vm9, %v1920_v9, %v1921_v23  ;;  %v4222_v34 = vunpack.i.l.bf16 %v4221_v44  ;;  %v6715_v23 = vrot.slane %v5128_v45, 7  ;;  %v4223_v35 = vunpack.i.h.bf16 %v4221_v44 }
 0x24c   : > { %4490 = vrot.lane.b32.xlu1 %v4484_v22, %s4750_s26  ;;  %v4519_v4 = vpack.i.bf16 %v1924_v11, %v1922_v28  ;;  %v2021_v11 = vrot.slane %v6019_v57, 2  ;;  %v4188_v45 = vunpack.i.h.bf16 %v5993_v38  ;;  %v2220_v28 = vrot.slane %v5134_v47, 1 }
 0x24d   : > { %4495 = vrot.lane.b32.xlu0 %v4494_v27, %s4751_s15  ;;  %v6071_v20 = vsel %vm1293_vm2, %v6715_v23, %v1346_v2  ;;  %v4193_v57 = vunpack.i.h.bf16 %v6002_v61  ;;  %v4192_v38 = vunpack.i.l.bf16 %v6002_v61  ;;  %v2340_v2 = vsel %vm985_vm1, %v5495_v26, %v4187_v17 }
 0x24e   : > { %v6049_v3 = vpop.permute.xlu1 %4225  ;;  %v2221_v37 = vrot.slane %v6071_v20, 1 }
 0x24f   : > { %v4206_v25 = vpop.permute.xlu0 %4205 }
 0x250   : > { %4500 = vrot.lane.b32.xlu1 %v4484_v22, %s4747_s30  ;;  %v4208_v32 = vunpack.i.h.bf16 %v4206_v25  ;;  %v4207_v52 = vunpack.i.l.bf16 %v4206_v25  ;;  %v2470_v25 = vsel %vm2456_vm4, %v2437_v8, %v4183_v40 }
 0x251   : > { %4505 = vrot.lane.b32.xlu0 %v4494_v27, %s4749_s20 }
 0x252   : > { %v6059_v58 = vpop.permute.xlu1 %4230  ;;  %v2502_v9 = vsel %vm2489_vm5, %v2469_v33, %v4207_v52  ;;  %v2503_v27 = vsel %vm2489_vm5, %v2470_v25, %v4208_v32  ;;  %v6098_v32 = vsel %vm1645_vm12, %v2021_v11, %v2022_v48  ;;  %v2326_v52 = vsel %vm985_vm1, %v5526_v16, %v4188_v45 }
 0x253   : > { %v4211_v54 = vpop.permute.xlu0 %4210  ;;  %v2535_v22 = vsel %vm2522_vm6, %v2502_v9, %v4222_v34  ;;  %v2536_v44 = vsel %vm2522_vm6, %v2503_v27, %v4223_v35  ;;  %v4197_v9 = vunpack.i.l.bf16 %v6005_v12  ;;  %v2222_v16 = vsel %vm1468_vm9, %v2220_v28, %v2221_v37 }
 0x254   : > { %4510 = vrot.lane.b32.xlu1 %v4509_v63, %s4745_s12  ;;  %2769 = vmatmul.mubr.f32.gmra.mrb[20].mxu1 %v2535_v22  ;;  %v4212_v34 = vunpack.i.l.bf16 %v4211_v54  ;;  %v2359_v26 = vsel %vm2358_vm15, %v2326_v52, %v4193_v57  ;;  %v4203_v35 = vunpack.i.h.bf16 %v6034_v0  ;;  %v4228_v11 = vunpack.i.h.bf16 %v6049_v3 }
 0x255   : > { %4520 = vrot.lane.b32.xlu0 %v4519_v4, %s4752_s11  ;;  %3581 = vmatprep.mubr.msk.f32.mxu1 %vm985_vm1, %v5630_v24  ;;  %v2024_v24 = vrot.slane %v6025_v5, 2  ;;  %v2223_v5 = vrot.slane %v6081_v62, 1  ;;  %v2341_v17 = vsel %vm985_vm1, %v5483_v31, %v4197_v9  ;;  %v4232_v57 = vunpack.i.l.bf16 %v6059_v58 }
 0x256   : > { %v6076_v56 = vpop.permute.xlu1 %4240 }
 0x257   : > { %v4216_v40 = vpop.permute.xlu0 %4215  ;;  %v6108_v61 = vsel %vm1645_vm12, %v2022_v48, %v2024_v24  ;;  %v4227_v48 = vunpack.i.l.bf16 %v6049_v3  ;;  %v4233_v3 = vunpack.i.h.bf16 %v6059_v58 }
 0x258   : > { %4515 = vrot.lane.b32.xlu1 %v4509_v63, %s4748_s13  ;;  %2774 = vmatmul.mubr.f32.gmra.mrb[22].mxu1 %v2536_v44  ;;  %v4198_v63 = vunpack.i.h.bf16 %v6005_v12  ;;  %v4202_v12 = vunpack.i.l.bf16 %v6034_v0  ;;  %v4218_v24 = vunpack.i.h.bf16 %v4216_v40  ;;  %v4217_v28 = vunpack.i.l.bf16 %v4216_v40 }
 0x259   : > { %4525 = vrot.lane.b32.xlu0 %v4519_v4, %s4750_s26  ;;  %3582 = vmatprep.mubr.msk.f32.mxu1 %vm985_vm1, %v5668_v15  ;;  %v4213_v15 = vunpack.i.h.bf16 %v4211_v54  ;;  %v2373_v54 = vsel %vm2358_vm15, %v2340_v2, %v4192_v38  ;;  %v2224_v4 = vsel %vm1468_vm9, %v2221_v37, %v2223_v5 }
 0x25a   : > { %v6095_v8 = vpop.permute.xlu1 %4250  ;;  %v2406_v27 = vsel %vm2391_vm3, %v2373_v54, %v4212_v34  ;;  %v2327_v45 = vsel %vm985_vm1, %v5530_v19, %v4198_v63  ;;  %v2374_v31 = vsel %vm2358_vm15, %v2341_v17, %v4202_v12 }
 0x25b   : > { %v4236_v33 = vpop.permute.xlu0 %4235  ;;  %v2392_v25 = vsel %vm2391_vm3, %v2359_v26, %v4213_v15  ;;  %v2438_v0 = vsel %vm565_vm0, %v2406_v27, %v4227_v48  ;;  %v2360_v52 = vsel %vm2358_vm15, %v2327_v45, %v4203_v35 }
 0x25c   : > { %2086 = vrot.lane.b32.xlu1 %v6098_v32, %s4751_s15  ;;  %v2424_v44 = vsel %vm565_vm0, %v2392_v25, %v4228_v11  ;;  %v4238_v38 = vunpack.i.h.bf16 %v4236_v33  ;;  %v4237_v5 = vunpack.i.l.bf16 %v4236_v33  ;;  %v2471_v9 = vsel %vm2456_vm4, %v2438_v0, %v4232_v57 }
 0x25d   : > { %2088 = vrot.lane.b32.xlu0 %v6108_v61, %s4751_s15  ;;  %v2457_v40 = vsel %vm2456_vm4, %v2424_v44, %v4233_v3  ;;  %v2393_v58 = vsel %vm2391_vm3, %v2360_v52, %v4218_v24  ;;  %v2407_v33 = vsel %vm2391_vm3, %v2374_v31, %v4217_v28  ;;  %v4252_v52 = vunpack.i.l.bf16 %v6095_v8 }
 0x25e   : > { %v4256_v22 = vpop.permute.xlu1 %4255 }
 0x25f   : > { %v4246_v23 = vpop.permute.xlu0 %4245  ;;  %v4258_v2 = vunpack.i.h.bf16 %v4256_v22  ;;  %v4257_v15 = vunpack.i.l.bf16 %v4256_v22  ;;  %v2439_v22 = vsel %vm565_vm0, %v2407_v33, %v4237_v5 }
 0x260   : > { %2285 = vrot.lane.b32.xlu1 %v2222_v16, %s4752_s11  ;;  %v4248_v34 = vunpack.i.h.bf16 %v4246_v23  ;;  %v4247_v63 = vunpack.i.l.bf16 %v4246_v23 }
 0x261   : > { %2287 = vrot.lane.b32.xlu0 %v2224_v4, %s4752_s11  ;;  %v2425_v4 = vsel %vm565_vm0, %v2393_v58, %v4238_v38  ;;  %v2490_v12 = vsel %vm2489_vm5, %v2457_v40, %v4258_v2  ;;  %v2504_v48 = vsel %vm2489_vm5, %v2471_v9, %v4257_v15 }
 0x262   : > { %v6131_v37 = vpop.permute.xlu1 %4265  ;;  %v2458_v44 = vsel %vm2456_vm4, %v2425_v4, %v4248_v34  ;;  %v2472_v24 = vsel %vm2456_vm4, %v2439_v22, %v4247_v63  ;;  %v4253_v63 = vunpack.i.h.bf16 %v6095_v8 }
 0x263   : > { %v4261_v19 = vpop.permute.xlu0 %4260  ;;  %v4267_v31 = vunpack.i.l.bf16 %v6131_v37  ;;  %v4268_v58 = vunpack.i.h.bf16 %v6131_v37 }
 0x264   : > { %2185 = vrot.lane.b32.xlu1 %v6071_v20, %s4745_s12  ;;  %v4263_v16 = vunpack.i.h.bf16 %v4261_v19  ;;  %v4262_v26 = vunpack.i.l.bf16 %v4261_v19  ;;  %v4242_v19 = vunpack.i.l.bf16 %v6076_v56  ;;  %s4657_s12 = scalar_lea.vmem %s4656_s14, 8192 }
 0x265   : > { %p4659_p1 = scmp.lt.s32.totalorder %s4657_s12, %s4651_s22 }
 0x266   : > { %v4271_v54 = vpop.permute.xlu1 %4270  ;;  %v2491_v0 = vsel %vm2489_vm5, %v2458_v44, %v4263_v16  ;;  %v2505_v3 = vsel %vm2489_vm5, %v2472_v24, %v4262_v26  ;;  %v2342_v40 = vsel %vm985_vm1, %v5565_v18, %v4242_v19 }
 0x267   : > { %v4273_v25 = vunpack.i.h.bf16 %v4271_v54  ;;  %v4272_v27 = vunpack.i.l.bf16 %v4271_v54  ;;  %v4276_v35 = vpop.permute.xlu0 %4275  ;;  %v2375_v9 = vsel %vm2358_vm15, %v2342_v40, %v4252_v52  ;;  %p4660_p6 = por %p4659_p1, %p4658_p12 }
 0x268   : > { %v4278_v11 = vunpack.i.h.bf16 %v4276_v35  ;;  %v4277_v23 = vunpack.i.l.bf16 %v4276_v35  ;;  %v2408_v33 = vsel %vm2391_vm3, %v2375_v9, %v4267_v31 }
 0x269   : > { %v2523_v45 = vsel %vm2522_vm6, %v2490_v12, %v4273_v25  ;;  %v2537_v17 = vsel %vm2522_vm6, %v2504_v48, %v4272_v27  ;;  %p4661_p13 = pnand %p4660_p6, %p4654_p9 }
 0x26a   : > { %v4281_v28 = vpop.permute.xlu1 %4280  ;;  %2709 = vmatmul.mubr.f32.vlgmr.msra.gmra.mrb[32].mxu0 %v2523_v45  ;;  %2779 = vmatmul.mubr.f32.gmra.mrb[24].mxu1 %v2537_v17  ;;  %v2524_v38 = vsel %vm2522_vm6, %v2491_v0, %v4278_v11  ;;  %v2538_v5 = vsel %vm2522_vm6, %v2505_v3, %v4277_v23 }
 0x26b   : > { %3569 = vmatprep.mubr.msk.f32.mxu0 %vm985_vm1, %v5291_v53  ;;  %3583 = vmatprep.mubr.msk.f32.mxu1 %vm985_vm1, %v5671_v50  ;;  %v4286_v57 = vpop.permute.xlu0 %4285  ;;  %v4282_v15 = vunpack.i.l.bf16 %v4281_v28  ;;  %v4243_v50 = vunpack.i.h.bf16 %v6076_v56  ;;  %v4283_v26 = vunpack.i.h.bf16 %v4281_v28 }
 0x26c   : > { %v4287_v34 = vunpack.i.l.bf16 %v4286_v57  ;;  %v4288_v22 = vunpack.i.h.bf16 %v4286_v57 }
 0x26d   : > { %v2440_v54 = vsel %vm565_vm0, %v2408_v33, %v4282_v15  ;;  %v2343_v56 = vsel %vm985_vm1, %v5570_v36, %v4243_v50 }
 0x26e   : > { %v4291_v2 = vpop.permute.xlu1 %4290  ;;  %2714 = vmatmul.mubr.f32.gmra.mrb[34].mxu0 %v2524_v38  ;;  %2784 = vmatmul.mubr.f32.gmra.mrb[26].mxu1 %v2538_v5  ;;  %v2473_v25 = vsel %vm2456_vm4, %v2440_v54, %v4287_v34  ;;  %v2376_v8 = vsel %vm2358_vm15, %v2343_v56, %v4253_v63  ;;  %v6716_v5 = vld [vmem:[#allocation23_spill] sm:$0xff] }
 0x26f   : > { %3584 = vmatprep.mubr.msk.f32.mxu1 %vm985_vm1, %v5711_v30  ;;  %v4296_v53 = vpop.permute.xlu0 %4295  ;;  %v2409_v35 = vsel %vm2391_vm3, %v2376_v8, %v4268_v58  ;;  %v4292_v45 = vunpack.i.l.bf16 %v4291_v2  ;;  %v4293_v38 = vunpack.i.h.bf16 %v4291_v2  ;;  %v6717_v2 = vld [vmem:[#allocation24_spill] sm:$0xff] }
 0x270   : > { %v2441_v48 = vsel %vm565_vm0, %v2409_v35, %v4283_v26  ;;  %v4297_v36 = vunpack.i.l.bf16 %v4296_v53  ;;  %v4298_v31 = vunpack.i.h.bf16 %v4296_v53 }
 0x271   : > { %v2474_v44 = vsel %vm2456_vm4, %v2441_v48, %v4288_v22  ;;  %v2344_v19 = vsel %vm985_vm1, %v6716_v5, %v4292_v45  ;;  %v2345_v58 = vsel %vm985_vm1, %v6717_v2, %v4293_v38  ;;  %v6719_v5 = vld [vmem:[#allocation26_spill] sm:$0xff] }
 0x272   : > { %v4301_v16 = vpop.permute.xlu1 %4300  ;;  %v2377_v15 = vsel %vm2358_vm15, %v2344_v19, %v4297_v36 }
 0x273   : > { %v4302_v30 = vunpack.i.l.bf16 %v4301_v16  ;;  %v4311_v4 = vpop.permute.xlu0 %4310  ;;  %v4303_v27 = vunpack.i.h.bf16 %v4301_v16  ;;  %v2378_v16 = vsel %vm2358_vm15, %v2345_v58, %v4298_v31 }
 0x274   : > { %v4312_v18 = vunpack.i.l.bf16 %v4311_v4  ;;  %v4313_v12 = vunpack.i.h.bf16 %v4311_v4 }
 0x275   : > { %v2506_v37 = vsel %vm2489_vm5, %v2473_v25, %v4302_v30  ;;  %v2507_v28 = vsel %vm2489_vm5, %v2474_v44, %v4303_v27 }
 0x276   : > { %v4306_v11 = vpop.permute.xlu1 %4305  ;;  %v2539_v23 = vsel %vm2522_vm6, %v2506_v37, %v4312_v18  ;;  %v2540_v57 = vsel %vm2522_vm6, %v2507_v28, %v4313_v12 }
 0x277   : > { %v4316_v17 = vpop.permute.xlu0 %4315  ;;  %2789 = vmatmul.mubr.f32.gmra.mrb[28].mxu1 %v2539_v23  ;;  %v4307_v24 = vunpack.i.l.bf16 %v4306_v11 }
 0x278   : > { %3585 = vmatprep.mubr.msk.f32.mxu1 %vm985_vm1, %v5714_v60  ;;  %v4317_v0 = vunpack.i.l.bf16 %v4316_v17  ;;  %v4308_v60 = vunpack.i.h.bf16 %v4306_v11  ;;  %v4318_v34 = vunpack.i.h.bf16 %v4316_v17  ;;  %v6718_v17 = vld [vmem:[#allocation27_spill] sm:$0xff] }
 0x279   : > { %v2410_v50 = vsel %vm2391_vm3, %v2377_v15, %v4307_v24 }
 0x27a   : > { %v4321_v3 = vpop.permute.xlu1 %4320  ;;  %v2442_v63 = vsel %vm565_vm0, %v2410_v50, %v4317_v0  ;;  %v2411_v26 = vsel %vm2391_vm3, %v2378_v16, %v4308_v60 }
 0x27b   : > { %v4326_v52 = vpop.permute.xlu0 %4325  ;;  %2794 = vmatmul.mubr.f32.gmra.mrb[30].mxu1 %v2540_v57  ;;  %v4322_v40 = vunpack.i.l.bf16 %v4321_v3  ;;  %v4323_v54 = vunpack.i.h.bf16 %v4321_v3  ;;  %v2443_v30 = vsel %vm565_vm0, %v2411_v26, %v4318_v34 }
 0x27c   : > { %3586 = vmatprep.mubr.msk.f32.mxu1 %vm985_vm1, %v5766_v6  ;;  %v4327_v8 = vunpack.i.l.bf16 %v4326_v52  ;;  %v4328_v45 = vunpack.i.h.bf16 %v4326_v52 }
 0x27d   : > { %v2475_v6 = vsel %vm2456_vm4, %v2442_v63, %v4322_v40  ;;  %v2476_v35 = vsel %vm2456_vm4, %v2443_v30, %v4323_v54 }
 0x27e   : > { %v4331_v9 = vpop.permute.xlu1 %4330  ;;  %v2346_v36 = vsel %vm985_vm1, %v6718_v17, %v4327_v8 }
 0x27f   : > { %v4336_v33 = vpop.permute.xlu0 %4335  ;;  %v4332_v23 = vunpack.i.l.bf16 %v4331_v9  ;;  %v4333_v0 = vunpack.i.h.bf16 %v4331_v9 }
 0x280   : > { %v4337_v53 = vunpack.i.l.bf16 %v4336_v33  ;;  %v4338_v4 = vunpack.i.h.bf16 %v4336_v33 }
 0x281   : > { %v2379_v3 = vsel %vm2358_vm15, %v2346_v36, %v4332_v23 }
 0x282   : > { %v4346_v56 = vpop.permute.xlu1 %4345  ;;  %v2508_v22 = vsel %vm2489_vm5, %v2475_v6, %v4337_v53  ;;  %v2509_v11 = vsel %vm2489_vm5, %v2476_v35, %v4338_v4 }
 0x283   : > { %v4347_v18 = vunpack.i.l.bf16 %v4346_v56  ;;  %v4341_v25 = vpop.permute.xlu0 %4340  ;;  %v4348_v27 = vunpack.i.h.bf16 %v4346_v56 }
 0x284   : > { %v4342_v44 = vunpack.i.l.bf16 %v4341_v25  ;;  %v4343_v19 = vunpack.i.h.bf16 %v4341_v25 }
 0x285   : > { %v2541_v37 = vsel %vm2522_vm6, %v2508_v22, %v4347_v18  ;;  %v2542_v24 = vsel %vm2522_vm6, %v2509_v11, %v4348_v27 }
 0x286   : > { %v4351_v12 = vpop.permute.xlu1 %4350  ;;  %2799 = vmatmul.mubr.f32.gmra.mrb[32].mxu1 %v2541_v37  ;;  %v2412_v52 = vsel %vm2391_vm3, %v2379_v3, %v4342_v44 }
 0x287   : > { %3587 = vmatprep.mubr.msk.f32.mxu1 %vm985_vm1, %v5769_v49  ;;  %v4356_v48 = vpop.permute.xlu0 %4355  ;;  %v4352_v57 = vunpack.i.l.bf16 %v4351_v12  ;;  %v2347_v49 = vsel %vm985_vm1, %v6719_v5, %v4328_v45  ;;  %v4353_v50 = vunpack.i.h.bf16 %v4351_v12  ;;  %v6720_v12 = vld [vmem:[#allocation28_spill] sm:$0xff] }
 0x288   : > { %v4357_v31 = vunpack.i.l.bf16 %v4356_v48  ;;  %v2380_v60 = vsel %vm2358_vm15, %v2347_v49, %v4333_v0  ;;  %v4358_v2 = vunpack.i.h.bf16 %v4356_v48 }
 0x289   : > { %v2444_v40 = vsel %vm565_vm0, %v2412_v52, %v4352_v57  ;;  %v2413_v9 = vsel %vm2391_vm3, %v2380_v60, %v4343_v19 }
 0x28a   : > { %v4361_v28 = vpop.permute.xlu1 %4360  ;;  %2804 = vmatmul.mubr.f32.gmra.mrb[34].mxu1 %v2542_v24  ;;  %v2477_v58 = vsel %vm2456_vm4, %v2444_v40, %v4357_v31  ;;  %v2445_v6 = vsel %vm565_vm0, %v2413_v9, %v4353_v50 }
 0x28b   : > { %3588 = vmatprep.mubr.msk.f32.mxu1 %vm985_vm1, %v5827_v43  ;;  %v4366_v38 = vpop.permute.xlu0 %4365  ;;  %v4362_v30 = vunpack.i.l.bf16 %v4361_v28  ;;  %v2478_v22 = vsel %vm2456_vm4, %v2445_v6, %v4358_v2  ;;  %v4363_v35 = vunpack.i.h.bf16 %v4361_v28 }
 0x28c   : > { %v4367_v56 = vunpack.i.l.bf16 %v4366_v38  ;;  %v4368_v48 = vunpack.i.h.bf16 %v4366_v38 }
 0x28d   : > { %v2348_v11 = vsel %vm985_vm1, %v6720_v12, %v4362_v30  ;;  %v2349_v28 = vsel %vm985_vm1, %v5717_v59, %v4363_v35 }
 0x28e   : > { %v4371_v15 = vpop.permute.xlu1 %4370  ;;  %v2381_v45 = vsel %vm2358_vm15, %v2348_v11, %v4367_v56  ;;  %v2382_v57 = vsel %vm2358_vm15, %v2349_v28, %v4368_v48 }
 0x28f   : > { %v4372_v34 = vunpack.i.l.bf16 %v4371_v15  ;;  %v4381_v63 = vpop.permute.xlu0 %4380  ;;  %v4373_v33 = vunpack.i.h.bf16 %v4371_v15 }
 0x290   : > { %v4382_v43 = vunpack.i.l.bf16 %v4381_v63  ;;  %v4383_v53 = vunpack.i.h.bf16 %v4381_v63 }
 0x291   : > { %v2510_v16 = vsel %vm2489_vm5, %v2477_v58, %v4372_v34  ;;  %v2511_v25 = vsel %vm2489_vm5, %v2478_v22, %v4373_v33 }
 0x292   : > { %v4376_v26 = vpop.permute.xlu1 %4375  ;;  %v2543_v54 = vsel %vm2522_vm6, %v2510_v16, %v4382_v43  ;;  %v2544_v37 = vsel %vm2522_vm6, %v2511_v25, %v4383_v53 }
 0x293   : > { %v4386_v4 = vpop.permute.xlu0 %4385  ;;  %2809 = vmatmul.mubr.f32.gmra.mrb[36].mxu1 %v2543_v54  ;;  %v4377_v18 = vunpack.i.l.bf16 %v4376_v26 }
 0x294   : > { %3589 = vmatprep.mubr.msk.f32.mxu1 %vm985_vm1, %v5830_v55  ;;  %v4387_v8 = vunpack.i.l.bf16 %v4386_v4  ;;  %v4378_v55 = vunpack.i.h.bf16 %v4376_v26  ;;  %v4388_v44 = vunpack.i.h.bf16 %v4386_v4 }
 0x295   : > { %v2414_v17 = vsel %vm2391_vm3, %v2381_v45, %v4377_v18 }
 0x296   : > { %v4391_v27 = vpop.permute.xlu1 %4390  ;;  %v2446_v24 = vsel %vm565_vm0, %v2414_v17, %v4387_v8  ;;  %v2415_v5 = vsel %vm2391_vm3, %v2382_v57, %v4378_v55 }
 0x297   : > { %v4396_v23 = vpop.permute.xlu0 %4395  ;;  %2814 = vmatmul.mubr.f32.gmra.mrb[38].mxu1 %v2544_v37  ;;  %v4392_v36 = vunpack.i.l.bf16 %v4391_v27  ;;  %v4393_v49 = vunpack.i.h.bf16 %v4391_v27  ;;  %v2447_v19 = vsel %vm565_vm0, %v2415_v5, %v4388_v44 }
 0x298   : > { %3590 = vmatprep.mubr.msk.f32.mxu1 %vm985_vm1, %v5890_v21  ;;  %v4397_v40 = vunpack.i.l.bf16 %v4396_v23  ;;  %v4398_v33 = vunpack.i.h.bf16 %v4396_v23 }
 0x299   : > { %v2479_v21 = vsel %vm2456_vm4, %v2446_v24, %v4392_v36  ;;  %v2480_v63 = vsel %vm2456_vm4, %v2447_v19, %v4393_v49 }
 0x29a   : > { %v4401_v0 = vpop.permute.xlu1 %4400  ;;  %v2350_v16 = vsel %vm985_vm1, %v5777_v39, %v4397_v40 }
 0x29b   : > { %v4406_v3 = vpop.permute.xlu0 %4405  ;;  %v4402_v43 = vunpack.i.l.bf16 %v4401_v0  ;;  %v4403_v6 = vunpack.i.h.bf16 %v4401_v0 }
 0x29c   : > { %v4407_v38 = vunpack.i.l.bf16 %v4406_v3  ;;  %v4408_v52 = vunpack.i.h.bf16 %v4406_v3 }
 0x29d   : > { %v2383_v30 = vsel %vm2358_vm15, %v2350_v16, %v4402_v43 }
 0x29e   : > { %v4416_v31 = vpop.permute.xlu1 %4415  ;;  %v2512_v15 = vsel %vm2489_vm5, %v2479_v21, %v4407_v38  ;;  %v2513_v2 = vsel %vm2489_vm5, %v2480_v63, %v4408_v52 }
 0x29f   : > { %v4417_v60 = vunpack.i.l.bf16 %v4416_v31  ;;  %v4411_v50 = vpop.permute.xlu0 %4410  ;;  %v4418_v34 = vunpack.i.h.bf16 %v4416_v31 }
 0x2a0   : > { %v4412_v53 = vunpack.i.l.bf16 %v4411_v50  ;;  %v4413_v22 = vunpack.i.h.bf16 %v4411_v50 }
 0x2a1   : > { %v2545_v59 = vsel %vm2522_vm6, %v2512_v15, %v4417_v60  ;;  %v2546_v26 = vsel %vm2522_vm6, %v2513_v2, %v4418_v34 }
 0x2a2   : > { %v4421_v9 = vpop.permute.xlu1 %4420  ;;  %2819 = vmatmul.mubr.f32.gmra.mrb[40].mxu1 %v2545_v59  ;;  %v2416_v18 = vsel %vm2391_vm3, %v2383_v30, %v4412_v53 }
 0x2a3   : > { %3591 = vmatprep.mubr.msk.f32.mxu1 %vm985_vm1, %v5893_v1  ;;  %v4426_v58 = vpop.permute.xlu0 %4425  ;;  %v4422_v4 = vunpack.i.l.bf16 %v4421_v9  ;;  %v2351_v1 = vsel %vm985_vm1, %v5774_v29, %v4398_v33  ;;  %v4423_v27 = vunpack.i.h.bf16 %v4421_v9 }
 0x2a4   : > { %v4427_v39 = vunpack.i.l.bf16 %v4426_v58  ;;  %v2384_v8 = vsel %vm2358_vm15, %v2351_v1, %v4403_v6  ;;  %v4428_v23 = vunpack.i.h.bf16 %v4426_v58 }
 0x2a5   : > { %v2448_v37 = vsel %vm565_vm0, %v2416_v18, %v4422_v4  ;;  %v2417_v11 = vsel %vm2391_vm3, %v2384_v8, %v4413_v22 }
 0x2a6   : > { %v4431_v54 = vpop.permute.xlu1 %4430  ;;  %2824 = vmatmul.mubr.f32.gmra.mrb[42].mxu1 %v2546_v26  ;;  %v2481_v48 = vsel %vm2456_vm4, %v2448_v37, %v4427_v39  ;;  %v2449_v44 = vsel %vm565_vm0, %v2417_v11, %v4423_v27 }
 0x2a7   : > { %3592 = vmatprep.mubr.msk.f32.mxu1 %vm985_vm1, %v5951_v14  ;;  %v4436_v56 = vpop.permute.xlu0 %4435  ;;  %v4432_v24 = vunpack.i.l.bf16 %v4431_v54  ;;  %v2482_v3 = vsel %vm2456_vm4, %v2449_v44, %v4428_v23  ;;  %v4433_v19 = vunpack.i.h.bf16 %v4431_v54 }
 0x2a8   : > { %v4437_v28 = vunpack.i.l.bf16 %v4436_v56  ;;  %v4438_v15 = vunpack.i.h.bf16 %v4436_v56 }
 0x2a9   : > { %v2352_v52 = vsel %vm985_vm1, %v5836_v7, %v4432_v24  ;;  %v2353_v9 = vsel %vm985_vm1, %v5833_v46, %v4433_v19  ;;  %v2966_v24 = vld [vmem:[%s6652_s7 + $0x8] sm:$0xff]  ;;  %v2321_v19 = vrot.slane %v5134_v47, 2 }
 0x2aa   : > { %v4441_v25 = vpop.permute.xlu1 %4440  ;;  %v2385_v60 = vsel %vm2358_vm15, %v2352_v52, %v4437_v28  ;;  %v2386_v2 = vsel %vm2358_vm15, %v2353_v9, %v4438_v15  ;;  %v2322_v15 = vrot.slane %v6071_v20, 2 }
 0x2ab   : > { %v4442_v35 = vunpack.i.l.bf16 %v4441_v25  ;;  %v4451_v12 = vpop.permute.xlu0 %4450  ;;  %v4443_v45 = vunpack.i.h.bf16 %v4441_v25 }
 0x2ac   : > { %v4452_v14 = vunpack.i.l.bf16 %v4451_v12  ;;  %v4453_v55 = vunpack.i.h.bf16 %v4451_v12 }
 0x2ad   : > { %v2514_v29 = vsel %vm2489_vm5, %v2481_v48, %v4442_v35  ;;  %v2515_v38 = vsel %vm2489_vm5, %v2482_v3, %v4443_v45 }
 0x2ae   : > { %v4446_v17 = vpop.permute.xlu1 %4445  ;;  %v2547_v36 = vsel %vm2522_vm6, %v2514_v29, %v4452_v14  ;;  %v2548_v21 = vsel %vm2522_vm6, %v2515_v38, %v4453_v55 }
 0x2af   : > { %v4456_v0 = vpop.permute.xlu0 %4455  ;;  %2829 = vmatmul.mubr.f32.gmra.mrb[44].mxu1 %v2547_v36  ;;  %v4447_v57 = vunpack.i.l.bf16 %v4446_v17 }
 0x2b0   : > { %3593 = vmatprep.mubr.msk.f32.mxu1 %vm985_vm1, %v5954_v13  ;;  %v4457_v5 = vunpack.i.l.bf16 %v4456_v0  ;;  %v4448_v13 = vunpack.i.h.bf16 %v4446_v17  ;;  %v4458_v34 = vunpack.i.h.bf16 %v4456_v0 }
 0x2b1   : > { %v2418_v50 = vsel %vm2391_vm3, %v2385_v60, %v4447_v57 }
 0x2b2   : > { %v4461_v49 = vpop.permute.xlu1 %4460  ;;  %v2450_v59 = vsel %vm565_vm0, %v2418_v50, %v4457_v5  ;;  %v2419_v58 = vsel %vm2391_vm3, %v2386_v2, %v4448_v13 }
 0x2b3   : > { %v4466_v31 = vpop.permute.xlu0 %4465  ;;  %2834 = vmatmul.mubr.f32.gmra.mrb[46].mxu1 %v2548_v21  ;;  %v4462_v40 = vunpack.i.l.bf16 %v4461_v49  ;;  %v4463_v33 = vunpack.i.h.bf16 %v4461_v49  ;;  %v2451_v16 = vsel %vm565_vm0, %v2419_v58, %v4458_v34  ;;  %v6721_v34 = vld [vmem:[#allocation30_spill] sm:$0xff] }
 0x2b4   : > { %3594 = vmatprep.mubr.msk.f32.mxu1 %vm985_vm1, %v6008_v51  ;;  %v4467_v4 = vunpack.i.l.bf16 %v4466_v31  ;;  %v4468_v22 = vunpack.i.h.bf16 %v4466_v31 }
 0x2b5   : > { %v2483_v51 = vsel %vm2456_vm4, %v2450_v59, %v4462_v40  ;;  %v2484_v1 = vsel %vm2456_vm4, %v2451_v16, %v4463_v33 }
 0x2b6   : > { %v4471_v63 = vpop.permute.xlu1 %4470  ;;  %v2354_v27 = vsel %vm985_vm1, %v5901_v41, %v4467_v4  ;;  %v2355_v11 = vsel %vm985_vm1, %v5898_v42, %v4468_v22  ;;  %v2965_v42 = vld [vmem:[%s6652_s7] sm:$0xff]  ;;  %v6722_v4 = vld [vmem:[#allocation29_spill] sm:$0xff] }
 0x2b7   : > { %v4476_v7 = vpop.permute.xlu0 %4475  ;;  %v4472_v25 = vunpack.i.l.bf16 %v4471_v63  ;;  %v4473_v35 = vunpack.i.h.bf16 %v4471_v63  ;;  %v3877_v57 = vpack.c.bf16 %v2966_v24, %v2965_v42 }
 0x2b8   : > { %v4477_v43 = vunpack.i.l.bf16 %v4476_v7  ;;  %v4478_v53 = vunpack.i.h.bf16 %v4476_v7 }
 0x2b9   : > { %v2387_v48 = vsel %vm2358_vm15, %v2354_v27, %v4472_v25  ;;  %v2388_v55 = vsel %vm2358_vm15, %v2355_v11, %v4473_v35  ;;  %3878 = vmatprep.subr.bf16.mxu0 %v3877_v57 }
 0x2ba   : > { %v4486_v26 = vpop.permute.xlu1 %4485  ;;  %v2516_v54 = vsel %vm2489_vm5, %v2483_v51, %v4477_v43  ;;  %v2517_v39 = vsel %vm2489_vm5, %v2484_v1, %v4478_v53  ;;  %3880 = vmatpush3.bf16.msra.mxu0 %v3877_v57  ;;  %v2323_v51 = vsel %vm1645_vm12, %v2321_v19, %v2322_v15 }
 0x2bb   : > { %v4487_v6 = vunpack.i.l.bf16 %v4486_v26  ;;  %v4481_v30 = vpop.permute.xlu0 %4480  ;;  %v4488_v56 = vunpack.i.h.bf16 %v4486_v26 }
 0x2bc   : > { %v4482_v37 = vunpack.i.l.bf16 %v4481_v30  ;;  %v4483_v23 = vunpack.i.h.bf16 %v4481_v30 }
 0x2bd   : > { %v2549_v46 = vsel %vm2522_vm6, %v2516_v54, %v4487_v6  ;;  %v2550_v12 = vsel %vm2522_vm6, %v2517_v39, %v4488_v56  ;;  %v2324_v6 = vrot.slane %v6081_v62, 2 }
 0x2be   : > { %v4491_v18 = vpop.permute.xlu1 %4490  ;;  %2839 = vmatmul.mubr.f32.gmra.mrb[48].mxu1 %v2549_v46  ;;  %v2420_v29 = vsel %vm2391_vm3, %v2387_v48, %v4482_v37  ;;  %v2421_v17 = vsel %vm2391_vm3, %v2388_v55, %v4483_v23  ;;  %v6723_v46 = vld [vmem:[#allocation25_spill] sm:$0xff] }
 0x2bf   : > { %3595 = vmatprep.mubr.msk.f32.mxu1 %vm985_vm1, %v6011_v10  ;;  %v4496_v8 = vpop.permute.xlu0 %4495  ;;  %v4492_v45 = vunpack.i.l.bf16 %v4491_v18  ;;  %v4493_v36 = vunpack.i.h.bf16 %v4491_v18  ;;  %v2325_v62 = vsel %vm1645_vm12, %v2322_v15, %v2324_v6  ;;  %v6345_v15 = vld [vmem:[%s6651_s6] ss:$0 sm:$0xff] }
 0x2c0   : > { %v4497_v41 = vunpack.i.l.bf16 %v4496_v8  ;;  %v4498_v38 = vunpack.i.h.bf16 %v4496_v8 }
 0x2c1   : > { %v2453_v40 = vsel %vm565_vm0, %v2421_v17, %v4493_v36 }
 0x2c2   : > { %v4501_v14 = vpop.permute.xlu1 %4500  ;;  %2844 = vmatmul.mubr.f32.gmra.mrb[50].mxu1 %v2550_v12  ;;  %v2486_v20 = vsel %vm2456_vm4, %v2453_v40, %v4498_v38 }
 0x2c3   : > { %3596 = vmatprep.mubr.msk.f32.mxu1 %vm985_vm1, %v6098_v32  ;;  %v4506_v10 = vpop.permute.xlu0 %4505  ;;  %v2452_v32 = vsel %vm565_vm0, %v2420_v29, %v4492_v45  ;;  %v4502_v0 = vunpack.i.l.bf16 %v4501_v14  ;;  %v4503_v47 = vunpack.i.h.bf16 %v4501_v14 }
 0x2c4   : > { %v4507_v5 = vunpack.i.l.bf16 %v4506_v10  ;;  %v2485_v21 = vsel %vm2456_vm4, %v2452_v32, %v4497_v41  ;;  %v4508_v43 = vunpack.i.h.bf16 %v4506_v10 }
 0x2c5   : > { %v2356_v59 = vsel %vm985_vm1, %v6721_v34, %v4502_v0  ;;  %v2357_v56 = vsel %vm985_vm1, %v6722_v4, %v4503_v47 }
 0x2c6   : > { %v4511_v44 = vpop.permute.xlu1 %4510  ;;  %v2389_v7 = vsel %vm2358_vm15, %v2356_v59, %v4507_v5  ;;  %v2390_v22 = vsel %vm2358_vm15, %v2357_v56, %v4508_v43 }
 0x2c7   : > { %v4512_v28 = vunpack.i.l.bf16 %v4511_v44  ;;  %v4521_v3 = vpop.permute.xlu0 %4520  ;;  %v4513_v52 = vunpack.i.h.bf16 %v4511_v44 }
 0x2c8   : > { %v4522_v49 = vunpack.i.l.bf16 %v4521_v3  ;;  %v4523_v60 = vunpack.i.h.bf16 %v4521_v3 }
 0x2c9   : > { %v2518_v31 = vsel %vm2489_vm5, %v2485_v21, %v4512_v28  ;;  %v2519_v33 = vsel %vm2489_vm5, %v2486_v20, %v4513_v52 }
 0x2ca   : > { %v4516_v13 = vpop.permute.xlu1 %4515  ;;  %v2551_v50 = vsel %vm2522_vm6, %v2518_v31, %v4522_v49  ;;  %v2552_v54 = vsel %vm2522_vm6, %v2519_v33, %v4523_v60 }
 0x2cb   : > { %v4517_v63 = vunpack.i.l.bf16 %v4516_v13  ;;  %v4526_v9 = vpop.permute.xlu0 %4525  ;;  %2849 = vmatmul.mubr.f32.gmra.mrb[52].mxu1 %v2551_v50  ;;  %v4518_v16 = vunpack.i.h.bf16 %v4516_v13 }
 0x2cc   : > { %v4527_v2 = vunpack.i.l.bf16 %v4526_v9  ;;  %3597 = vmatprep.mubr.msk.f32.mxu1 %vm985_vm1, %v6108_v61  ;;  %v4528_v30 = vunpack.i.h.bf16 %v4526_v9 }
 0x2cd   : > { %v2422_v58 = vsel %vm2391_vm3, %v2389_v7, %v4517_v63  ;;  %v2423_v39 = vsel %vm2391_vm3, %v2390_v22, %v4518_v16  ;;  %v6724_v63 = vld [vmem:[#allocation22_spill] sm:$0xff] }
 0x2ce   : > { %v2087_v53 = vpop.permute.xlu1 %2086  ;;  %v2454_v26 = vsel %vm565_vm0, %v2422_v58, %v4527_v2  ;;  %v2455_v8 = vsel %vm565_vm0, %v2423_v39, %v4528_v30 }
 0x2cf   : > { %v2487_v61 = vsel %vm2456_vm4, %v2454_v26, %v2087_v53  ;;  %2854 = vmatmul.mubr.f32.gmra.mrb[54].mxu1 %v2552_v54  ;;  %v2089_v18 = vpop.permute.xlu0 %2088 }
 0x2d0   : > { %3598 = vmatprep.mubr.msk.f32.mxu1 %vm985_vm1, %v2323_v51  ;;  %v2520_v1 = vsel %vm2489_vm5, %v2487_v61, %v6723_v46  ;;  %v2488_v35 = vsel %vm2456_vm4, %v2455_v8, %v2089_v18 }
 0x2d2   : > { %v2286_v25 = vpop.permute.xlu1 %2285 }
 0x2d3   : > { %v2553_v27 = vsel %vm2522_vm6, %v2520_v1, %v2286_v25  ;;  %v2288_v37 = vpop.permute.xlu0 %2287 }
 0x2d4   : > { %2859 = vmatmul.mubr.f32.gmra.mrb[56].mxu1 %v2553_v27 }
 0x2d5   : > { %3599 = vmatprep.mubr.msk.f32.mxu1 %vm985_vm1, %v2325_v62 }
 0x2d6   : > { %v2186_v12 = vpop.permute.xlu1 %2185 }
 0x2d7   : > { %v2521_v11 = vsel %vm2489_vm5, %v2488_v35, %v2186_v12 }
 0x2d8   : > { %v2554_v23 = vsel %vm2522_vm6, %v2521_v11, %v2288_v37 }
 0x2d9   : > { %2864 = vmatmul.mubr.f32.gmra.mrb[58].mxu1 %v2554_v23 }
 0x2da   : > { %v2720_v14 = vpop.f32.mrb[0].mxu1 }
 0x2db   : > { %v2722_v48 = vpop.f32.mrb[1].mxu1  ;;  %v2721_v59 = vadd.f32 %v6345_v15, %v2720_v14 }
 0x2dd   : > { %v2903_v51 = vmul.f32 %v2721_v59, %v6724_v63  ;;  %vm2871_vm9 = vcmp.gt.f32.partialorder %v2721_v59, 0.0 }
 0x2de   : > { %v2725_v45 = vpop.f32.mrb[2].mxu1 }
 0x2df   : > { %v2727_v10 = vpop.f32.mrb[3].mxu1  ;;  %v2726_v2 = vadd.f32 %v6345_v15, %v2725_v45  ;;  %v2935_v4 = vsel %vm2871_vm9, %v2721_v59, %v2903_v51 }
 0x2e1   : > { %v2904_v26 = vmul.f32 %v2726_v2, %v6724_v63  ;;  %vm2872_vm7 = vcmp.gt.f32.partialorder %v2726_v2, 0.0 }
 0x2e3   : > { %v2936_v1 = vsel %vm2872_vm7, %v2726_v2, %v2904_v26 }
 0x2e9   : > { %v2730_v29 = vpop.f32.mrb[4].mxu1 }
 0x2ea   : > { %v2732_v41 = vpop.f32.mrb[5].mxu1  ;;  %v2731_v16 = vadd.f32 %v6345_v15, %v2730_v29 }
 0x2ec   : > { %v2905_v30 = vmul.f32 %v2731_v16, %v6724_v63  ;;  %vm2873_vm8 = vcmp.gt.f32.partialorder %v2731_v16, 0.0 }
 0x2ed   : > { %v2735_v55 = vpop.f32.mrb[6].mxu1 }
 0x2ee   : > { %v2737_v17 = vpop.f32.mrb[7].mxu1  ;;  %v2736_v54 = vadd.f32 %v6345_v15, %v2735_v55  ;;  %v2937_v25 = vsel %vm2873_vm8, %v2731_v16, %v2905_v30 }
 0x2f0   : > { %v2906_v56 = vmul.f32 %v2736_v54, %v6724_v63  ;;  %vm2874_vm10 = vcmp.gt.f32.partialorder %v2736_v54, 0.0 }
 0x2f2   : > { %v2938_v37 = vsel %vm2874_vm10, %v2736_v54, %v2906_v56 }
 0x2f6   : > { %v2740_v36 = vpop.f32.mrb[8].mxu1 }
 0x2f7   : > { %v2742_v44 = vpop.f32.mrb[9].mxu1  ;;  %v2741_v61 = vadd.f32 %v6345_v15, %v2740_v36 }
 0x2f9   : > { %v2907_v18 = vmul.f32 %v2741_v61, %v6724_v63  ;;  %vm2875_vm11 = vcmp.gt.f32.partialorder %v2741_v61, 0.0 }
 0x2fa   : > { %v2745_v42 = vpop.f32.mrb[10].mxu1 }
 0x2fb   : > { %v2747_v24 = vpop.f32.mrb[11].mxu1  ;;  %v2746_v46 = vadd.f32 %v6345_v15, %v2745_v42  ;;  %v2939_v23 = vsel %vm2875_vm11, %v2741_v61, %v2907_v18 }
 0x2fd   : > { %v2908_v8 = vmul.f32 %v2746_v46, %v6724_v63  ;;  %vm2876_vm13 = vcmp.gt.f32.partialorder %v2746_v46, 0.0 }
 0x2ff   : > { %v2940_v10 = vsel %vm2876_vm13, %v2746_v46, %v2908_v8 }
 0x305   : > { %v2750_v32 = vpop.f32.mrb[12].mxu1 }
 0x306   : > { %v2752_v0 = vpop.f32.mrb[13].mxu1  ;;  %v2751_v39 = vadd.f32 %v6345_v15, %v2750_v32 }
 0x308   : > { %v2909_v12 = vmul.f32 %v2751_v39, %v6724_v63  ;;  %vm2877_vm14 = vcmp.gt.f32.partialorder %v2751_v39, 0.0 }
 0x309   : > { %v2755_v28 = vpop.f32.mrb[14].mxu1 }
 0x30a   : > { %v2757_v3 = vpop.f32.mrb[15].mxu1  ;;  %v2756_v27 = vadd.f32 %v6345_v15, %v2755_v28  ;;  %v2941_v55 = vsel %vm2877_vm14, %v2751_v39, %v2909_v12 }
 0x30c   : > { %v2910_v48 = vmul.f32 %v2756_v27, %v6724_v63  ;;  %vm2878_vm15 = vcmp.gt.f32.partialorder %v2756_v27, 0.0 }
 0x30e   : > { %v2942_v44 = vsel %vm2878_vm15, %v2756_v27, %v2910_v48 }
 0x312   : > { %v2760_v57 = vpop.f32.mrb[16].mxu1 }
 0x313   : > { %v2762_v38 = vpop.f32.mrb[17].mxu1  ;;  %v2761_v11 = vadd.f32 %v6345_v15, %v2760_v57 }
 0x315   : > { %v2911_v29 = vmul.f32 %v2761_v11, %v6724_v63  ;;  %vm2879_vm3 = vcmp.gt.f32.partialorder %v2761_v11, 0.0 }
 0x316   : > { %v6336_v5 = vpop.f32.mrb[18].mxu1 }
 0x317   : > { %v2767_v49 = vpop.f32.mrb[19].mxu1  ;;  %v2766_v45 = vadd.f32 %v6345_v15, %v6336_v5  ;;  %v2943_v32 = vsel %vm2879_vm3, %v2761_v11, %v2911_v29 }
 0x319   : > { %v2912_v17 = vmul.f32 %v2766_v45, %v6724_v63  ;;  %vm2880_vm4 = vcmp.gt.f32.partialorder %v2766_v45, 0.0 }
 0x31b   : > { %v2944_v38 = vsel %vm2880_vm4, %v2766_v45, %v2912_v17 }
 0x327   : > { %v6338_v21 = vpop.f32.mrb[20].mxu1 }
 0x328   : > { %v2772_v19 = vpop.f32.mrb[21].mxu1  ;;  %v2771_v41 = vadd.f32 %v6345_v15, %v6338_v21 }
 0x32a   : > { %v2913_v42 = vmul.f32 %v2771_v41, %v6724_v63  ;;  %vm2881_vm5 = vcmp.gt.f32.partialorder %v2771_v41, 0.0 }
 0x32b   : > { %v6340_v52 = vpop.f32.mrb[22].mxu1 }
 0x32c   : > { %v2777_v31 = vpop.f32.mrb[23].mxu1  ;;  %v2776_v36 = vadd.f32 %v6345_v15, %v6340_v52  ;;  %v2945_v21 = vsel %vm2881_vm5, %v2771_v41, %v2913_v42 }
 0x32e   : > { %v2914_v28 = vmul.f32 %v2776_v36, %v6724_v63  ;;  %vm2882_vm6 = vcmp.gt.f32.partialorder %v2776_v36, 0.0 }
 0x33d   : > { %v2710_v60 = vpop.f32.mrb[32].mxu0  ;;  %v6347_v13 = vpop.f32.mrb[24].mxu1 }
 0x33e   : > { %v2711_v50 = vadd.f32 %v6345_v15, %v2710_v60  ;;  %v2712_v40 = vpop.f32.mrb[33].mxu0  ;;  %v2782_v34 = vpop.f32.mrb[25].mxu1  ;;  %v2781_v24 = vadd.f32 %v6345_v15, %v6347_v13  ;;  %v2946_v13 = vsel %vm2882_vm6, %v2776_v36, %v2914_v28 }
 0x340   : > { %vm2869_vm2 = vcmp.gt.f32.partialorder %v2711_v50, 0.0  ;;  %v2901_v9 = vmul.f32 %v2711_v50, %v6724_v63  ;;  %v2915_v5 = vmul.f32 %v2781_v24, %v6724_v63 }
 0x341   : > { %v2715_v47 = vpop.f32.mrb[34].mxu0  ;;  %v6352_v7 = vpop.f32.mrb[26].mxu1 }
 0x342   : > { %v2716_v20 = vadd.f32 %v6345_v15, %v2715_v47  ;;  %v2717_v43 = vpop.f32.mrb[35].mxu0  ;;  %v2787_v58 = vpop.f32.mrb[27].mxu1  ;;  %v2933_v33 = vsel %vm2869_vm2, %v2711_v50, %v2901_v9  ;;  %v2786_v3 = vadd.f32 %v6345_v15, %v6352_v7  ;;  %vm2883_vm2 = vcmp.gt.f32.partialorder %v2781_v24, 0.0 }
 0x343   : > { %3786 = vmatprep.mubr.msk.f32.mxu0 %vm985_vm1, %v2933_v33  ;;  %v2947_v34 = vsel %vm2883_vm2, %v2781_v24, %v2915_v5 }
 0x344   : > { %vm2870_vm12 = vcmp.gt.f32.partialorder %v2716_v20, 0.0  ;;  %v2902_v53 = vmul.f32 %v2716_v20, %v6724_v63  ;;  %v2916_v52 = vmul.f32 %v2786_v3, %v6724_v63  ;;  %vm2884_vm9 = vcmp.gt.f32.partialorder %v2786_v3, 0.0 }
 0x346   : > { %v2934_v6 = vsel %vm2870_vm12, %v2716_v20, %v2902_v53  ;;  %v2948_v47 = vsel %vm2884_vm9, %v2786_v3, %v2916_v52 }
 0x347   : > { %3787 = vmatmul.mubr.msk.f32.vlgmr.msra.gmra.mrb[36].mxu0 %vm985_vm1, %v2934_v6 }
 0x348   : > { %3789 = vmatprep.mubr.msk.f32.mxu0 %vm985_vm1, %v2935_v4 }
 0x34a   : > { %v2790_v22 = vpop.f32.mrb[28].mxu1 }
 0x34b   : > { %3790 = vmatmul.mubr.msk.f32.gmra.mrb[38].mxu0 %vm985_vm1, %v2936_v1  ;;  %v2792_v62 = vpop.f32.mrb[29].mxu1  ;;  %v2791_v49 = vadd.f32 %v6345_v15, %v2790_v22 }
 0x34c   : > { %3792 = vmatprep.mubr.msk.f32.mxu0 %vm985_vm1, %v2937_v25 }
 0x34d   : > { %v2917_v50 = vmul.f32 %v2791_v49, %v6724_v63  ;;  %vm2885_vm12 = vcmp.gt.f32.partialorder %v2791_v49, 0.0 }
 0x34e   : > { %v2795_v35 = vpop.f32.mrb[30].mxu1 }
 0x34f   : > { %3793 = vmatmul.mubr.msk.f32.gmra.mrb[40].mxu0 %vm985_vm1, %v2938_v37  ;;  %v2797_v14 = vpop.f32.mrb[31].mxu1  ;;  %v2796_v31 = vadd.f32 %v6345_v15, %v2795_v35  ;;  %v2949_v2 = vsel %vm2885_vm12, %v2791_v49, %v2917_v50 }
 0x350   : > { %3795 = vmatprep.mubr.msk.f32.mxu0 %vm985_vm1, %v2939_v23 }
 0x351   : > { %v2918_v59 = vmul.f32 %v2796_v31, %v6724_v63  ;;  %vm2886_vm7 = vcmp.gt.f32.partialorder %v2796_v31, 0.0 }
 0x353   : > { %3796 = vmatmul.mubr.msk.f32.gmra.mrb[42].mxu0 %vm985_vm1, %v2940_v10  ;;  %v2950_v43 = vsel %vm2886_vm7, %v2796_v31, %v2918_v59 }
 0x354   : > { %3798 = vmatprep.mubr.msk.f32.mxu0 %vm985_vm1, %v2941_v55 }
 0x357   : > { %3799 = vmatmul.mubr.msk.f32.gmra.mrb[44].mxu0 %vm985_vm1, %v2942_v44 }
 0x358   : > { %3801 = vmatprep.mubr.msk.f32.mxu0 %vm985_vm1, %v2943_v32 }
 0x359   : > { %v2800_v0 = vpop.f32.mrb[32].mxu1 }
 0x35a   : > { %v2802_v57 = vpop.f32.mrb[33].mxu1  ;;  %v2801_v40 = vadd.f32 %v6345_v15, %v2800_v0 }
 0x35b   : > { %3802 = vmatmul.mubr.msk.f32.gmra.mrb[46].mxu0 %vm985_vm1, %v2944_v38 }
 0x35c   : > { %3804 = vmatprep.mubr.msk.f32.mxu0 %vm985_vm1, %v2945_v21  ;;  %v2919_v7 = vmul.f32 %v2801_v40, %v6724_v63  ;;  %vm2887_vm8 = vcmp.gt.f32.partialorder %v2801_v40, 0.0 }
 0x35d   : > { %v2805_v19 = vpop.f32.mrb[34].mxu1 }
 0x35e   : > { %v2807_v60 = vpop.f32.mrb[35].mxu1  ;;  %v2806_v9 = vadd.f32 %v6345_v15, %v2805_v19  ;;  %v2951_v51 = vsel %vm2887_vm8, %v2801_v40, %v2919_v7 }
 0x35f   : > { %3805 = vmatmul.mubr.msk.f32.gmra.mrb[48].mxu0 %vm985_vm1, %v2946_v13 }
 0x360   : > { %3807 = vmatprep.mubr.msk.f32.mxu0 %vm985_vm1, %v2947_v34  ;;  %v2920_v20 = vmul.f32 %v2806_v9, %v6724_v63  ;;  %vm2888_vm10 = vcmp.gt.f32.partialorder %v2806_v9, 0.0 }
 0x362   : > { %v2952_v26 = vsel %vm2888_vm10, %v2806_v9, %v2920_v20 }
 0x363   : > { %3808 = vmatmul.mubr.msk.f32.gmra.mrb[50].mxu0 %vm985_vm1, %v2948_v47 }
 0x364   : > { %3810 = vmatprep.mubr.msk.f32.mxu0 %vm985_vm1, %v2949_v2 }
 0x366   : > { %v2810_v58 = vpop.f32.mrb[36].mxu1 }
 0x367   : > { %3811 = vmatmul.mubr.msk.f32.gmra.mrb[52].mxu0 %vm985_vm1, %v2950_v43  ;;  %v2811_v33 = vadd.f32 %v6345_v15, %v2810_v58  ;;  %v2812_v16 = vpop.f32.mrb[37].mxu1  ;;  %v6455_v58 = vld [vmem:[%s6653_s8] ss:$0 sm:$0xff] }
 0x368   : > { %3813 = vmatprep.mubr.msk.f32.mxu0 %vm985_vm1, %v2951_v51 }
 0x369   : > { %vm2889_vm11 = vcmp.gt.f32.partialorder %v2811_v33, 0.0  ;;  %v2921_v53 = vmul.f32 %v2811_v33, %v6724_v63 }
 0x36a   : > { %v2815_v54 = vpop.f32.mrb[38].mxu1 }
 0x36b   : > { %3814 = vmatmul.mubr.msk.f32.gmra.mrb[54].mxu0 %vm985_vm1, %v2952_v26  ;;  %v2816_v6 = vadd.f32 %v6345_v15, %v2815_v54  ;;  %v2817_v30 = vpop.f32.mrb[39].mxu1  ;;  %v2953_v61 = vsel %vm2889_vm11, %v2811_v33, %v2921_v53  ;;  %v4529_v53 = vld [vmem:[%s5030_s23 + $0x8] sm:$0xff]  ;;  %v4530_v54 = vld [vmem:[%s5030_s23] sm:$0xff] }
 0x36c   : > { %3816 = vmatprep.mubr.msk.f32.mxu0 %vm985_vm1, %v2953_v61 }
 0x36d   : > { %vm2890_vm13 = vcmp.gt.f32.partialorder %v2816_v6, 0.0  ;;  %v2922_v4 = vmul.f32 %v2816_v6, %v6724_v63 }
 0x36f   : > { %v2954_v56 = vsel %vm2890_vm13, %v2816_v6, %v2922_v4 }
 0x370   : > { %3817 = vmatmul.mubr.msk.f32.gmra.mrb[56].mxu0 %vm985_vm1, %v2954_v56  ;;  %v4531_v56 = vld [vmem:[%s5030_s23 + $0x18] sm:$0xff] }
 0x375   : > { %v2820_v46 = vpop.f32.mrb[40].mxu1 }
 0x376   : > { %v2821_v1 = vadd.f32 %v6345_v15, %v2820_v46  ;;  %v2822_v22 = vpop.f32.mrb[41].mxu1 }
 0x378   : > { %vm2891_vm14 = vcmp.gt.f32.partialorder %v2821_v1, 0.0  ;;  %v2923_v18 = vmul.f32 %v2821_v1, %v6724_v63 }
 0x379   : > { %v2825_v39 = vpop.f32.mrb[42].mxu1 }
 0x37a   : > { %v2826_v25 = vadd.f32 %v6345_v15, %v2825_v39  ;;  %v2827_v62 = vpop.f32.mrb[43].mxu1  ;;  %v2955_v8 = vsel %vm2891_vm14, %v2821_v1, %v2923_v18  ;;  %v4532_v1 = vld [vmem:[%s5030_s23 + $0x10] sm:$0xff] }
 0x37b   : > { %3819 = vmatprep.mubr.msk.f32.mxu0 %vm985_vm1, %v2955_v8  ;;  %v4533_v8 = vld [vmem:[%s5030_s23 + $0x28] sm:$0xff] }
 0x37c   : > { %vm2892_vm15 = vcmp.gt.f32.partialorder %v2826_v25, 0.0  ;;  %v2924_v27 = vmul.f32 %v2826_v25, %v6724_v63 }
 0x37e   : > { %v2956_v37 = vsel %vm2892_vm15, %v2826_v25, %v2924_v27 }
 0x37f   : > { %3820 = vmatmul.mubr.msk.f32.gmra.mrb[58].mxu0 %vm985_vm1, %v2956_v37  ;;  %v4534_v37 = vld [vmem:[%s5030_s23 + $0x20] sm:$0xff] }
 0x382   : > { %v2830_v35 = vpop.f32.mrb[44].mxu1 }
 0x383   : > { %v2831_v12 = vadd.f32 %v6345_v15, %v2830_v35  ;;  %v2832_v11 = vpop.f32.mrb[45].mxu1 }
 0x385   : > { %vm2893_vm3 = vcmp.gt.f32.partialorder %v2831_v12, 0.0  ;;  %v2925_v23 = vmul.f32 %v2831_v12, %v6724_v63 }
 0x386   : > { %v2835_v14 = vpop.f32.mrb[46].mxu1 }
 0x387   : > { %v2836_v48 = vadd.f32 %v6345_v15, %v2835_v14  ;;  %v2837_v45 = vpop.f32.mrb[47].mxu1  ;;  %v2957_v10 = vsel %vm2893_vm3, %v2831_v12, %v2925_v23 }
 0x388   : > { %3822 = vmatprep.mubr.msk.f32.mxu0 %vm985_vm1, %v2957_v10  ;;  %v4536_v10 = vld [vmem:[%s5030_s23 + $0x30] sm:$0xff] }
 0x389   : > { %vm2894_vm4 = vcmp.gt.f32.partialorder %v2836_v48, 0.0  ;;  %v2926_v29 = vmul.f32 %v2836_v48, %v6724_v63 }
 0x38b   : > { %v2958_v41 = vsel %vm2894_vm4, %v2836_v48, %v2926_v29  ;;  %v4535_v48 = vld [vmem:[%s5030_s23 + $0x38] sm:$0xff] }
 0x38c   : > { %3823 = vmatmul.mubr.msk.f32.gmra.mrb[60].mxu0 %vm985_vm1, %v2958_v41 }
 0x391   : > { %v2840_v55 = vpop.f32.mrb[48].mxu1 }
 0x392   : > { %v2841_v17 = vadd.f32 %v6345_v15, %v2840_v55  ;;  %v2842_v36 = vpop.f32.mrb[49].mxu1 }
 0x394   : > { %vm2895_vm5 = vcmp.gt.f32.partialorder %v2841_v17, 0.0  ;;  %v2927_v44 = vmul.f32 %v2841_v17, %v6724_v63 }
 0x395   : > { %v2845_v42 = vpop.f32.mrb[50].mxu1 }
 0x396   : > { %v2846_v24 = vadd.f32 %v6345_v15, %v2845_v42  ;;  %v2847_v32 = vpop.f32.mrb[51].mxu1  ;;  %v2959_v0 = vsel %vm2895_vm5, %v2841_v17, %v2927_v44  ;;  %v4537_v44 = vld [vmem:[%s5030_s23 + $0x48] sm:$0xff] }
 0x397   : > { %3825 = vmatprep.mubr.msk.f32.mxu0 %vm985_vm1, %v2959_v0 }
 0x398   : > { %vm2896_vm6 = vcmp.gt.f32.partialorder %v2846_v24, 0.0  ;;  %v2928_v28 = vmul.f32 %v2846_v24, %v6724_v63 }
 0x39a   : > { %v2960_v3 = vsel %vm2896_vm6, %v2846_v24, %v2928_v28  ;;  %v4538_v24 = vld [vmem:[%s5030_s23 + $0x40] sm:$0xff] }
 0x39b   : > { %3826 = vmatmul.mubr.msk.f32.gmra.mrb[62].mxu0 %vm985_vm1, %v2960_v3 }
 0x39e   : > { %v2850_v57 = vpop.f32.mrb[52].mxu1 }
 0x39f   : > { %v2851_v38 = vadd.f32 %v6345_v15, %v2850_v57  ;;  %v2852_v5 = vpop.f32.mrb[53].mxu1 }
 0x3a1   : > { %vm2897_vm2 = vcmp.gt.f32.partialorder %v2851_v38, 0.0  ;;  %v2929_v49 = vmul.f32 %v2851_v38, %v6724_v63 }
 0x3a2   : > { %v2855_v21 = vpop.f32.mrb[54].mxu1 }
 0x3a3   : > { %v2856_v19 = vadd.f32 %v6345_v15, %v2855_v21  ;;  %v2857_v52 = vpop.f32.mrb[55].mxu1  ;;  %v2961_v31 = vsel %vm2897_vm2, %v2851_v38, %v2929_v49  ;;  %v4539_v38 = vld [vmem:[%s5030_s23 + $0x58] sm:$0xff]  ;;  %v4540_v49 = vld [vmem:[%s5030_s23 + $0x50] sm:$0xff] }
 0x3a4   : > { %3828 = vmatprep.mubr.msk.f32.mxu0 %vm985_vm1, %v2961_v31 }
 0x3a5   : > { %vm2898_vm9 = vcmp.gt.f32.partialorder %v2856_v19, 0.0  ;;  %v2930_v60 = vmul.f32 %v2856_v19, %v6724_v63 }
 0x3a7   : > { %v2860_v13 = vpop.f32.mrb[56].mxu1  ;;  %v2962_v50 = vsel %vm2898_vm9, %v2856_v19, %v2930_v60 }
 0x3a8   : > { %v2861_v40 = vadd.f32 %v6345_v15, %v2860_v13  ;;  %v2862_v34 = vpop.f32.mrb[57].mxu1  ;;  %3829 = vmatmul.mubr.msk.f32.gmra.mrb[64].mxu0 %vm985_vm1, %v2962_v50  ;;  %v4541_v13 = vld [vmem:[%s5030_s23 + $0x68] sm:$0xff] }
 0x3aa   : > { %vm2899_vm12 = vcmp.gt.f32.partialorder %v2861_v40, 0.0  ;;  %v2931_v59 = vmul.f32 %v2861_v40, %v6724_v63 }
 0x3ac   : > { %v2865_v9 = vpop.f32.mrb[58].mxu1  ;;  %v2963_v47 = vsel %vm2899_vm12, %v2861_v40, %v2931_v59  ;;  %v4542_v40 = vld [vmem:[%s5030_s23 + $0x60] sm:$0xff] }
 0x3ad   : > { %v2866_v7 = vadd.f32 %v6345_v15, %v2865_v9  ;;  %v2867_v2 = vpop.f32.mrb[59].mxu1  ;;  %3831 = vmatprep.mubr.msk.f32.mxu0 %vm985_vm1, %v2963_v47 }
 0x3ae   : > { %v4543_v2 = vld [vmem:[%s5030_s23 + $0x78] sm:$0xff] }
 0x3af   : > { %vm2900_vm7 = vcmp.gt.f32.partialorder %v2866_v7, 0.0  ;;  %v2932_v20 = vmul.f32 %v2866_v7, %v6724_v63 }
 0x3b1   : > { %v2964_v43 = vsel %vm2900_vm7, %v2866_v7, %v2932_v20 }
 0x3b2   : > { %3832 = vmatmul.mubr.msk.f32.gmra.mrb[66].mxu0 %vm985_vm1, %v2964_v43  ;;  %v4544_v43 = vld [vmem:[%s5030_s23 + $0x70] sm:$0xff] }
 0x41a   : > { %v3788_v33 = vpop.f32.mrb[36].mxu0 }
 0x41b   : > { %v3142_v51 = vadd.f32 %v3788_v33, %v6455_v58  ;;  %v3136_v15 = vpop.f32.mrb[37].mxu0 }
 0x41c   : > { %v3137_v16 = vadd.f32 %v6455_v58, %v3136_v15 }
 0x41d   : > { %v3296_v26 = vadd.f32 %v4529_v53, %v3142_v51 }
 0x41e   : > { %v3295_v63 = vadd.f32 %v4530_v54, %v3137_v16  ;;  %v3791_v6 = vpop.f32.mrb[38].mxu0 }
 0x41f   : > { %3328 = vst.msk [vmem:[%s6463_s27 + $0x8] sm:$0xff] %vm565_vm0, %v3296_v26  ;;  %v3152_v30 = vadd.f32 %v3791_v6, %v6455_v58  ;;  %v3146_v61 = vpop.f32.mrb[39].mxu0  ;;  %v4545_v26 = vld [vmem:[%s5030_s23 + $0x88] sm:$0xff] }
 0x420   : > { %3327 = vst.msk [vmem:[%s6463_s27] sm:$0xff] %vm565_vm0, %v3295_v63  ;;  %v3147_v4 = vadd.f32 %v6455_v58, %v3146_v61  ;;  %v4546_v63 = vld [vmem:[%s5030_s23 + $0x80] sm:$0xff] }
 0x421   : > { %v3298_v46 = vadd.f32 %v4531_v56, %v3152_v30 }
 0x422   : > { %v3297_v22 = vadd.f32 %v4532_v1, %v3147_v4  ;;  %v3794_v18 = vpop.f32.mrb[40].mxu0 }
 0x423   : > { %3330 = vst.msk [vmem:[%s6463_s27 + $0x18] sm:$0xff] %vm565_vm0, %v3298_v46  ;;  %v3162_v39 = vadd.f32 %v3794_v18, %v6455_v58  ;;  %v3156_v25 = vpop.f32.mrb[41].mxu0  ;;  %v4547_v46 = vld [vmem:[%s5030_s23 + $0x98] sm:$0xff] }
 0x424   : > { %3329 = vst.msk [vmem:[%s6463_s27 + $0x10] sm:$0xff] %vm565_vm0, %v3297_v22  ;;  %v3157_v62 = vadd.f32 %v6455_v58, %v3156_v25  ;;  %v4548_v22 = vld [vmem:[%s5030_s23 + $0x90] sm:$0xff] }
 0x425   : > { %v3300_v27 = vadd.f32 %v4533_v8, %v3162_v39 }
 0x426   : > { %v3299_v35 = vadd.f32 %v4534_v37, %v3157_v62  ;;  %v3797_v12 = vpop.f32.mrb[42].mxu0 }
 0x427   : > { %3332 = vst.msk [vmem:[%s6463_s27 + $0x28] sm:$0xff] %vm565_vm0, %v3300_v27  ;;  %v3172_v11 = vadd.f32 %v3797_v12, %v6455_v58  ;;  %v3166_v23 = vpop.f32.mrb[43].mxu0  ;;  %v4549_v27 = vld [vmem:[%s5030_s23 + $0xa8] sm:$0xff] }
 0x428   : > { %3331 = vst.msk [vmem:[%s6463_s27 + $0x20] sm:$0xff] %vm565_vm0, %v3299_v35  ;;  %v3167_v14 = vadd.f32 %v6455_v58, %v3166_v23  ;;  %v4550_v35 = vld [vmem:[%s5030_s23 + $0xa0] sm:$0xff] }
 0x429   : > { %v3302_v45 = vadd.f32 %v4535_v48, %v3172_v11 }
 0x42a   : > { %v3301_v29 = vadd.f32 %v4536_v10, %v3167_v14  ;;  %v3800_v41 = vpop.f32.mrb[44].mxu0 }
 0x42b   : > { %3334 = vst.msk [vmem:[%s6463_s27 + $0x38] sm:$0xff] %vm565_vm0, %v3302_v45  ;;  %v3182_v55 = vadd.f32 %v3800_v41, %v6455_v58  ;;  %v3176_v17 = vpop.f32.mrb[45].mxu0  ;;  %v4551_v45 = vld [vmem:[%s5030_s23 + $0xb8] sm:$0xff] }
 0x42c   : > { %3333 = vst.msk [vmem:[%s6463_s27 + $0x30] sm:$0xff] %vm565_vm0, %v3301_v29  ;;  %v3177_v36 = vadd.f32 %v6455_v58, %v3176_v17  ;;  %v4552_v29 = vld [vmem:[%s5030_s23 + $0xb0] sm:$0xff] }
 0x42d   : > { %v3304_v42 = vadd.f32 %v4537_v44, %v3182_v55 }
 0x42e   : > { %v3303_v32 = vadd.f32 %v4538_v24, %v3177_v36  ;;  %v3803_v0 = vpop.f32.mrb[46].mxu0 }
 0x42f   : > { %3336 = vst.msk [vmem:[%s6463_s27 + $0x48] sm:$0xff] %vm565_vm0, %v3304_v42  ;;  %v3192_v28 = vadd.f32 %v3803_v0, %v6455_v58  ;;  %v3186_v3 = vpop.f32.mrb[47].mxu0  ;;  %v4553_v42 = vld [vmem:[%s5030_s23 + $0xc8] sm:$0xff] }
 0x430   : > { %3335 = vst.msk [vmem:[%s6463_s27 + $0x40] sm:$0xff] %vm565_vm0, %v3303_v32  ;;  %v3187_v57 = vadd.f32 %v6455_v58, %v3186_v3  ;;  %v4554_v32 = vld [vmem:[%s5030_s23 + $0xc0] sm:$0xff] }
 0x431   : > { %v3306_v5 = vadd.f32 %v4539_v38, %v3192_v28 }
 0x432   : > { %v3305_v21 = vadd.f32 %v4540_v49, %v3187_v57  ;;  %v3806_v19 = vpop.f32.mrb[48].mxu0 }
 0x433   : > { %3338 = vst.msk [vmem:[%s6463_s27 + $0x58] sm:$0xff] %vm565_vm0, %v3306_v5  ;;  %v3202_v52 = vadd.f32 %v3806_v19, %v6455_v58  ;;  %v3196_v31 = vpop.f32.mrb[49].mxu0  ;;  %v4555_v5 = vld [vmem:[%s5030_s23 + $0xd8] sm:$0xff] }
 0x434   : > { %3337 = vst.msk [vmem:[%s6463_s27 + $0x50] sm:$0xff] %vm565_vm0, %v3305_v21  ;;  %v3197_v60 = vadd.f32 %v6455_v58, %v3196_v31  ;;  %v4556_v21 = vld [vmem:[%s5030_s23 + $0xd0] sm:$0xff] }
 0x435   : > { %v3308_v50 = vadd.f32 %v4541_v13, %v3202_v52 }
 0x436   : > { %v3307_v34 = vadd.f32 %v4542_v40, %v3197_v60  ;;  %v3809_v59 = vpop.f32.mrb[50].mxu0 }
 0x437   : > { %3340 = vst.msk [vmem:[%s6463_s27 + $0x68] sm:$0xff] %vm565_vm0, %v3308_v50  ;;  %v3212_v9 = vadd.f32 %v3809_v59, %v6455_v58  ;;  %v3206_v47 = vpop.f32.mrb[51].mxu0  ;;  %v4557_v50 = vld [vmem:[%s5030_s23 + $0xe8] sm:$0xff] }
 0x438   : > { %3339 = vst.msk [vmem:[%s6463_s27 + $0x60] sm:$0xff] %vm565_vm0, %v3307_v34  ;;  %v3207_v7 = vadd.f32 %v6455_v58, %v3206_v47  ;;  %v4558_v34 = vld [vmem:[%s5030_s23 + $0xe0] sm:$0xff] }
 0x439   : > { %v3310_v20 = vadd.f32 %v4543_v2, %v3212_v9 }
 0x43a   : > { %v3309_v33 = vadd.f32 %v4544_v43, %v3207_v7  ;;  %v3812_v51 = vpop.f32.mrb[52].mxu0 }
 0x43b   : > { %3342 = vst.msk [vmem:[%s6463_s27 + $0x78] sm:$0xff] %vm565_vm0, %v3310_v20  ;;  %v3222_v15 = vadd.f32 %v3812_v51, %v6455_v58  ;;  %v3216_v16 = vpop.f32.mrb[53].mxu0  ;;  %v4559_v20 = vld [vmem:[%s5030_s23 + $0xf8] sm:$0xff] }
 0x43c   : > { %3341 = vst.msk [vmem:[%s6463_s27 + $0x70] sm:$0xff] %vm565_vm0, %v3309_v33  ;;  %v3217_v53 = vadd.f32 %v6455_v58, %v3216_v16  ;;  %v4560_v33 = vld [vmem:[%s5030_s23 + $0xf0] sm:$0xff] }
 0x43d   : > { %v3312_v54 = vadd.f32 %v4545_v26, %v3222_v15 }
 0x43e   : > { %v3311_v6 = vadd.f32 %v4546_v63, %v3217_v53  ;;  %v3815_v30 = vpop.f32.mrb[54].mxu0 }
 0x43f   : > { %3344 = vst.msk [vmem:[%s6463_s27 + $0x88] sm:$0xff] %vm565_vm0, %v3312_v54  ;;  %v3232_v61 = vadd.f32 %v3815_v30, %v6455_v58  ;;  %v3226_v4 = vpop.f32.mrb[55].mxu0 }
 0x440   : > { %3343 = vst.msk [vmem:[%s6463_s27 + $0x80] sm:$0xff] %vm565_vm0, %v3311_v6  ;;  %v3227_v56 = vadd.f32 %v6455_v58, %v3226_v4 }
 0x441   : > { %v3314_v1 = vadd.f32 %v4547_v46, %v3232_v61 }
 0x442   : > { %v3313_v18 = vadd.f32 %v4548_v22, %v3227_v56 }
 0x443   : > { %3346 = vst.msk [vmem:[%s6463_s27 + $0x98] sm:$0xff] %vm565_vm0, %v3314_v1  ;;  %v3818_v39 = vpop.f32.mrb[56].mxu0 }
 0x444   : > { %3345 = vst.msk [vmem:[%s6463_s27 + $0x90] sm:$0xff] %vm565_vm0, %v3313_v18  ;;  %v3242_v25 = vadd.f32 %v3818_v39, %v6455_v58  ;;  %v3236_v62 = vpop.f32.mrb[57].mxu0 }
 0x445   : > { %v3237_v8 = vadd.f32 %v6455_v58, %v3236_v62 }
 0x446   : > { %v3316_v37 = vadd.f32 %v4549_v27, %v3242_v25 }
 0x447   : > { %v3315_v12 = vadd.f32 %v4550_v35, %v3237_v8 }
 0x448   : > { %3348 = vst.msk [vmem:[%s6463_s27 + $0xa8] sm:$0xff] %vm565_vm0, %v3316_v37 }
 0x449   : > { %3347 = vst.msk [vmem:[%s6463_s27 + $0xa0] sm:$0xff] %vm565_vm0, %v3315_v12 }
 0x452   : > { %v3821_v11 = vpop.f32.mrb[58].mxu0 }
 0x453   : > { %v3252_v23 = vadd.f32 %v3821_v11, %v6455_v58  ;;  %v3246_v14 = vpop.f32.mrb[59].mxu0 }
 0x454   : > { %v3247_v48 = vadd.f32 %v6455_v58, %v3246_v14 }
 0x455   : > { %v3318_v10 = vadd.f32 %v4551_v45, %v3252_v23 }
 0x456   : > { %v3317_v41 = vadd.f32 %v4552_v29, %v3247_v48 }
 0x457   : > { %3350 = vst.msk [vmem:[%s6463_s27 + $0xb8] sm:$0xff] %vm565_vm0, %v3318_v10 }
 0x458   : > { %3349 = vst.msk [vmem:[%s6463_s27 + $0xb0] sm:$0xff] %vm565_vm0, %v3317_v41 }
 0x45f   : > { %v3824_v55 = vpop.f32.mrb[60].mxu0 }
 0x460   : > { %v3262_v17 = vadd.f32 %v3824_v55, %v6455_v58  ;;  %v3256_v36 = vpop.f32.mrb[61].mxu0 }
 0x461   : > { %v3257_v44 = vadd.f32 %v6455_v58, %v3256_v36 }
 0x462   : > { %v3320_v24 = vadd.f32 %v4553_v42, %v3262_v17 }
 0x463   : > { %v3319_v0 = vadd.f32 %v4554_v32, %v3257_v44 }
 0x464   : > { %3352 = vst.msk [vmem:[%s6463_s27 + $0xc8] sm:$0xff] %vm565_vm0, %v3320_v24 }
 0x465   : > { %3351 = vst.msk [vmem:[%s6463_s27 + $0xc0] sm:$0xff] %vm565_vm0, %v3319_v0 }
 0x46e   : > { %v3827_v28 = vpop.f32.mrb[62].mxu0 }
 0x46f   : > { %v3272_v3 = vadd.f32 %v3827_v28, %v6455_v58  ;;  %v3266_v57 = vpop.f32.mrb[63].mxu0 }
 0x470   : > { %v3267_v38 = vadd.f32 %v6455_v58, %v3266_v57 }
 0x471   : > { %v3322_v49 = vadd.f32 %v4555_v5, %v3272_v3 }
 0x472   : > { %v3321_v19 = vadd.f32 %v4556_v21, %v3267_v38 }
 0x473   : > { %3354 = vst.msk [vmem:[%s6463_s27 + $0xd8] sm:$0xff] %vm565_vm0, %v3322_v49 }
 0x474   : > { %3353 = vst.msk [vmem:[%s6463_s27 + $0xd0] sm:$0xff] %vm565_vm0, %v3321_v19 }
 0x47b   : > { %v3830_v52 = vpop.f32.mrb[64].mxu0 }
 0x47c   : > { %v3282_v31 = vadd.f32 %v3830_v52, %v6455_v58  ;;  %v3276_v60 = vpop.f32.mrb[65].mxu0 }
 0x47d   : > { %v3277_v13 = vadd.f32 %v6455_v58, %v3276_v60 }
 0x47e   : > { %v3324_v40 = vadd.f32 %v4557_v50, %v3282_v31 }
 0x47f   : > { %v3323_v59 = vadd.f32 %v4558_v34, %v3277_v13 }
 0x480   : > { %3356 = vst.msk [vmem:[%s6463_s27 + $0xe8] sm:$0xff] %vm565_vm0, %v3324_v40 }
 0x481   : > { %3355 = vst.msk [vmem:[%s6463_s27 + $0xe0] sm:$0xff] %vm565_vm0, %v3323_v59 }
 0x485   : > { %v3833_v9 = vpop.f32.mrb[66].mxu0 }
 0x486   : > { %v3292_v47 = vadd.f32 %v3833_v9, %v6455_v58  ;;  %v3286_v7 = vpop.f32.mrb[67].mxu0 }
 0x487   : > { %v3287_v2 = vadd.f32 %v6455_v58, %v3286_v7 }
 0x488   : > { %v3326_v43 = vadd.f32 %v4559_v20, %v3292_v47 }
 0x489   : > { %v3325_v51 = vadd.f32 %v4560_v33, %v3287_v2 }
 0x48a   : > { %3358 = vst.msk [vmem:[%s6463_s27 + $0xf8] sm:$0xff] %vm565_vm0, %v3326_v43 }
 0x48b   : > { %3357 = vst.msk [vmem:[%s6463_s27 + $0xf0] sm:$0xff] %vm565_vm0, %v3325_v51 }
 0x48c   : > { %4664 = shalt.err (!%p4661_p13)
}
 0x48d   : > { %s4665_s23 = scalar_lea.hbm %s6589_s25, 4096  ;;  %s4669_s20 = scalar_lea.hbm %s6726_s29, 8192 }
 0x48e   : > { %p4666_p11 = scmp.ne.s32.totalorder %s6589_s25, %s4665_s23  ;;  %p4670_p7 = scmp.lt.u32.totalorder %s6589_s25, %s6726_s29 }
 0x48f   : > { %p4671_p4 = scmp.lt.u32.totalorder %s4669_s20, %s4665_s23  ;;  %p4673_p0 = scmp.lt.u32.totalorder %s4665_s23, %s6589_s25 }
 0x490   : > { %p4667_p2 = pnand %p4666_p11, %p6727_p10 }
 0x491   : > { %p4672_p3 = por %p4671_p4, %p4670_p7 }
 0x492   : > { %p4668_p5 = pneg %p4667_p2 }
 0x493   : > { %p4674_p8 = por %p4673_p0, %p4672_p3 }
 0x495   : > { %p4675_p9 = pnand %p4674_p8, %p4668_p5 }
 0x497   : > { %4678 = shalt.err (!%p4675_p9)
}
 0x498   : > { %s4754_s11 = smov 128   ;;  %s4755_s19 = smov 8  }
 0x499   : > { %3905 = dma.vmem_to_hbm [thread:$0]  (%p6727_p10), %s6591_s1, 4096, %s6589_s25, %s3360_s18, %s4754_s11, %s4754_s11, %s4755_s19  }
 0x49a PF: > { %s6728_s27 = sld [smem:[#allocation14_spill]]  ;;  %s6729_s24 = sld [smem:[#allocation21_spill]] }
 0x49b   : > { %s6730_s10 = sld [smem:[#allocation17_spill]] }
 0x4a0   : > { %s3391_s9 = sand.u32 1, %s6728_s27   ;;  %p6731_p12 = scmp.ne.s32.totalorder %s6729_s24, 0 }
 0x4a1   : > { %p6732_p1 = scmp.ge.s32.totalorder %s6730_s10, 2  ;;  %s3392_s22 = scalar_lea.sflag [#allocation6], %s3391_s9 }
 0x4a3   : > { %p3918_p6 = pnand %p6732_p1, %p6731_p12 }
 0x4a5   : > { %4712 = dma.done.wait (!%p3918_p6), %s3392_s22, 4096  }
 0x4a6   : > { %4714 = vsyncadd (!%p3918_p6), %s3392_s22, 4294963200  ;;  %s30_s20 = sadd.s32 1, %s6730_s10   ;;  %s6733_s21 = sld [smem:[#allocation15_spill]] }
 0x4a7   : > { %p27_p13 = scmp.ge.s32.totalorder %s30_s20, 4   ;;  %s6734_s17 = sld [smem:[#allocation20_spill]] }
 0x4a8   : > { %s6735_s18 = sld [smem:[#allocation16_spill]]  ;;  %s6736_s19 = sld [smem:[#allocation18_spill]] }
 0x4a9   : > { %s6737_s15 = smov %s4721_s16  ;;  %29 = sbr.rel (!%p27_p13) target bundleno = 12 (0xc), region = 148 }
 0x4ac   : > { %s6738_s16 = smov %s6733_s21 }
 0x4b0   :  { %3397 = vsyncpa [#allocation5], 1 }
 0x4b1   :  { %3399 = vsyncpa [#allocation5 + $0x1], 1 }
 0x4b2   :  { %3400 = vsyncpa [#allocation8], 1 }
 0x4b3   :  { %3402 = vsyncpa [#allocation8 + $0x1], 1 }
 0x4b4   :  { %3403 = vsyncpa [#allocation6], 1 }
 0x4b5   :  { %3405 = vsyncpa [#allocation6 + $0x1], 1 }

</bundles_post_ra>
